<compile_context>
chip_gen: v5e
topology: v5e:2x2
jax: 0.10.0
libtpu: 0.0.40
codegen_flags: <defaults>
</compile_context>

<pallas_src>
import functools

import numpy as np
import jax
import jax.numpy as jnp
from jax.experimental import pallas as pl
from jax.experimental.pallas import tpu as pltpu


def _erf_approx(z):
    # Abramowitz & Stegun 7.1.26 (used to build exact-GELU).
    # TODO(synk): lax.erf lowering in Mosaic is not guaranteed; polynomial erf used instead.
    # Note: the approx reciprocal relaxes the 1.5e-7 bound to ~1e-3; fine at 2e-2 tolerance.
    a1, a2, a3, a4, a5 = 0.254829592, -0.284496736, 1.421413741, -1.453152027, 1.061405429
    p = 0.3275911
    sgn = jnp.where(z >= 0.0, 1.0, -1.0)
    za = jnp.abs(z)
    t = pl.reciprocal(1.0 + p * za, approx=True)          # EUP vrcp, frees VPU slot
    poly = ((((a5 * t + a4) * t + a3) * t + a2) * t + a1) * t
    return sgn * (1.0 - poly * jnp.exp(-za * za))


def _layer_norm(x, w, b, eps=1e-5):
    # f32 statistics; reuse (x - mu); single 1/D scale.
    d_inv = np.float32(1.0 / x.shape[-1])
    mu = jnp.sum(x, axis=-1, keepdims=True) * d_inv
    xc = x - mu
    var = jnp.sum(xc * xc, axis=-1, keepdims=True) * d_inv
    return xc * jax.lax.rsqrt(var + eps) * w + b


def _transformer_block_kernel(num_heads, head_dim,
                              x_ref, ln1_w_ref, ln1_b_ref,
                              wqkv_ref, cos_ref, sin_ref,
                              w1_ref, ln2_w_ref, ln2_b_ref,
                              w2_ref, b2_ref, w3_ref, b3_ref,
                              out_ref):
    S, D = x_ref.shape
    H, hd = num_heads, head_dim
    half = hd // 2
    x = x_ref[...].astype(jnp.float32)

    # ---- LayerNorm 1 + fused QKV projection (bf16 MXU, f32 accumulate) ------
    xn = _layer_norm(x, ln1_w_ref[...], ln1_b_ref[...])
    qkv = jnp.dot(xn.astype(jnp.bfloat16), wqkv_ref[...],
                  preferred_element_type=jnp.float32)            # (S, 3D) f32
    # NOTE: at real shapes D is a multiple of 128 so these lane-dim slices are tile-aligned.
    q = qkv[:, :D]
    k = qkv[:, D:2 * D]
    v = qkv[:, 2 * D:]

    def _to_heads(t):                                            # (S, D) -> (H, S, hd)
        return jnp.transpose(t.reshape(S, H, hd), (1, 0, 2))

    # ---- Rotary embedding (rotate-half layout, one roll, no mask/select) ----
    # wq/wk columns were permuted host-side to the rotate-half ordering and the +/- sign is
    # folded into sin_ref; the 1/sqrt(hd) softmax scale is folded into the wq columns.
    cos = cos_ref[...]          # (S, hd)
    sin = sin_ref[...]          # (S, hd), sign already applied

    def _rope(th):              # (H, S, hd) f32
        rot = pltpu.roll(th.reshape(H * S, hd), shift=half, axis=1).reshape(H, S, hd)
        return th * cos + rot * sin

    qh = _rope(_to_heads(q)).astype(jnp.bfloat16)
    kh = _rope(_to_heads(k)).astype(jnp.bfloat16)
    vh = _to_heads(v).astype(jnp.bfloat16)

    # ---- Multi-head attention (batched heads, deferred softmax normalization)
    # TODO(synk): flash-style KV tiling (grid axis over K/V tiles + m/l/acc scratch) is needed
    # once S is large enough that the (H,S,S) tiles stress VMEM; trivial at S=8.
    scores = jax.lax.dot_general(qh, kh, (((2,), (2,)), ((0,), (0,))),
                                 preferred_element_type=jnp.float32)   # (H, S, S)
    scores = scores - jnp.max(scores, axis=-1, keepdims=True)
    p = jnp.exp(scores)
    denom = jnp.sum(p, axis=-1, keepdims=True)                          # (H, S, 1) f32
    # dropout1 / dropout2 / dropout3: identity (inference semantics).
    ctx = jax.lax.dot_general(p.astype(jnp.bfloat16), vh,
                              (((2,), (1,)), ((0,), (0,))),
                              preferred_element_type=jnp.float32)       # (H, S, hd)
    # Normalize on H*S*hd elements instead of H*S*S (identical math, fewer VPU ops).
    ctx = ctx * pl.reciprocal(denom, approx=True)

    # ---- Head concat + fc1 as one (S,D)@(D,D) MXU matmul ---------------------
    # No (H,S,D) f32 intermediate; the H-reduction is MXU K-dim accumulation.
    ctx2 = jnp.transpose(ctx, (1, 0, 2)).reshape(S, D).astype(jnp.bfloat16)
    att = jnp.dot(ctx2, w1_ref[...], preferred_element_type=jnp.float32)  # (S, D)

    mlp_in = att + x

    # ---- LayerNorm 2 + exact-GELU MLP ----------------------------------------
    # TODO(synk): at real mlp_dim, stream w2/w3 tiles (pltpu.emit_pipeline / extra grid axis)
    # instead of holding both resident.
    y = _layer_norm(mlp_in, ln2_w_ref[...], ln2_b_ref[...])
    hdn = jnp.dot(y.astype(jnp.bfloat16), w2_ref[...],
                  preferred_element_type=jnp.float32) + b2_ref[...]
    hdn = 0.5 * hdn * (1.0 + _erf_approx(hdn * np.float32(1.0 / np.sqrt(2.0))))
    out = jnp.dot(hdn.astype(jnp.bfloat16), w3_ref[...],
                  preferred_element_type=jnp.float32) + b3_ref[...]
    out_ref[...] = (out + mlp_in).astype(out_ref.dtype)


def prepare_params(params, *, num_heads, seq_len, theta=10000.0):
    """One-time host-side weight/table prep (do NOT re-run per forward call)."""
    D = params["wq"].shape[0]
    assert D % num_heads == 0
    hd = D // num_heads
    assert hd % 2 == 0 and D % 2 == 0, "RoPE requires even head_dim / d_model"
    mlp_dim = params["w2"].shape[1]

    # Within-head column permutation: interleaved RoPE pairs -> rotate-half halves.
    # Applied identically to wq and wk only; q.k scores are invariant under a consistent
    # within-head permutation, so v / fc1 stay in the original ordering.
    perm_within = np.concatenate([np.arange(0, hd, 2), np.arange(1, hd, 2)])
    col_perm = (np.arange(num_heads)[:, None] * hd + perm_within[None, :]).reshape(-1)
    col_perm = jnp.asarray(col_perm, jnp.int32)

    scale = np.float32(1.0 / np.sqrt(float(hd)))
    wq = params["wq"][:, col_perm] * scale          # fold softmax scale into wq
    wk = params["wk"][:, col_perm]
    wqkv = jnp.concatenate([wq, wk, params["wv"]], axis=1).astype(jnp.bfloat16)  # (D, 3D)

    # Rotate-half RoPE tables in the permuted per-head layout; +/- sign folded into sin.
    inv_freq = 1.0 / (theta ** (np.arange(0, hd, 2, dtype=np.float32) / hd))
    t = np.arange(seq_len, dtype=np.float32)
    freqs = np.einsum("i,j->ij", t, inv_freq)                       # (S, hd // 2)
    cos_h = np.concatenate([np.cos(freqs), np.cos(freqs)], axis=-1)  # (S, hd)
    sin_h = np.concatenate([-np.sin(freqs), np.sin(freqs)], axis=-1)

    return {
        "num_heads": num_heads, "head_dim": hd, "mlp_dim": mlp_dim,
        "ln1_w": params["ln1_w"].astype(jnp.float32),
        "ln1_b": params["ln1_b"].astype(jnp.float32),
        "wqkv": wqkv,
        "cos": jnp.asarray(cos_h, jnp.float32),
        "sin": jnp.asarray(sin_h, jnp.float32),
        "w1": params["w1"].astype(jnp.bfloat16),
        "ln2_w": params["ln2_w"].astype(jnp.float32),
        "ln2_b": params["ln2_b"].astype(jnp.float32),
        "w2": params["w2"].astype(jnp.bfloat16),
        "b2": params["b2"].astype(jnp.float32),
        "w3": params["w3"].astype(jnp.bfloat16),
        "b3": params["b3"].astype(jnp.float32),
    }


def _pick_vmem_limit():
    # ~75% of physical VMEM: ~48 MiB on v7x (64 MiB/TC), ~96 MiB on v5e/v6e (128 MiB).
    try:
        cap = int(pltpu.get_tpu_info().vmem_capacity_bytes)
        return max(32 * 1024 * 1024, (cap * 3) // 4)
    except Exception:
        return 48 * 1024 * 1024


def transformer_block(x, prepped, *, single_buffer_weights=True):
    B, S, D = x.shape
    H = prepped["num_heads"]
    hd = prepped["head_dim"]
    mlp_dim = prepped["mlp_dim"]

    kernel = functools.partial(_transformer_block_kernel, H, hd)

    def invariant(shape):
        # Grid-invariant input: fetched once; single-buffered to halve weight VMEM.
        zeros = (0,) * len(shape)
        if single_buffer_weights:
            return pl.BlockSpec(shape, lambda b: zeros, pipeline_mode=pl.Buffered(1))
        return pl.BlockSpec(shape, lambda b: zeros)

    in_specs = [
        pl.BlockSpec((None, S, D), lambda b: (b, 0, 0)),   # x (batch dim squeezed)
        invariant((1, D)), invariant((1, D)),              # ln1 weight, bias (f32)
        invariant((D, 3 * D)),                             # fused QKV weight (bf16)
        invariant((S, hd)), invariant((S, hd)),            # rope cos, signed sin (f32)
        invariant((D, D)),                                 # fc1 weight (bf16)
        invariant((1, D)), invariant((1, D)),              # ln2 weight, bias (f32)
        invariant((D, mlp_dim)), invariant((1, mlp_dim)),  # fc2 weight (bf16), bias (f32)
        invariant((mlp_dim, D)), invariant((1, D)),        # fc3 weight (bf16), bias (f32)
    ]
    out_spec = pl.BlockSpec((None, S, D), lambda b: (b, 0, 0))

    flops = 2 * B * S * (4 * D * D + 2 * S * D + 2 * D * mlp_dim)
    transcendentals = B * (H * S * S + 2 * S * mlp_dim + S * H)
    bytes_accessed = (2 * B * S * D * 4                        # x in + out (f32), per step
                      + (4 * D * D + 2 * D * mlp_dim) * 2      # bf16 weights, fetched once
                      + (2 * S * hd + 5 * D + mlp_dim) * 4)    # f32 tables / LN / biases

    # TODO(synk): add a second "parallel" grid axis over sequence tiles (with K/V streamed or
    # precomputed) so both v7x TensorCores stay busy when B is small/odd.
    return pl.pallas_call(
        kernel,
        out_shape=jax.ShapeDtypeStruct((B, S, D), x.dtype),
        grid_spec=pltpu.PrefetchScalarGridSpec(
            num_scalar_prefetch=0,
            grid=(B,),
            in_specs=in_specs,
            out_specs=out_spec),
        compiler_params=pltpu.CompilerParams(
            dimension_semantics=("parallel",),
            vmem_limit_bytes=_pick_vmem_limit()),
        cost_estimate=pl.CostEstimate(
            flops=flops,
            transcendentals=transcendentals,
            bytes_accessed=bytes_accessed),
    )(x, prepped["ln1_w"], prepped["ln1_b"],
      prepped["wqkv"], prepped["cos"], prepped["sin"], prepped["w1"],
      prepped["ln2_w"], prepped["ln2_b"],
      prepped["w2"], prepped["b2"], prepped["w3"], prepped["b3"])


def reference(x, params, cos_hd, sin_hd, num_heads):
    # Pure-JAX f32 mirror of the PyTorch forward (eval mode) for verification.
    B, S, D = x.shape
    hd = D // num_heads

    def ln(v, w, b):
        mu = v.mean(-1, keepdims=True)
        var = ((v - mu) ** 2).mean(-1, keepdims=True)
        return (v - mu) / jnp.sqrt(var + 1e-5) * w + b

    xn = ln(x, params["ln1_w"], params["ln1_b"])
    q = (xn @ params["wq"]).reshape(B, S, num_heads, hd)
    k = (xn @ params["wk"]).reshape(B, S, num_heads, hd)
    v = (xn @ params["wv"]).reshape(B, S, num_heads, hd)

    def rope(t):
        x1 = t[..., 0::2]
        x2 = t[..., 1::2]
        rot = jnp.stack([-x2, x1], axis=-1).reshape(t.shape)
        return t * cos_hd[None, :, None, :] + rot * sin_hd[None, :, None, :]

    q, k = rope(q), rope(k)
    aw = jnp.einsum("bqhd,bkhd->bhqk", q, k) / np.sqrt(hd)
    aw = jax.nn.softmax(aw, axis=-1)
    ao = jnp.einsum("bhqk,bkhd->bqhd", aw, v).reshape(B, S, D)
    ao = ao @ params["w1"]
    mlp_in = ao + x
    y = ln(mlp_in, params["ln2_w"], params["ln2_b"])
    h = y @ params["w2"] + params["b2"]
    h = jax.nn.gelu(h, approximate=False)
    h = h @ params["w3"] + params["b3"]
    return h + mlp_in


if __name__ == "__main__":
    # Toy shapes for correctness; real deployments should use lane-aligned dims
    # (D, head_dim, mlp_dim multiples of 128/256) to avoid padded MXU passes.
    B, S, D = 2, 8, 32        # batch, seq, d_model
    NH, MLP = 4, 64           # nhead, mlp_dim
    HD = D // NH

    key = jax.random.PRNGKey(0)
    keys = jax.random.split(key, 13)
    s = 0.05
    params = {
        "ln1_w": 1.0 + 0.1 * jax.random.normal(keys[0], (1, D), jnp.float32),
        "ln1_b": 0.1 * jax.random.normal(keys[1], (1, D), jnp.float32),
        "wq": s * jax.random.normal(keys[2], (D, D), jnp.float32),
        "wk": s * jax.random.normal(keys[3], (D, D), jnp.float32),
        "wv": s * jax.random.normal(keys[4], (D, D), jnp.float32),
        "w1": s * jax.random.normal(keys[5], (D, D), jnp.float32),
        "ln2_w": 1.0 + 0.1 * jax.random.normal(keys[6], (1, D), jnp.float32),
        "ln2_b": 0.1 * jax.random.normal(keys[7], (1, D), jnp.float32),
        "w2": s * jax.random.normal(keys[8], (D, MLP), jnp.float32),
        "b2": s * jax.random.normal(keys[9], (1, MLP), jnp.float32),
        "w3": s * jax.random.normal(keys[10], (MLP, D), jnp.float32),
        "b3": s * jax.random.normal(keys[11], (1, D), jnp.float32),
    }
    x = jax.random.normal(keys[12], (B, S, D), jnp.float32)

    prepped = prepare_params(params, num_heads=NH, seq_len=S)

    try:
        out = jax.block_until_ready(transformer_block(x, prepped, single_buffer_weights=True))
    except Exception:
        # TODO(synk): this jax build does not accept pipeline_mode=pl.Buffered(1);
        # fall back to default double-buffering of the grid-invariant weights.
        out = jax.block_until_ready(transformer_block(x, prepped, single_buffer_weights=False))

    # Interleaved RoPE tables for the reference implementation (original module convention).
    inv_freq = 1.0 / (10000.0 ** (np.arange(0, HD, 2, dtype=np.float32) / HD))
    t = np.arange(S, dtype=np.float32)
    freqs = np.einsum("i,j->ij", t, inv_freq)
    cos_hd = jnp.asarray(np.repeat(np.cos(freqs), 2, axis=-1))
    sin_hd = jnp.asarray(np.repeat(np.sin(freqs), 2, axis=-1))

    ref = reference(x, params, cos_hd, sin_hd, NH)
    assert out.shape == (B, S, D)
    # Tolerance reflects bf16 MXU operands (f32 accumulate) and EUP approximate reciprocals.
    np.testing.assert_allclose(np.asarray(out), np.asarray(ref), rtol=2e-2, atol=2e-2)
    print("KERNEL_OK")
</pallas_src>

<mosaic_0001>
module attributes {stable_mosaic.version = 11 : i64} {
  func.func @_transformer_block_kernel(%arg0: i32, %arg1: memref<1x8x32xf32, #tpu.memory_space<vmem>>, %arg2: memref<1x32xf32, #tpu.memory_space<vmem>>, %arg3: memref<1x32xf32, #tpu.memory_space<vmem>>, %arg4: memref<32x96xbf16, #tpu.memory_space<vmem>>, %arg5: memref<8x8xf32, #tpu.memory_space<vmem>>, %arg6: memref<8x8xf32, #tpu.memory_space<vmem>>, %arg7: memref<32x32xbf16, #tpu.memory_space<vmem>>, %arg8: memref<1x32xf32, #tpu.memory_space<vmem>>, %arg9: memref<1x32xf32, #tpu.memory_space<vmem>>, %arg10: memref<32x64xbf16, #tpu.memory_space<vmem>>, %arg11: memref<1x64xf32, #tpu.memory_space<vmem>>, %arg12: memref<64x32xbf16, #tpu.memory_space<vmem>>, %arg13: memref<1x32xf32, #tpu.memory_space<vmem>>, %arg14: memref<1x8x32xf32, #tpu.memory_space<vmem>>) attributes {dimension_semantics = [#tpu.dimension_semantics<parallel>], iteration_bounds = array<i64: 2>, scalar_prefetch = 0 : i64, scratch_operands = 0 : i64, tpu.core_type = #tpu.core_type<tc>, window_params = [{transform_indices = @transform_0, window_bounds = array<i64: 1, 8, 32>}, {pipeline_mode = #tpu.pipeline_mode<synchronous>, transform_indices = @transform_1, window_bounds = array<i64: 1, 32>}, {pipeline_mode = #tpu.pipeline_mode<synchronous>, transform_indices = @transform_2, window_bounds = array<i64: 1, 32>}, {pipeline_mode = #tpu.pipeline_mode<synchronous>, transform_indices = @transform_3, window_bounds = array<i64: 32, 96>}, {pipeline_mode = #tpu.pipeline_mode<synchronous>, transform_indices = @transform_4, window_bounds = array<i64: 8, 8>}, {pipeline_mode = #tpu.pipeline_mode<synchronous>, transform_indices = @transform_5, window_bounds = array<i64: 8, 8>}, {pipeline_mode = #tpu.pipeline_mode<synchronous>, transform_indices = @transform_6, window_bounds = array<i64: 32, 32>}, {pipeline_mode = #tpu.pipeline_mode<synchronous>, transform_indices = @transform_7, window_bounds = array<i64: 1, 32>}, {pipeline_mode = #tpu.pipeline_mode<synchronous>, transform_indices = @transform_8, window_bounds = array<i64: 1, 32>}, {pipeline_mode = #tpu.pipeline_mode<synchronous>, transform_indices = @transform_9, window_bounds = array<i64: 32, 64>}, {pipeline_mode = #tpu.pipeline_mode<synchronous>, transform_indices = @transform_10, window_bounds = array<i64: 1, 64>}, {pipeline_mode = #tpu.pipeline_mode<synchronous>, transform_indices = @transform_11, window_bounds = array<i64: 64, 32>}, {pipeline_mode = #tpu.pipeline_mode<synchronous>, transform_indices = @transform_12, window_bounds = array<i64: 1, 32>}, {transform_indices = @transform_13, window_bounds = array<i64: 1, 8, 32>}]} {
    %c0 = arith.constant 0 : index
    %c0_0 = arith.constant 0 : index
    %c0_1 = arith.constant 0 : index
    %0 = vector.load %arg1[%c0, %c0_0, %c0_1] : memref<1x8x32xf32, #tpu.memory_space<vmem>>, vector<1x8x32xf32>
    %1 = vector.shape_cast %0 : vector<1x8x32xf32> to vector<8x32xf32>
    %c0_2 = arith.constant 0 : index
    %c0_3 = arith.constant 0 : index
    %2 = vector.load %arg2[%c0_2, %c0_3] : memref<1x32xf32, #tpu.memory_space<vmem>>, vector<1x32xf32>
    %c0_4 = arith.constant 0 : index
    %c0_5 = arith.constant 0 : index
    %3 = vector.load %arg3[%c0_4, %c0_5] : memref<1x32xf32, #tpu.memory_space<vmem>>, vector<1x32xf32>
    %cst = arith.constant dense<0.000000e+00> : vector<8xf32>
    %4 = vector.multi_reduction <add>, %1, %cst [1] : vector<8x32xf32> to vector<8xf32>
    %5 = vector.shape_cast %4 : vector<8xf32> to vector<8x1xf32>
    %cst_6 = arith.constant 3.125000e-02 : f32
    %6 = vector.broadcast %cst_6 : f32 to vector<8x1xf32>
    %7 = arith.mulf %5, %6 : vector<8x1xf32>
    %8 = vector.broadcast %7 : vector<8x1xf32> to vector<8x32xf32>
    %9 = arith.subf %1, %8 : vector<8x32xf32>
    %10 = arith.mulf %9, %9 : vector<8x32xf32>
    %cst_7 = arith.constant dense<0.000000e+00> : vector<8xf32>
    %11 = vector.multi_reduction <add>, %10, %cst_7 [1] : vector<8x32xf32> to vector<8xf32>
    %12 = vector.shape_cast %11 : vector<8xf32> to vector<8x1xf32>
    %cst_8 = arith.constant 3.125000e-02 : f32
    %13 = vector.broadcast %cst_8 : f32 to vector<8x1xf32>
    %14 = arith.mulf %12, %13 : vector<8x1xf32>
    %cst_9 = arith.constant 9.99999974E-6 : f32
    %15 = vector.broadcast %cst_9 : f32 to vector<8x1xf32>
    %16 = arith.addf %14, %15 : vector<8x1xf32>
    %17 = math.rsqrt %16 : vector<8x1xf32>
    %18 = vector.broadcast %17 : vector<8x1xf32> to vector<8x32xf32>
    %19 = arith.mulf %9, %18 : vector<8x32xf32>
    %20 = vector.broadcast %2 : vector<1x32xf32> to vector<8x32xf32>
    %21 = arith.mulf %19, %20 : vector<8x32xf32>
    %22 = vector.broadcast %3 : vector<1x32xf32> to vector<8x32xf32>
    %23 = arith.addf %21, %22 : vector<8x32xf32>
    %24 = arith.truncf %23 : vector<8x32xf32> to vector<8x32xbf16>
    %c0_10 = arith.constant 0 : index
    %c0_11 = arith.constant 0 : index
    %25 = vector.load %arg4[%c0_10, %c0_11] : memref<32x96xbf16, #tpu.memory_space<vmem>>, vector<32x96xbf16>
    %cst_12 = arith.constant dense<0.000000e+00> : vector<8x96xf32>
    %26 = tpu.matmul %24, %25, %cst_12 {dimension_numbers = #tpu.dot_dimension_numbers<[1], [0], [0], [1], [0, 0, 1, 1], [], []>} : vector<8x32xbf16>, vector<32x96xbf16>, vector<8x96xf32> -> vector<8x96xf32>
    %27 = vector.extract_strided_slice %26 {offsets = [0, 0], sizes = [8, 32], strides = [1, 1]} : vector<8x96xf32> to vector<8x32xf32>
    %28 = vector.extract_strided_slice %26 {offsets = [0, 32], sizes = [8, 32], strides = [1, 1]} : vector<8x96xf32> to vector<8x32xf32>
    %29 = vector.extract_strided_slice %26 {offsets = [0, 64], sizes = [8, 32], strides = [1, 1]} : vector<8x96xf32> to vector<8x32xf32>
    %c0_13 = arith.constant 0 : index
    %c0_14 = arith.constant 0 : index
    %30 = vector.load %arg5[%c0_13, %c0_14] : memref<8x8xf32, #tpu.memory_space<vmem>>, vector<8x8xf32>
    %c0_15 = arith.constant 0 : index
    %c0_16 = arith.constant 0 : index
    %31 = vector.load %arg6[%c0_15, %c0_16] : memref<8x8xf32, #tpu.memory_space<vmem>>, vector<8x8xf32>
    %32 = vector.shape_cast %27 : vector<8x32xf32> to vector<8x4x8xf32>
    %33 = tpu.transpose %32, [1, 0, 2] : vector<8x4x8xf32> -> vector<4x8x8xf32>
    %34 = vector.shape_cast %33 : vector<4x8x8xf32> to vector<32x8xf32>
    %c4_i32 = arith.constant 4 : i32
    %35 = tpu.dynamic_rotate %34 by %c4_i32 dim 1 : vector<32x8xf32>, i32 -> vector<32x8xf32>
    %36 = vector.shape_cast %35 : vector<32x8xf32> to vector<4x8x8xf32>
    %37 = vector.shape_cast %30 : vector<8x8xf32> to vector<1x8x8xf32>
    %38 = vector.broadcast %37 : vector<1x8x8xf32> to vector<4x8x8xf32>
    %39 = arith.mulf %33, %38 : vector<4x8x8xf32>
    %40 = vector.shape_cast %31 : vector<8x8xf32> to vector<1x8x8xf32>
    %41 = vector.broadcast %40 : vector<1x8x8xf32> to vector<4x8x8xf32>
    %42 = arith.mulf %36, %41 : vector<4x8x8xf32>
    %43 = arith.addf %39, %42 : vector<4x8x8xf32>
    %44 = arith.truncf %43 : vector<4x8x8xf32> to vector<4x8x8xbf16>
    %45 = vector.shape_cast %28 : vector<8x32xf32> to vector<8x4x8xf32>
    %46 = tpu.transpose %45, [1, 0, 2] : vector<8x4x8xf32> -> vector<4x8x8xf32>
    %47 = vector.shape_cast %46 : vector<4x8x8xf32> to vector<32x8xf32>
    %c4_i32_17 = arith.constant 4 : i32
    %48 = tpu.dynamic_rotate %47 by %c4_i32_17 dim 1 : vector<32x8xf32>, i32 -> vector<32x8xf32>
    %49 = vector.shape_cast %48 : vector<32x8xf32> to vector<4x8x8xf32>
    %50 = vector.shape_cast %30 : vector<8x8xf32> to vector<1x8x8xf32>
    %51 = vector.broadcast %50 : vector<1x8x8xf32> to vector<4x8x8xf32>
    %52 = arith.mulf %46, %51 : vector<4x8x8xf32>
    %53 = vector.shape_cast %31 : vector<8x8xf32> to vector<1x8x8xf32>
    %54 = vector.broadcast %53 : vector<1x8x8xf32> to vector<4x8x8xf32>
    %55 = arith.mulf %49, %54 : vector<4x8x8xf32>
    %56 = arith.addf %52, %55 : vector<4x8x8xf32>
    %57 = arith.truncf %56 : vector<4x8x8xf32> to vector<4x8x8xbf16>
    %58 = vector.shape_cast %29 : vector<8x32xf32> to vector<8x4x8xf32>
    %59 = tpu.transpose %58, [1, 0, 2] : vector<8x4x8xf32> -> vector<4x8x8xf32>
    %60 = arith.truncf %59 : vector<4x8x8xf32> to vector<4x8x8xbf16>
    %cst_18 = arith.constant dense<0.000000e+00> : vector<4x8x8xf32>
    %61 = tpu.matmul %44, %57, %cst_18 {dimension_numbers = #tpu.dot_dimension_numbers<[2], [2], [1], [1], [0, 0, 0, 1, 1, 1], [0], [0]>} : vector<4x8x8xbf16>, vector<4x8x8xbf16>, vector<4x8x8xf32> -> vector<4x8x8xf32>
    %cst_19 = arith.constant dense<0xFF800000> : vector<4x8xf32>
    %62 = vector.multi_reduction <maximumf>, %61, %cst_19 [2] : vector<4x8x8xf32> to vector<4x8xf32>
    %63 = vector.shape_cast %62 : vector<4x8xf32> to vector<4x8x1xf32>
    %64 = vector.broadcast %63 : vector<4x8x1xf32> to vector<4x8x8xf32>
    %65 = arith.subf %61, %64 : vector<4x8x8xf32>
    %66 = math.exp %65 : vector<4x8x8xf32>
    %cst_20 = arith.constant dense<0.000000e+00> : vector<4x8xf32>
    %67 = vector.multi_reduction <add>, %66, %cst_20 [2] : vector<4x8x8xf32> to vector<4x8xf32>
    %68 = vector.shape_cast %67 : vector<4x8xf32> to vector<4x8x1xf32>
    %69 = arith.truncf %66 : vector<4x8x8xf32> to vector<4x8x8xbf16>
    %cst_21 = arith.constant dense<0.000000e+00> : vector<4x8x8xf32>
    %70 = tpu.matmul %69, %60, %cst_21 {dimension_numbers = #tpu.dot_dimension_numbers<[2], [1], [1], [2], [0, 0, 0, 1, 1, 2], [0], [0]>} : vector<4x8x8xbf16>, vector<4x8x8xbf16>, vector<4x8x8xf32> -> vector<4x8x8xf32>
    %71 = tpu.reciprocal %68 {approx = true} : vector<4x8x1xf32> -> vector<4x8x1xf32>
    %72 = vector.broadcast %71 : vector<4x8x1xf32> to vector<4x8x8xf32>
    %73 = arith.mulf %70, %72 : vector<4x8x8xf32>
    %74 = tpu.transpose %73, [1, 0, 2] : vector<4x8x8xf32> -> vector<8x4x8xf32>
    %75 = vector.shape_cast %74 : vector<8x4x8xf32> to vector<8x32xf32>
    %76 = arith.truncf %75 : vector<8x32xf32> to vector<8x32xbf16>
    %c0_22 = arith.constant 0 : index
    %c0_23 = arith.constant 0 : index
    %77 = vector.load %arg7[%c0_22, %c0_23] : memref<32x32xbf16, #tpu.memory_space<vmem>>, vector<32x32xbf16>
    %cst_24 = arith.constant dense<0.000000e+00> : vector<8x32xf32>
    %78 = tpu.matmul %76, %77, %cst_24 {dimension_numbers = #tpu.dot_dimension_numbers<[1], [0], [0], [1], [0, 0, 1, 1], [], []>} : vector<8x32xbf16>, vector<32x32xbf16>, vector<8x32xf32> -> vector<8x32xf32>
    %79 = arith.addf %78, %1 : vector<8x32xf32>
    %c0_25 = arith.constant 0 : index
    %c0_26 = arith.constant 0 : index
    %80 = vector.load %arg8[%c0_25, %c0_26] : memref<1x32xf32, #tpu.memory_space<vmem>>, vector<1x32xf32>
    %c0_27 = arith.constant 0 : index
    %c0_28 = arith.constant 0 : index
    %81 = vector.load %arg9[%c0_27, %c0_28] : memref<1x32xf32, #tpu.memory_space<vmem>>, vector<1x32xf32>
    %cst_29 = arith.constant dense<0.000000e+00> : vector<8xf32>
    %82 = vector.multi_reduction <add>, %79, %cst_29 [1] : vector<8x32xf32> to vector<8xf32>
    %83 = vector.shape_cast %82 : vector<8xf32> to vector<8x1xf32>
    %cst_30 = arith.constant 3.125000e-02 : f32
    %84 = vector.broadcast %cst_30 : f32 to vector<8x1xf32>
    %85 = arith.mulf %83, %84 : vector<8x1xf32>
    %86 = vector.broadcast %85 : vector<8x1xf32> to vector<8x32xf32>
    %87 = arith.subf %79, %86 : vector<8x32xf32>
    %88 = arith.mulf %87, %87 : vector<8x32xf32>
    %cst_31 = arith.constant dense<0.000000e+00> : vector<8xf32>
    %89 = vector.multi_reduction <add>, %88, %cst_31 [1] : vector<8x32xf32> to vector<8xf32>
    %90 = vector.shape_cast %89 : vector<8xf32> to vector<8x1xf32>
    %cst_32 = arith.constant 3.125000e-02 : f32
    %91 = vector.broadcast %cst_32 : f32 to vector<8x1xf32>
    %92 = arith.mulf %90, %91 : vector<8x1xf32>
    %cst_33 = arith.constant 9.99999974E-6 : f32
    %93 = vector.broadcast %cst_33 : f32 to vector<8x1xf32>
    %94 = arith.addf %92, %93 : vector<8x1xf32>
    %95 = math.rsqrt %94 : vector<8x1xf32>
    %96 = vector.broadcast %95 : vector<8x1xf32> to vector<8x32xf32>
    %97 = arith.mulf %87, %96 : vector<8x32xf32>
    %98 = vector.broadcast %80 : vector<1x32xf32> to vector<8x32xf32>
    %99 = arith.mulf %97, %98 : vector<8x32xf32>
    %100 = vector.broadcast %81 : vector<1x32xf32> to vector<8x32xf32>
    %101 = arith.addf %99, %100 : vector<8x32xf32>
    %102 = arith.truncf %101 : vector<8x32xf32> to vector<8x32xbf16>
    %c0_34 = arith.constant 0 : index
    %c0_35 = arith.constant 0 : index
    %103 = vector.load %arg10[%c0_34, %c0_35] : memref<32x64xbf16, #tpu.memory_space<vmem>>, vector<32x64xbf16>
    %cst_36 = arith.constant dense<0.000000e+00> : vector<8x64xf32>
    %104 = tpu.matmul %102, %103, %cst_36 {dimension_numbers = #tpu.dot_dimension_numbers<[1], [0], [0], [1], [0, 0, 1, 1], [], []>} : vector<8x32xbf16>, vector<32x64xbf16>, vector<8x64xf32> -> vector<8x64xf32>
    %c0_37 = arith.constant 0 : index
    %c0_38 = arith.constant 0 : index
    %105 = vector.load %arg11[%c0_37, %c0_38] : memref<1x64xf32, #tpu.memory_space<vmem>>, vector<1x64xf32>
    %106 = vector.broadcast %105 : vector<1x64xf32> to vector<8x64xf32>
    %107 = arith.addf %104, %106 : vector<8x64xf32>
    %cst_39 = arith.constant 5.000000e-01 : f32
    %108 = vector.broadcast %cst_39 : f32 to vector<8x64xf32>
    %109 = arith.mulf %108, %107 : vector<8x64xf32>
    %cst_40 = arith.constant 0.707106769 : f32
    %110 = vector.broadcast %cst_40 : f32 to vector<8x64xf32>
    %111 = arith.mulf %107, %110 : vector<8x64xf32>
    %cst_41 = arith.constant 0.000000e+00 : f32
    %112 = vector.broadcast %cst_41 : f32 to vector<8x64xf32>
    %113 = arith.cmpf oge, %111, %112 : vector<8x64xf32>
    %cst_42 = arith.constant 1.000000e+00 : f32
    %cst_43 = arith.constant -1.000000e+00 : f32
    %114 = vector.broadcast %cst_42 : f32 to vector<8x64xf32>
    %115 = vector.broadcast %cst_43 : f32 to vector<8x64xf32>
    %116 = arith.select %113, %114, %115 : vector<8x64xi1>, vector<8x64xf32>
    %117 = math.absf %111 : vector<8x64xf32>
    %cst_44 = arith.constant 0.327591091 : f32
    %118 = vector.broadcast %cst_44 : f32 to vector<8x64xf32>
    %119 = arith.mulf %118, %117 : vector<8x64xf32>
    %cst_45 = arith.constant 1.000000e+00 : f32
    %120 = vector.broadcast %cst_45 : f32 to vector<8x64xf32>
    %121 = arith.addf %120, %119 : vector<8x64xf32>
    %122 = tpu.reciprocal %121 {approx = true} : vector<8x64xf32> -> vector<8x64xf32>
    %cst_46 = arith.constant 1.06140542 : f32
    %123 = vector.broadcast %cst_46 : f32 to vector<8x64xf32>
    %124 = arith.mulf %123, %122 : vector<8x64xf32>
    %cst_47 = arith.constant -1.45315206 : f32
    %125 = vector.broadcast %cst_47 : f32 to vector<8x64xf32>
    %126 = arith.addf %124, %125 : vector<8x64xf32>
    %127 = arith.mulf %126, %122 : vector<8x64xf32>
    %cst_48 = arith.constant 1.42141378 : f32
    %128 = vector.broadcast %cst_48 : f32 to vector<8x64xf32>
    %129 = arith.addf %127, %128 : vector<8x64xf32>
    %130 = arith.mulf %129, %122 : vector<8x64xf32>
    %cst_49 = arith.constant -0.284496725 : f32
    %131 = vector.broadcast %cst_49 : f32 to vector<8x64xf32>
    %132 = arith.addf %130, %131 : vector<8x64xf32>
    %133 = arith.mulf %132, %122 : vector<8x64xf32>
    %cst_50 = arith.constant 0.254829586 : f32
    %134 = vector.broadcast %cst_50 : f32 to vector<8x64xf32>
    %135 = arith.addf %133, %134 : vector<8x64xf32>
    %136 = arith.mulf %135, %122 : vector<8x64xf32>
    %cst_51 = arith.constant 0.000000e+00 : f32
    %137 = vector.broadcast %cst_51 : f32 to vector<8x64xf32>
    %138 = arith.subf %137, %117 : vector<8x64xf32>
    %139 = arith.mulf %138, %117 : vector<8x64xf32>
    %140 = math.exp %139 : vector<8x64xf32>
    %141 = arith.mulf %136, %140 : vector<8x64xf32>
    %cst_52 = arith.constant 1.000000e+00 : f32
    %142 = vector.broadcast %cst_52 : f32 to vector<8x64xf32>
    %143 = arith.subf %142, %141 : vector<8x64xf32>
    %144 = arith.mulf %116, %143 : vector<8x64xf32>
    %cst_53 = arith.constant 1.000000e+00 : f32
    %145 = vector.broadcast %cst_53 : f32 to vector<8x64xf32>
    %146 = arith.addf %145, %144 : vector<8x64xf32>
    %147 = arith.mulf %109, %146 : vector<8x64xf32>
    %148 = arith.truncf %147 : vector<8x64xf32> to vector<8x64xbf16>
    %c0_54 = arith.constant 0 : index
    %c0_55 = arith.constant 0 : index
    %149 = vector.load %arg12[%c0_54, %c0_55] : memref<64x32xbf16, #tpu.memory_space<vmem>>, vector<64x32xbf16>
    %cst_56 = arith.constant dense<0.000000e+00> : vector<8x32xf32>
    %150 = tpu.matmul %148, %149, %cst_56 {dimension_numbers = #tpu.dot_dimension_numbers<[1], [0], [0], [1], [0, 0, 1, 1], [], []>} : vector<8x64xbf16>, vector<64x32xbf16>, vector<8x32xf32> -> vector<8x32xf32>
    %c0_57 = arith.constant 0 : index
    %c0_58 = arith.constant 0 : index
    %151 = vector.load %arg13[%c0_57, %c0_58] : memref<1x32xf32, #tpu.memory_space<vmem>>, vector<1x32xf32>
    %152 = vector.broadcast %151 : vector<1x32xf32> to vector<8x32xf32>
    %153 = arith.addf %150, %152 : vector<8x32xf32>
    %154 = arith.addf %153, %79 : vector<8x32xf32>
    %c0_59 = arith.constant 0 : index
    %c0_60 = arith.constant 0 : index
    %c0_61 = arith.constant 0 : index
    %155 = vector.load %arg14[%c0_59, %c0_60, %c0_61] : memref<1x8x32xf32, #tpu.memory_space<vmem>>, vector<1x8x32xf32>
    %156 = vector.shape_cast %155 : vector<1x8x32xf32> to vector<8x32xf32>
    %157 = vector.shape_cast %154 : vector<8x32xf32> to vector<1x8x32xf32>
    tpu.vector_store %arg14[%c0_59, %c0_60, %c0_61], %157 {strides = array<i32>} : memref<1x8x32xf32, #tpu.memory_space<vmem>>, vector<1x8x32xf32>,
    return
  }
  func.func @transform_0(%arg0: i32) -> (i32, i32, i32) {
    %c0_i32 = arith.constant 0 : i32
    %c0_i32_0 = arith.constant 0 : i32
    %c0_i32_1 = arith.constant 0 : i32
    return %arg0, %c0_i32, %c0_i32_0 : i32, i32, i32
  }
  func.func @transform_1(%arg0: i32) -> (i32, i32) {
    %c0_i32 = arith.constant 0 : i32
    %c0_i32_0 = arith.constant 0 : i32
    %c0_i32_1 = arith.constant 0 : i32
    return %c0_i32, %c0_i32_0 : i32, i32
  }
  func.func @transform_2(%arg0: i32) -> (i32, i32) {
    %c0_i32 = arith.constant 0 : i32
    %c0_i32_0 = arith.constant 0 : i32
    %c0_i32_1 = arith.constant 0 : i32
    return %c0_i32, %c0_i32_0 : i32, i32
  }
  func.func @transform_3(%arg0: i32) -> (i32, i32) {
    %c0_i32 = arith.constant 0 : i32
    %c0_i32_0 = arith.constant 0 : i32
    %c0_i32_1 = arith.constant 0 : i32
    return %c0_i32, %c0_i32_0 : i32, i32
  }
  func.func @transform_4(%arg0: i32) -> (i32, i32) {
    %c0_i32 = arith.constant 0 : i32
    %c0_i32_0 = arith.constant 0 : i32
    %c0_i32_1 = arith.constant 0 : i32
    return %c0_i32, %c0_i32_0 : i32, i32
  }
  func.func @transform_5(%arg0: i32) -> (i32, i32) {
    %c0_i32 = arith.constant 0 : i32
    %c0_i32_0 = arith.constant 0 : i32
    %c0_i32_1 = arith.constant 0 : i32
    return %c0_i32, %c0_i32_0 : i32, i32
  }
  func.func @transform_6(%arg0: i32) -> (i32, i32) {
    %c0_i32 = arith.constant 0 : i32
    %c0_i32_0 = arith.constant 0 : i32
    %c0_i32_1 = arith.constant 0 : i32
    return %c0_i32, %c0_i32_0 : i32, i32
  }
  func.func @transform_7(%arg0: i32) -> (i32, i32) {
    %c0_i32 = arith.constant 0 : i32
    %c0_i32_0 = arith.constant 0 : i32
    %c0_i32_1 = arith.constant 0 : i32
    return %c0_i32, %c0_i32_0 : i32, i32
  }
  func.func @transform_8(%arg0: i32) -> (i32, i32) {
    %c0_i32 = arith.constant 0 : i32
    %c0_i32_0 = arith.constant 0 : i32
    %c0_i32_1 = arith.constant 0 : i32
    return %c0_i32, %c0_i32_0 : i32, i32
  }
  func.func @transform_9(%arg0: i32) -> (i32, i32) {
    %c0_i32 = arith.constant 0 : i32
    %c0_i32_0 = arith.constant 0 : i32
    %c0_i32_1 = arith.constant 0 : i32
    return %c0_i32, %c0_i32_0 : i32, i32
  }
  func.func @transform_10(%arg0: i32) -> (i32, i32) {
    %c0_i32 = arith.constant 0 : i32
    %c0_i32_0 = arith.constant 0 : i32
    %c0_i32_1 = arith.constant 0 : i32
    return %c0_i32, %c0_i32_0 : i32, i32
  }
  func.func @transform_11(%arg0: i32) -> (i32, i32) {
    %c0_i32 = arith.constant 0 : i32
    %c0_i32_0 = arith.constant 0 : i32
    %c0_i32_1 = arith.constant 0 : i32
    return %c0_i32, %c0_i32_0 : i32, i32
  }
  func.func @transform_12(%arg0: i32) -> (i32, i32) {
    %c0_i32 = arith.constant 0 : i32
    %c0_i32_0 = arith.constant 0 : i32
    %c0_i32_1 = arith.constant 0 : i32
    return %c0_i32, %c0_i32_0 : i32, i32
  }
  func.func @transform_13(%arg0: i32) -> (i32, i32, i32) {
    %c0_i32 = arith.constant 0 : i32
    %c0_i32_0 = arith.constant 0 : i32
    %c0_i32_1 = arith.constant 0 : i32
    return %arg0, %c0_i32, %c0_i32_0 : i32, i32, i32
  }
}

module attributes {stable_mosaic.version = 11 : i64} {
  func.func @_transformer_block_kernel(%arg0: i32, %arg1: memref<1x8x32xf32, #tpu.memory_space<vmem>>, %arg2: memref<1x32xf32, #tpu.memory_space<vmem>>, %arg3: memref<1x32xf32, #tpu.memory_space<vmem>>, %arg4: memref<32x96xbf16, #tpu.memory_space<vmem>>, %arg5: memref<8x8xf32, #tpu.memory_space<vmem>>, %arg6: memref<8x8xf32, #tpu.memory_space<vmem>>, %arg7: memref<32x32xbf16, #tpu.memory_space<vmem>>, %arg8: memref<1x32xf32, #tpu.memory_space<vmem>>, %arg9: memref<1x32xf32, #tpu.memory_space<vmem>>, %arg10: memref<32x64xbf16, #tpu.memory_space<vmem>>, %arg11: memref<1x64xf32, #tpu.memory_space<vmem>>, %arg12: memref<64x32xbf16, #tpu.memory_space<vmem>>, %arg13: memref<1x32xf32, #tpu.memory_space<vmem>>, %arg14: memref<1x8x32xf32, #tpu.memory_space<vmem>>) attributes {dimension_semantics = [#tpu.dimension_semantics<parallel>], iteration_bounds = array<i64: 2>, scalar_prefetch = 0 : i64, scratch_operands = 0 : i64, tpu.core_type = #tpu.core_type<tc>, window_params = [{transform_indices = @transform_0, window_bounds = array<i64: 1, 8, 32>}, {pipeline_mode = #tpu.pipeline_mode<synchronous>, transform_indices = @transform_1, window_bounds = array<i64: 1, 32>}, {pipeline_mode = #tpu.pipeline_mode<synchronous>, transform_indices = @transform_2, window_bounds = array<i64: 1, 32>}, {pipeline_mode = #tpu.pipeline_mode<synchronous>, transform_indices = @transform_3, window_bounds = array<i64: 32, 96>}, {pipeline_mode = #tpu.pipeline_mode<synchronous>, transform_indices = @transform_4, window_bounds = array<i64: 8, 8>}, {pipeline_mode = #tpu.pipeline_mode<synchronous>, transform_indices = @transform_5, window_bounds = array<i64: 8, 8>}, {pipeline_mode = #tpu.pipeline_mode<synchronous>, transform_indices = @transform_6, window_bounds = array<i64: 32, 32>}, {pipeline_mode = #tpu.pipeline_mode<synchronous>, transform_indices = @transform_7, window_bounds = array<i64: 1, 32>}, {pipeline_mode = #tpu.pipeline_mode<synchronous>, transform_indices = @transform_8, window_bounds = array<i64: 1, 32>}, {pipeline_mode = #tpu.pipeline_mode<synchronous>, transform_indices = @transform_9, window_bounds = array<i64: 32, 64>}, {pipeline_mode = #tpu.pipeline_mode<synchronous>, transform_indices = @transform_10, window_bounds = array<i64: 1, 64>}, {pipeline_mode = #tpu.pipeline_mode<synchronous>, transform_indices = @transform_11, window_bounds = array<i64: 64, 32>}, {pipeline_mode = #tpu.pipeline_mode<synchronous>, transform_indices = @transform_12, window_bounds = array<i64: 1, 32>}, {transform_indices = @transform_13, window_bounds = array<i64: 1, 8, 32>}]} {
    %c0 = arith.constant 0 : index
    %c0_0 = arith.constant 0 : index
    %c0_1 = arith.constant 0 : index
    %0 = vector.load %arg1[%c0, %c0_0, %c0_1] : memref<1x8x32xf32, #tpu.memory_space<vmem>>, vector<1x8x32xf32>
    %1 = vector.shape_cast %0 : vector<1x8x32xf32> to vector<8x32xf32>
    %c0_2 = arith.constant 0 : index
    %c0_3 = arith.constant 0 : index
    %2 = vector.load %arg2[%c0_2, %c0_3] : memref<1x32xf32, #tpu.memory_space<vmem>>, vector<1x32xf32>
    %c0_4 = arith.constant 0 : index
    %c0_5 = arith.constant 0 : index
    %3 = vector.load %arg3[%c0_4, %c0_5] : memref<1x32xf32, #tpu.memory_space<vmem>>, vector<1x32xf32>
    %cst = arith.constant dense<0.000000e+00> : vector<8xf32>
    %4 = vector.multi_reduction <add>, %1, %cst [1] : vector<8x32xf32> to vector<8xf32>
    %5 = vector.shape_cast %4 : vector<8xf32> to vector<8x1xf32>
    %cst_6 = arith.constant 3.125000e-02 : f32
    %6 = vector.broadcast %cst_6 : f32 to vector<8x1xf32>
    %7 = arith.mulf %5, %6 : vector<8x1xf32>
    %8 = vector.broadcast %7 : vector<8x1xf32> to vector<8x32xf32>
    %9 = arith.subf %1, %8 : vector<8x32xf32>
    %10 = arith.mulf %9, %9 : vector<8x32xf32>
    %cst_7 = arith.constant dense<0.000000e+00> : vector<8xf32>
    %11 = vector.multi_reduction <add>, %10, %cst_7 [1] : vector<8x32xf32> to vector<8xf32>
    %12 = vector.shape_cast %11 : vector<8xf32> to vector<8x1xf32>
    %cst_8 = arith.constant 3.125000e-02 : f32
    %13 = vector.broadcast %cst_8 : f32 to vector<8x1xf32>
    %14 = arith.mulf %12, %13 : vector<8x1xf32>
    %cst_9 = arith.constant 9.99999974E-6 : f32
    %15 = vector.broadcast %cst_9 : f32 to vector<8x1xf32>
    %16 = arith.addf %14, %15 : vector<8x1xf32>
    %17 = math.rsqrt %16 : vector<8x1xf32>
    %18 = vector.broadcast %17 : vector<8x1xf32> to vector<8x32xf32>
    %19 = arith.mulf %9, %18 : vector<8x32xf32>
    %20 = vector.broadcast %2 : vector<1x32xf32> to vector<8x32xf32>
    %21 = arith.mulf %19, %20 : vector<8x32xf32>
    %22 = vector.broadcast %3 : vector<1x32xf32> to vector<8x32xf32>
    %23 = arith.addf %21, %22 : vector<8x32xf32>
    %24 = arith.truncf %23 : vector<8x32xf32> to vector<8x32xbf16>
    %c0_10 = arith.constant 0 : index
    %c0_11 = arith.constant 0 : index
    %25 = vector.load %arg4[%c0_10, %c0_11] : memref<32x96xbf16, #tpu.memory_space<vmem>>, vector<32x96xbf16>
    %cst_12 = arith.constant dense<0.000000e+00> : vector<8x96xf32>
    %26 = tpu.matmul %24, %25, %cst_12 {dimension_numbers = #tpu.dot_dimension_numbers<[1], [0], [0], [1], [0, 0, 1, 1], [], []>} : vector<8x32xbf16>, vector<32x96xbf16>, vector<8x96xf32> -> vector<8x96xf32>
    %27 = vector.extract_strided_slice %26 {offsets = [0, 0], sizes = [8, 32], strides = [1, 1]} : vector<8x96xf32> to vector<8x32xf32>
    %28 = vector.extract_strided_slice %26 {offsets = [0, 32], sizes = [8, 32], strides = [1, 1]} : vector<8x96xf32> to vector<8x32xf32>
    %29 = vector.extract_strided_slice %26 {offsets = [0, 64], sizes = [8, 32], strides = [1, 1]} : vector<8x96xf32> to vector<8x32xf32>
    %c0_13 = arith.constant 0 : index
    %c0_14 = arith.constant 0 : index
    %30 = vector.load %arg5[%c0_13, %c0_14] : memref<8x8xf32, #tpu.memory_space<vmem>>, vector<8x8xf32>
    %c0_15 = arith.constant 0 : index
    %c0_16 = arith.constant 0 : index
    %31 = vector.load %arg6[%c0_15, %c0_16] : memref<8x8xf32, #tpu.memory_space<vmem>>, vector<8x8xf32>
    %32 = vector.shape_cast %27 : vector<8x32xf32> to vector<8x4x8xf32>
    %33 = tpu.transpose %32, [1, 0, 2] : vector<8x4x8xf32> -> vector<4x8x8xf32>
    %34 = vector.shape_cast %33 : vector<4x8x8xf32> to vector<32x8xf32>
    %c4_i32 = arith.constant 4 : i32
    %35 = tpu.dynamic_rotate %34 by %c4_i32 dim 1 : vector<32x8xf32>, i32 -> vector<32x8xf32>
    %36 = vector.shape_cast %35 : vector<32x8xf32> to vector<4x8x8xf32>
    %37 = vector.shape_cast %30 : vector<8x8xf32> to vector<1x8x8xf32>
    %38 = vector.broadcast %37 : vector<1x8x8xf32> to vector<4x8x8xf32>
    %39 = arith.mulf %33, %38 : vector<4x8x8xf32>
    %40 = vector.shape_cast %31 : vector<8x8xf32> to vector<1x8x8xf32>
    %41 = vector.broadcast %40 : vector<1x8x8xf32> to vector<4x8x8xf32>
    %42 = arith.mulf %36, %41 : vector<4x8x8xf32>
    %43 = arith.addf %39, %42 : vector<4x8x8xf32>
    %44 = arith.truncf %43 : vector<4x8x8xf32> to vector<4x8x8xbf16>
    %45 = vector.shape_cast %28 : vector<8x32xf32> to vector<8x4x8xf32>
    %46 = tpu.transpose %45, [1, 0, 2] : vector<8x4x8xf32> -> vector<4x8x8xf32>
    %47 = vector.shape_cast %46 : vector<4x8x8xf32> to vector<32x8xf32>
    %c4_i32_17 = arith.constant 4 : i32
    %48 = tpu.dynamic_rotate %47 by %c4_i32_17 dim 1 : vector<32x8xf32>, i32 -> vector<32x8xf32>
    %49 = vector.shape_cast %48 : vector<32x8xf32> to vector<4x8x8xf32>
    %50 = vector.shape_cast %30 : vector<8x8xf32> to vector<1x8x8xf32>
    %51 = vector.broadcast %50 : vector<1x8x8xf32> to vector<4x8x8xf32>
    %52 = arith.mulf %46, %51 : vector<4x8x8xf32>
    %53 = vector.shape_cast %31 : vector<8x8xf32> to vector<1x8x8xf32>
    %54 = vector.broadcast %53 : vector<1x8x8xf32> to vector<4x8x8xf32>
    %55 = arith.mulf %49, %54 : vector<4x8x8xf32>
    %56 = arith.addf %52, %55 : vector<4x8x8xf32>
    %57 = arith.truncf %56 : vector<4x8x8xf32> to vector<4x8x8xbf16>
    %58 = vector.shape_cast %29 : vector<8x32xf32> to vector<8x4x8xf32>
    %59 = tpu.transpose %58, [1, 0, 2] : vector<8x4x8xf32> -> vector<4x8x8xf32>
    %60 = arith.truncf %59 : vector<4x8x8xf32> to vector<4x8x8xbf16>
    %cst_18 = arith.constant dense<0.000000e+00> : vector<4x8x8xf32>
    %61 = tpu.matmul %44, %57, %cst_18 {dimension_numbers = #tpu.dot_dimension_numbers<[2], [2], [1], [1], [0, 0, 0, 1, 1, 1], [0], [0]>} : vector<4x8x8xbf16>, vector<4x8x8xbf16>, vector<4x8x8xf32> -> vector<4x8x8xf32>
    %cst_19 = arith.constant dense<0xFF800000> : vector<4x8xf32>
    %62 = vector.multi_reduction <maximumf>, %61, %cst_19 [2] : vector<4x8x8xf32> to vector<4x8xf32>
    %63 = vector.shape_cast %62 : vector<4x8xf32> to vector<4x8x1xf32>
    %64 = vector.broadcast %63 : vector<4x8x1xf32> to vector<4x8x8xf32>
    %65 = arith.subf %61, %64 : vector<4x8x8xf32>
    %66 = math.exp %65 : vector<4x8x8xf32>
    %cst_20 = arith.constant dense<0.000000e+00> : vector<4x8xf32>
    %67 = vector.multi_reduction <add>, %66, %cst_20 [2] : vector<4x8x8xf32> to vector<4x8xf32>
    %68 = vector.shape_cast %67 : vector<4x8xf32> to vector<4x8x1xf32>
    %69 = arith.truncf %66 : vector<4x8x8xf32> to vector<4x8x8xbf16>
    %cst_21 = arith.constant dense<0.000000e+00> : vector<4x8x8xf32>
    %70 = tpu.matmul %69, %60, %cst_21 {dimension_numbers = #tpu.dot_dimension_numbers<[2], [1], [1], [2], [0, 0, 0, 1, 1, 2], [0], [0]>} : vector<4x8x8xbf16>, vector<4x8x8xbf16>, vector<4x8x8xf32> -> vector<4x8x8xf32>
    %71 = tpu.reciprocal %68 {approx = true} : vector<4x8x1xf32> -> vector<4x8x1xf32>
    %72 = vector.broadcast %71 : vector<4x8x1xf32> to vector<4x8x8xf32>
    %73 = arith.mulf %70, %72 : vector<4x8x8xf32>
    %74 = tpu.transpose %73, [1, 0, 2] : vector<4x8x8xf32> -> vector<8x4x8xf32>
    %75 = vector.shape_cast %74 : vector<8x4x8xf32> to vector<8x32xf32>
    %76 = arith.truncf %75 : vector<8x32xf32> to vector<8x32xbf16>
    %c0_22 = arith.constant 0 : index
    %c0_23 = arith.constant 0 : index
    %77 = vector.load %arg7[%c0_22, %c0_23] : memref<32x32xbf16, #tpu.memory_space<vmem>>, vector<32x32xbf16>
    %cst_24 = arith.constant dense<0.000000e+00> : vector<8x32xf32>
    %78 = tpu.matmul %76, %77, %cst_24 {dimension_numbers = #tpu.dot_dimension_numbers<[1], [0], [0], [1], [0, 0, 1, 1], [], []>} : vector<8x32xbf16>, vector<32x32xbf16>, vector<8x32xf32> -> vector<8x32xf32>
    %79 = arith.addf %78, %1 : vector<8x32xf32>
    %c0_25 = arith.constant 0 : index
    %c0_26 = arith.constant 0 : index
    %80 = vector.load %arg8[%c0_25, %c0_26] : memref<1x32xf32, #tpu.memory_space<vmem>>, vector<1x32xf32>
    %c0_27 = arith.constant 0 : index
    %c0_28 = arith.constant 0 : index
    %81 = vector.load %arg9[%c0_27, %c0_28] : memref<1x32xf32, #tpu.memory_space<vmem>>, vector<1x32xf32>
    %cst_29 = arith.constant dense<0.000000e+00> : vector<8xf32>
    %82 = vector.multi_reduction <add>, %79, %cst_29 [1] : vector<8x32xf32> to vector<8xf32>
    %83 = vector.shape_cast %82 : vector<8xf32> to vector<8x1xf32>
    %cst_30 = arith.constant 3.125000e-02 : f32
    %84 = vector.broadcast %cst_30 : f32 to vector<8x1xf32>
    %85 = arith.mulf %83, %84 : vector<8x1xf32>
    %86 = vector.broadcast %85 : vector<8x1xf32> to vector<8x32xf32>
    %87 = arith.subf %79, %86 : vector<8x32xf32>
    %88 = arith.mulf %87, %87 : vector<8x32xf32>
    %cst_31 = arith.constant dense<0.000000e+00> : vector<8xf32>
    %89 = vector.multi_reduction <add>, %88, %cst_31 [1] : vector<8x32xf32> to vector<8xf32>
    %90 = vector.shape_cast %89 : vector<8xf32> to vector<8x1xf32>
    %cst_32 = arith.constant 3.125000e-02 : f32
    %91 = vector.broadcast %cst_32 : f32 to vector<8x1xf32>
    %92 = arith.mulf %90, %91 : vector<8x1xf32>
    %cst_33 = arith.constant 9.99999974E-6 : f32
    %93 = vector.broadcast %cst_33 : f32 to vector<8x1xf32>
    %94 = arith.addf %92, %93 : vector<8x1xf32>
    %95 = math.rsqrt %94 : vector<8x1xf32>
    %96 = vector.broadcast %95 : vector<8x1xf32> to vector<8x32xf32>
    %97 = arith.mulf %87, %96 : vector<8x32xf32>
    %98 = vector.broadcast %80 : vector<1x32xf32> to vector<8x32xf32>
    %99 = arith.mulf %97, %98 : vector<8x32xf32>
    %100 = vector.broadcast %81 : vector<1x32xf32> to vector<8x32xf32>
    %101 = arith.addf %99, %100 : vector<8x32xf32>
    %102 = arith.truncf %101 : vector<8x32xf32> to vector<8x32xbf16>
    %c0_34 = arith.constant 0 : index
    %c0_35 = arith.constant 0 : index
    %103 = vector.load %arg10[%c0_34, %c0_35] : memref<32x64xbf16, #tpu.memory_space<vmem>>, vector<32x64xbf16>
    %cst_36 = arith.constant dense<0.000000e+00> : vector<8x64xf32>
    %104 = tpu.matmul %102, %103, %cst_36 {dimension_numbers = #tpu.dot_dimension_numbers<[1], [0], [0], [1], [0, 0, 1, 1], [], []>} : vector<8x32xbf16>, vector<32x64xbf16>, vector<8x64xf32> -> vector<8x64xf32>
    %c0_37 = arith.constant 0 : index
    %c0_38 = arith.constant 0 : index
    %105 = vector.load %arg11[%c0_37, %c0_38] : memref<1x64xf32, #tpu.memory_space<vmem>>, vector<1x64xf32>
    %106 = vector.broadcast %105 : vector<1x64xf32> to vector<8x64xf32>
    %107 = arith.addf %104, %106 : vector<8x64xf32>
    %cst_39 = arith.constant 5.000000e-01 : f32
    %108 = vector.broadcast %cst_39 : f32 to vector<8x64xf32>
    %109 = arith.mulf %108, %107 : vector<8x64xf32>
    %cst_40 = arith.constant 0.707106769 : f32
    %110 = vector.broadcast %cst_40 : f32 to vector<8x64xf32>
    %111 = arith.mulf %107, %110 : vector<8x64xf32>
    %cst_41 = arith.constant 0.000000e+00 : f32
    %112 = vector.broadcast %cst_41 : f32 to vector<8x64xf32>
    %113 = arith.cmpf oge, %111, %112 : vector<8x64xf32>
    %cst_42 = arith.constant 1.000000e+00 : f32
    %cst_43 = arith.constant -1.000000e+00 : f32
    %114 = vector.broadcast %cst_42 : f32 to vector<8x64xf32>
    %115 = vector.broadcast %cst_43 : f32 to vector<8x64xf32>
    %116 = arith.select %113, %114, %115 : vector<8x64xi1>, vector<8x64xf32>
    %117 = math.absf %111 : vector<8x64xf32>
    %cst_44 = arith.constant 0.327591091 : f32
    %118 = vector.broadcast %cst_44 : f32 to vector<8x64xf32>
    %119 = arith.mulf %118, %117 : vector<8x64xf32>
    %cst_45 = arith.constant 1.000000e+00 : f32
    %120 = vector.broadcast %cst_45 : f32 to vector<8x64xf32>
    %121 = arith.addf %120, %119 : vector<8x64xf32>
    %122 = tpu.reciprocal %121 {approx = true} : vector<8x64xf32> -> vector<8x64xf32>
    %cst_46 = arith.constant 1.06140542 : f32
    %123 = vector.broadcast %cst_46 : f32 to vector<8x64xf32>
    %124 = arith.mulf %123, %122 : vector<8x64xf32>
    %cst_47 = arith.constant -1.45315206 : f32
    %125 = vector.broadcast %cst_47 : f32 to vector<8x64xf32>
    %126 = arith.addf %124, %125 : vector<8x64xf32>
    %127 = arith.mulf %126, %122 : vector<8x64xf32>
    %cst_48 = arith.constant 1.42141378 : f32
    %128 = vector.broadcast %cst_48 : f32 to vector<8x64xf32>
    %129 = arith.addf %127, %128 : vector<8x64xf32>
    %130 = arith.mulf %129, %122 : vector<8x64xf32>
    %cst_49 = arith.constant -0.284496725 : f32
    %131 = vector.broadcast %cst_49 : f32 to vector<8x64xf32>
    %132 = arith.addf %130, %131 : vector<8x64xf32>
    %133 = arith.mulf %132, %122 : vector<8x64xf32>
    %cst_50 = arith.constant 0.254829586 : f32
    %134 = vector.broadcast %cst_50 : f32 to vector<8x64xf32>
    %135 = arith.addf %133, %134 : vector<8x64xf32>
    %136 = arith.mulf %135, %122 : vector<8x64xf32>
    %cst_51 = arith.constant 0.000000e+00 : f32
    %137 = vector.broadcast %cst_51 : f32 to vector<8x64xf32>
    %138 = arith.subf %137, %117 : vector<8x64xf32>
    %139 = arith.mulf %138, %117 : vector<8x64xf32>
    %140 = math.exp %139 : vector<8x64xf32>
    %141 = arith.mulf %136, %140 : vector<8x64xf32>
    %cst_52 = arith.constant 1.000000e+00 : f32
    %142 = vector.broadcast %cst_52 : f32 to vector<8x64xf32>
    %143 = arith.subf %142, %141 : vector<8x64xf32>
    %144 = arith.mulf %116, %143 : vector<8x64xf32>
    %cst_53 = arith.constant 1.000000e+00 : f32
    %145 = vector.broadcast %cst_53 : f32 to vector<8x64xf32>
    %146 = arith.addf %145, %144 : vector<8x64xf32>
    %147 = arith.mulf %109, %146 : vector<8x64xf32>
    %148 = arith.truncf %147 : vector<8x64xf32> to vector<8x64xbf16>
    %c0_54 = arith.constant 0 : index
    %c0_55 = arith.constant 0 : index
    %149 = vector.load %arg12[%c0_54, %c0_55] : memref<64x32xbf16, #tpu.memory_space<vmem>>, vector<64x32xbf16>
    %cst_56 = arith.constant dense<0.000000e+00> : vector<8x32xf32>
    %150 = tpu.matmul %148, %149, %cst_56 {dimension_numbers = #tpu.dot_dimension_numbers<[1], [0], [0], [1], [0, 0, 1, 1], [], []>} : vector<8x64xbf16>, vector<64x32xbf16>, vector<8x32xf32> -> vector<8x32xf32>
    %c0_57 = arith.constant 0 : index
    %c0_58 = arith.constant 0 : index
    %151 = vector.load %arg13[%c0_57, %c0_58] : memref<1x32xf32, #tpu.memory_space<vmem>>, vector<1x32xf32>
    %152 = vector.broadcast %151 : vector<1x32xf32> to vector<8x32xf32>
    %153 = arith.addf %150, %152 : vector<8x32xf32>
    %154 = arith.addf %153, %79 : vector<8x32xf32>
    %c0_59 = arith.constant 0 : index
    %c0_60 = arith.constant 0 : index
    %c0_61 = arith.constant 0 : index
    %155 = vector.load %arg14[%c0_59, %c0_60, %c0_61] : memref<1x8x32xf32, #tpu.memory_space<vmem>>, vector<1x8x32xf32>
    %156 = vector.shape_cast %155 : vector<1x8x32xf32> to vector<8x32xf32>
    %157 = vector.shape_cast %154 : vector<8x32xf32> to vector<1x8x32xf32>
    tpu.vector_store %arg14[%c0_59, %c0_60, %c0_61], %157 {strides = array<i32>} : memref<1x8x32xf32, #tpu.memory_space<vmem>>, vector<1x8x32xf32>,
    return
  }
  func.func @transform_0(%arg0: i32) -> (i32, i32, i32) {
    %c0_i32 = arith.constant 0 : i32
    %c0_i32_0 = arith.constant 0 : i32
    %c0_i32_1 = arith.constant 0 : i32
    return %arg0, %c0_i32, %c0_i32_0 : i32, i32, i32
  }
  func.func @transform_1(%arg0: i32) -> (i32, i32) {
    %c0_i32 = arith.constant 0 : i32
    %c0_i32_0 = arith.constant 0 : i32
    %c0_i32_1 = arith.constant 0 : i32
    return %c0_i32, %c0_i32_0 : i32, i32
  }
  func.func @transform_2(%arg0: i32) -> (i32, i32) {
    %c0_i32 = arith.constant 0 : i32
    %c0_i32_0 = arith.constant 0 : i32
    %c0_i32_1 = arith.constant 0 : i32
    return %c0_i32, %c0_i32_0 : i32, i32
  }
  func.func @transform_3(%arg0: i32) -> (i32, i32) {
    %c0_i32 = arith.constant 0 : i32
    %c0_i32_0 = arith.constant 0 : i32
    %c0_i32_1 = arith.constant 0 : i32
    return %c0_i32, %c0_i32_0 : i32, i32
  }
  func.func @transform_4(%arg0: i32) -> (i32, i32) {
    %c0_i32 = arith.constant 0 : i32
    %c0_i32_0 = arith.constant 0 : i32
    %c0_i32_1 = arith.constant 0 : i32
    return %c0_i32, %c0_i32_0 : i32, i32
  }
  func.func @transform_5(%arg0: i32) -> (i32, i32) {
    %c0_i32 = arith.constant 0 : i32
    %c0_i32_0 = arith.constant 0 : i32
    %c0_i32_1 = arith.constant 0 : i32
    return %c0_i32, %c0_i32_0 : i32, i32
  }
  func.func @transform_6(%arg0: i32) -> (i32, i32) {
    %c0_i32 = arith.constant 0 : i32
    %c0_i32_0 = arith.constant 0 : i32
    %c0_i32_1 = arith.constant 0 : i32
    return %c0_i32, %c0_i32_0 : i32, i32
  }
  func.func @transform_7(%arg0: i32) -> (i32, i32) {
    %c0_i32 = arith.constant 0 : i32
    %c0_i32_0 = arith.constant 0 : i32
    %c0_i32_1 = arith.constant 0 : i32
    return %c0_i32, %c0_i32_0 : i32, i32
  }
  func.func @transform_8(%arg0: i32) -> (i32, i32) {
    %c0_i32 = arith.constant 0 : i32
    %c0_i32_0 = arith.constant 0 : i32
    %c0_i32_1 = arith.constant 0 : i32
    return %c0_i32, %c0_i32_0 : i32, i32
  }
  func.func @transform_9(%arg0: i32) -> (i32, i32) {
    %c0_i32 = arith.constant 0 : i32
    %c0_i32_0 = arith.constant 0 : i32
    %c0_i32_1 = arith.constant 0 : i32
    return %c0_i32, %c0_i32_0 : i32, i32
  }
  func.func @transform_10(%arg0: i32) -> (i32, i32) {
    %c0_i32 = arith.constant 0 : i32
    %c0_i32_0 = arith.constant 0 : i32
    %c0_i32_1 = arith.constant 0 : i32
    return %c0_i32, %c0_i32_0 : i32, i32
  }
  func.func @transform_11(%arg0: i32) -> (i32, i32) {
    %c0_i32 = arith.constant 0 : i32
    %c0_i32_0 = arith.constant 0 : i32
    %c0_i32_1 = arith.constant 0 : i32
    return %c0_i32, %c0_i32_0 : i32, i32
  }
  func.func @transform_12(%arg0: i32) -> (i32, i32) {
    %c0_i32 = arith.constant 0 : i32
    %c0_i32_0 = arith.constant 0 : i32
    %c0_i32_1 = arith.constant 0 : i32
    return %c0_i32, %c0_i32_0 : i32, i32
  }
  func.func @transform_13(%arg0: i32) -> (i32, i32, i32) {
    %c0_i32 = arith.constant 0 : i32
    %c0_i32_0 = arith.constant 0 : i32
    %c0_i32_1 = arith.constant 0 : i32
    return %arg0, %c0_i32, %c0_i32_0 : i32, i32, i32
  }
}

</mosaic_0001>

<bundles_post_ra>
// kernel: tpu_custom_call.1
= control target key start
LH: loop header
LB: loop body
LE: loop exit
PB: predicated region body
PF: predicated region fallthrough
CT: control target
= control target key end

     0   :  { %s2668_s0 = inlined_call_operand.vmem [shape: f32[2,8,32], index: 0, kind: input, shape index: {}]   ;;  %s2669_s1 = inlined_call_operand.hbm [shape: f32[1,32], index: 1, kind: input, shape index: {}]   ;;  %s2670_s2 = inlined_call_operand.vmem [shape: f32[1,32], index: 2, kind: input, shape index: {}]   ;;  %s2671_s3 = inlined_call_operand.vmem [shape: bf16[32,96], index: 3, kind: input, shape index: {}]   ;;  %s2672_s4 = inlined_call_operand.hbm [shape: f32[8,8], index: 4, kind: input, shape index: {}]   ;;  %s2673_s5 = inlined_call_operand.hbm [shape: f32[8,8], index: 5, kind: input, shape index: {}]   ;;  %s2674_s6 = inlined_call_operand.vmem [shape: bf16[32,32], index: 6, kind: input, shape index: {}]   ;;  %s2675_s7 = inlined_call_operand.vmem [shape: f32[1,32], index: 7, kind: input, shape index: {}]   ;;  %s2676_s8 = inlined_call_operand.vmem [shape: f32[1,32], index: 8, kind: input, shape index: {}]   ;;  %s2677_s9 = inlined_call_operand.hbm [shape: bf16[32,64], index: 9, kind: input, shape index: {}]   ;;  %s2678_s10 = inlined_call_operand.vmem [shape: f32[1,64], index: 10, kind: input, shape index: {}]   ;;  %s2679_s11 = inlined_call_operand.vmem [shape: bf16[64,32], index: 11, kind: input, shape index: {}]   ;;  %s2680_s12 = inlined_call_operand.vmem [shape: f32[1,32], index: 12, kind: input, shape index: {}]   ;;  %s2681_s13 = inlined_call_operand.hbm [shape: f32[2,8,32], index: 13, kind: output, shape index: {}]  }
   0x1   :  { %2687 = sst [smem:[#allocation20_spill]] %s2669_s1 }
   0x2   :  { %2688 = sst [smem:[#allocation21_spill]] %s2672_s4 }
   0x3   :  { %2689 = sst [smem:[#allocation22_spill]] %s2673_s5 }
   0x4   :  { %18 = vsyncpa [#allocation3], 0 }
   0x5   :  { %19 = vsyncpa [#allocation6], 0 }
   0x6   :  { %20 = vsyncpa [#allocation9], 0 }
   0x7   :  { %21 = vsyncpa [#allocation4], 0 }
   0x8   :  { %23 = vsyncpa [#allocation4 + $0x1], 0  ;;  %s2183_s25 = smov 0   ;;  %s2185_s26 = smov 0  }
   0x9   :  { %s2187_s27 = smov 0   ;;  %s2189_s28 = smov 0  }
   0xa LB: > { %2690 = sst [smem:[#allocation15_spill]] %s2080_s25  ;;  %s2204_s29 = sadd.s32 4294967295, %s2092_s28   ;;  %s2092_s28 = sphi %s2189_s28, %s2704_s28   ;;  %s2088_s27 = sphi %s2187_s27, %s2706_s27   ;;  %s2084_s26 = sphi %s2185_s26, %s2708_s26   ;;  %s2080_s25 = sphi %s2183_s25, %s2707_s25  }
   0xb   : > { %2691 = sst [smem:[#allocation16_spill]] %s2088_s27  ;;  %s1682_s30 = sadd.s32 4294967294, %s2092_s28  }
   0xc   : > { %s2208_s14 = sadd.s32 1, %s2092_s28   ;;  %s314_s15 = sadd.s32 1, %s2088_s27 }
   0xd   : > { %2692 = sst [smem:[#allocation17_spill]] %s2208_s14  ;;  %s311_s16 = ssub.s32 %s2092_s28, %s2208_s14 }
   0xe   : > { %p324_p0 = scmp.ne.s32.totalorder %s2088_s27, %s2084_s26  ;;  %p312_p1 = scmp.eq.s32.totalorder %s311_s16, 0 }
   0xf   : > { %p325_p2 = scmp.eq.s32.totalorder %s2204_s29, 1  ;;  %p330_p3 = scmp.ne.s32.totalorder %s2084_s26, %s2080_s25 }
  0x10   : > { %p331_p4 = scmp.eq.s32.totalorder %s1682_s30, 1  ;;  %p1683_p7 = scmp.ge.s32.totalorder %s2092_s28, 1 }
  0x11   : > { %s2219_s17 = scalar_select %p312_p1, %s2088_s27, %s314_s15  }
  0x12   : > { %p2221_p5 = por %p325_p2, %p324_p0  ;;  %p2225_p6 = por %p331_p4, %p330_p3 }
  0x13   : > { %2693 = sst [smem:[#allocation18_spill]] %s2219_s17  ;;  %p338_p8 = scmp.lt.s32.totalorder %s2092_s28, 3 }
  0x14   : > { %s2695_s19 = scalar_select %p2225_p6, 1, 0 }
  0x15   : > { %p1797_p9 = scmp.eq.s32.totalorder %s2204_s29, 0  ;;  %p2232_p10 = pnand %p1683_p7, %p338_p8 }
  0x16   : > { %2696 = sst [smem:[#allocation19_spill]] %s2695_s19  ;;  %s2094_s24 = smov [#allocation5]  }
  0x17   : > { %s2698_s4 = sld [smem:[#allocation21_spill]]  ;;  %p1780_p11 = pneg %p2232_p10 }
  0x18   : > { %s370_s30 = sshll.u32 %s2094_s24, 4  ;;  %s2699_s1 = sld [smem:[#allocation20_spill]]  ;;  %s371_s30 = int_to_ptr.vmem [resolvable:$true] %s370_s30 }
  0x19   : > { %p2246_p12 = pnand %p1797_p9, %p1780_p11  ;;  %s2701_s5 = sld [smem:[#allocation22_spill]] }
  0x1a   : > { %s2095_s14 = smov [#allocation2]   ;;  %s2096_s19 = smov [#allocation7]  }
  0x1b   : > { %s352_s24 = sshll.u32 %s2095_s14, 4  ;;  %s382_s25 = sshll.u32 %s2096_s19, 4  ;;  %s353_s24 = int_to_ptr.vmem [resolvable:$true] %s352_s24  ;;  %s383_s25 = int_to_ptr.vmem [resolvable:$true] %s382_s25 }
  0x1c   : > { %s2097_s21 = smov [#allocation8]   ;;  %s2098_s14 = smov 64  }
  0x1d   : > { %s368_s23 = sshll.u32 %s2698_s4, 4  ;;  %s402_s22 = sshll.u32 %s2097_s21, 4  ;;  %s369_s23 = int_to_ptr.hbm [resolvable:$true] %s368_s23  ;;  %s403_s22 = int_to_ptr.vmem [resolvable:$true] %s402_s22 }
  0x1e   : > { %s350_s17 = sshll.u32 %s2699_s1, 4  ;;  %s400_s1 = sshll.u32 %s2677_s9, 4  ;;  %s351_s17 = int_to_ptr.hbm [resolvable:$true] %s350_s17  ;;  %s401_s1 = int_to_ptr.hbm [resolvable:$true] %s400_s1 }
  0x1f   : > { %s380_s4 = sshll.u32 %s2701_s5, 4  ;;  %s2099_s5 = smov 4   ;;  %s381_s4 = int_to_ptr.hbm [resolvable:$true] %s380_s4 }
  0x20   : > { %1786 = dma.hbm_to_vmem [thread:$0]  (!%p2246_p12), %s369_s23, 128, %s371_s30, [#allocation6]  }
  0x21   : > { %1783 = dma.hbm_to_vmem [thread:$0]  (!%p2246_p12), %s351_s17, 16, %s353_s24, [#allocation3]  }
  0x22   : > { %1789 = dma.hbm_to_vmem [thread:$0]  (!%p2246_p12), %s381_s4, 128, %s383_s25, [#allocation6]  }
  0x23   : > { %1792 = dma.hbm_to_vmem [thread:$0]  (!%p2246_p12), %s401_s1, 256, %s403_s22, [#allocation9], %s2098_s14, %s2098_s14, %s2099_s5  }
  0x24   : > { %434 = sbr.rel (%p2232_p10) target bundleno = 2327 (0x917), region = 72 }
  0x29   : > { %2063 = dma.done.wait (%p1797_p9), [#allocation3], 16  }
  0x2a   : > { %2065 = vsyncadd (%p1797_p9), [#allocation3], 4294967280 }
  0x2b   : > { %2067 = dma.done.wait (%p1797_p9), [#allocation6], 256  }
  0x2c   : > { %2069 = vsyncadd (%p1797_p9), [#allocation6], 4294967040 }
  0x2d   : > { %2071 = dma.done.wait (%p1797_p9), [#allocation9], 256  }
  0x2e   : > { %2073 = vsyncadd (%p1797_p9), [#allocation9], 4294967040  ;;  %p493_p13 = scmp.lt.s32.totalorder %s2204_s29, 1  ;;  %vm501_vm0 = vcmask 261120   ;;  %v1753_v7 = vld [vmem:[%s2671_s3 + $0x8] sm:$0xff]  ;;  %v1752_v8 = vld [vmem:[%s2671_s3] sm:$0xff] }
  0x2f   : > { %558 = vmatpush.bf16.msra.mxu0 %v1753_v7  ;;  %v1867_v18 = vld [vmem:[#allocation2] ss:$0 sm:$0xff]  ;;  %s2100_s15 = smov 104   ;;  %s2101_s16 = smov 120   ;;  %vm578_vm4 = vcmask 1047556   ;;  %vm688_vm5 = vcmask 1047616  }
  0x30   : > { %s494_s1 = scalar_select %p493_p13, %s2204_s29, 1  ;;  %v1868_v21 = vld [vmem:[%s2670_s2] ss:$0 sm:$0xff]  ;;  %v2104_v29 = vmov 1983009808   ;;  %vm1053_vm6 = vcmask 64512  }
  0x31   : > { %s2102_s21 = smov 96   ;;  %s2103_s22 = smov 112   ;;  %v583_v30 = vunpack.c.l.s4 %v2104_v29  ;;  %v2105_v36 = vmov 1934713408   ;;  %vm1173_vm7 = vcmask 1043456   ;;  %vm1378_vm8 = vcmask 130048  }
  0x32   : > { %s1695_s4 = sshll.u32 %s494_s1, 3  ;;  %v607_v37 = vunpack.c.l.s4 %v2105_v36  ;;  %s2106_s14 = smov 8   ;;  %vm1380_vm9 = vcmask 195584   ;;  %vm1547_vm14 = vcmask 523264  }
  0x33   : > { %s2283_s27 = scalar_lea.vmem %s2668_s0, %s1695_s4  ;;  %559 = vmatpush.bf16.msra.mxu0 %v1752_v8  ;;  %v2316_v35 = vunpack.c.0.s8 %v583_v30  ;;  %s2107_s1 = smov 4  }
  0x34   : > { %v498_v0 = vld [vmem:[%s2283_s27] sm:$0xff]  ;;  %v2323_v42 = vunpack.c.0.s8 %v607_v37  ;;  %s2108_s4 = smov 124   ;;  %s2109_s5 = smov 64  }
  0x35   : > { %v502_v1 = vsel %vm501_vm0, %v498_v0, 0.0  ;;  %s2110_s25 = smov 16   ;;  %s2111_s17 = smov 24  }
  0x36   : > { %503 = vadd.xlane.f32.xlu0 %v502_v1  ;;  %s490_s23 = sand.u32 1, %s2084_s26   ;;  %s2038_s20 = scalar_lea.hbm %s2681_s13, 16 }
  0x37   : > { %s1694_s30 = sshll.u32 %s490_s23, 3 }
  0xa9   : > { %v504_v2 = vpop.xlane.xlu0 %503 }
  0xaa   : > { %v505_v3 = vmul.f32 0.03125, %v504_v2 }
  0xac   : > { %v506_v4 = vsub.f32 %v498_v0, %v505_v3 }
  0xae   : > { %v507_v5 = vmul.f32 %v506_v4, %v506_v4 }
  0xb0   : > { %v508_v6 = vsel %vm501_vm0, %v507_v5, 0.0 }
  0xb1   : > { %509 = vadd.xlane.f32.xlu0 %v508_v6 }
 0x124   : > { %v510_v9 = vpop.xlane.xlu0 %509 }
 0x125   : > { %v511_v10 = vmul.f32 0.03125, %v510_v9 }
 0x127   : > { %v512_v11 = vadd.f32 1e-05, %v511_v10 }
 0x129   : > { %1873 = vrsqrt.f32 %v512_v11  ;;  %vm519_vm2 = vweird.f32 %v512_v11 }
 0x12f   : > { %v1874_v12 = vpop.eup %1873 }
 0x130   : > { %v514_v13 = vmul.f32 %v1874_v12, %v512_v11  ;;  %vm520_vm1 = vweird.f32 %v1874_v12 }
 0x131   : > { %vm521_vm3 = vmor %vm519_vm2, %vm520_vm1 }
 0x132   : > { %v515_v14 = vmul.f32 %v1874_v12, %v514_v13 }
 0x134   : > { %v516_v15 = vmul.f32 0.5, %v515_v14 }
 0x136   : > { %v517_v16 = vsub.f32 1.5, %v516_v15 }
 0x138   : > { %v518_v17 = vmul.f32 %v1874_v12, %v517_v16 }
 0x13a   : > { %v522_v19 = vsel %vm521_vm3, %v1874_v12, %v518_v17 }
 0x13b   : > { %v523_v20 = vmul.f32 %v522_v19, %v506_v4 }
 0x13d   : > { %v527_v22 = vmul.f32 %v1867_v18, %v523_v20 }
 0x13f   : > { %v531_v23 = vadd.f32 %v1868_v21, %v527_v22 }
 0x141   : > { %v532_v24 = vpack.c.bf16 %v531_v23, %v531_v23 }
 0x143   : > { %1704 = vmatmul.msk.bf16.vlgmr.msra.gmra.mxu0 %vm501_vm0, %v532_v24 }
 0x1c0   : > { %v2298_v25 = vpop.f32.mrf.mxu0 }
 0x1c1   : > { %574 = vrot.lane.b32.xlu2 %v2298_v25, %s2100_s15  ;;  %568 = vrot.lane.b32.xlu1 %v2298_v25, %s2101_s16  ;;  %v580_v39 = vrot.slane %v2298_v25, 4 }
 0x1c8   : > { %v563_v26 = vpop.f32.mrf.mxu0 }
 0x1c9   : > { %749 = vrot.lane.b32.xlu2 %v2298_v25, %s2102_s21  ;;  %571 = vrot.lane.b32.xlu1 %v2298_v25, %s2103_s22 }
 0x21b   : > { %v2304_v27 = vpop.permute.xlu2 %574 }
 0x21c   : > { %755 = vrot.lane.b32.xlu2 %v2304_v27, %s2102_s21  ;;  %v590_v28 = vrot.slane %v2304_v27, 4 }
 0x233   : > { %v2308_v31 = vpop.permute.xlu1 %568 }
 0x234   : > { %v591_v32 = vsel %vm578_vm4, %v590_v28, %v2308_v31  ;;  %v592_v33 = vrot.slane %v2308_v31, 4  ;;  %751 = vrot.lane.b32.xlu0 %v2308_v31, %s2102_s21 }
 0x235   : > { %v597_v40 = vperm.slane %v591_v32, %v2316_v35 }
 0x236   : > { %v593_v34 = vsel %vm578_vm4, %v2304_v27, %v592_v33 }
 0x237   : > { %v601_v38 = vperm.slane %v593_v34, %v2316_v35  ;;  %v602_v48 = vrot.slane %v597_v40, 4 }
 0x239   : > { %v614_v45 = vrot.slane %v601_v38, 4 }
 0x23b   : > { %v2321_v41 = vpop.permute.xlu1 %571 }
 0x23c   : > { %v577_v43 = vrot.slane %v2321_v41, 4  ;;  %v581_v44 = vsel %vm578_vm4, %v2321_v41, %v580_v39  ;;  %753 = vrot.lane.b32.xlu1 %v2321_v41, %s2102_s21 }
 0x23d   : > { %v589_v46 = vperm.slane %v581_v44, %v2316_v35 }
 0x23e   : > { %v579_v47 = vsel %vm578_vm4, %v577_v43, %v2298_v25 }
 0x23f   : > { %v585_v49 = vperm.slane %v579_v47, %v2316_v35  ;;  %v615_v50 = vsel %vm578_vm4, %v614_v45, %v589_v46  ;;  %v616_v51 = vrot.slane %v589_v46, 4 }
 0x240   : > { %v621_v52 = vperm.slane %v615_v50, %v2323_v42 }
 0x241   : > { %v603_v53 = vsel %vm578_vm4, %v602_v48, %v585_v49  ;;  %v604_v54 = vrot.slane %v585_v49, 4  ;;  %v617_v55 = vsel %vm578_vm4, %v601_v38, %v616_v51  ;;  %v750_v38 = vpop.permute.xlu2 %749 }
 0x242   : > { %v609_v56 = vperm.slane %v603_v53, %v2323_v42  ;;  %v625_v57 = vperm.slane %v617_v55, %v2323_v42  ;;  %v630_v60 = vrot.slane %v621_v52, 4  ;;  %v763_v48 = vrot.slane %v750_v38, 4 }
 0x243   : > { %v605_v58 = vsel %vm578_vm4, %v597_v40, %v604_v54 }
 0x244   : > { %v613_v59 = vperm.slane %v605_v58, %v2323_v42  ;;  %v632_v61 = vrot.slane %v625_v57, 4  ;;  %v626_v1 = vrot.slane %v609_v56, 4  ;;  %v631_v4 = vsel %vm578_vm4, 0.0, %v630_v60 }
 0x246   : > { %v628_v62 = vrot.slane %v613_v59, 4  ;;  %v633_v63 = vsel %vm578_vm4, 0.0, %v632_v61  ;;  %v645_v0 = vsel %vm578_vm4, %v632_v61, %v621_v52  ;;  %v627_v11 = vsel %vm578_vm4, 0.0, %v626_v1 }
 0x247   : > { %v650_v2 = vrot.slane %v633_v63, 4  ;;  %v649_v3 = vperm.slane %v645_v0, %v2316_v35 }
 0x248   : > { %v629_v5 = vsel %vm578_vm4, 0.0, %v628_v62  ;;  %v634_v6 = vsel %vm578_vm4, %v628_v62, %v609_v56 }
 0x249   : > { %v638_v7 = vperm.slane %v634_v6, %v2316_v35  ;;  %v639_v8 = vrot.slane %v629_v5, 4  ;;  %v651_v9 = vsel %vm578_vm4, %v650_v2, %v631_v4  ;;  %v670_v10 = vrot.slane %v649_v3, 4 }
 0x24a   : > { %v655_v12 = vperm.slane %v651_v9, %v2316_v35 }
 0x24b   : > { %v640_v13 = vsel %vm578_vm4, %v639_v8, %v627_v11  ;;  %v658_v14 = vrot.slane %v638_v7, 4 }
 0x24c   : > { %v644_v15 = vperm.slane %v640_v13, %v2316_v35  ;;  %v671_v16 = vsel %vm578_vm4, %v655_v12, %v670_v10  ;;  %v668_v17 = vrot.slane %v655_v12, 4 }
 0x24d   : > { %v679_v18 = vperm.slane %v671_v16, %v2323_v42 }
 0x24e   : > { %v659_v19 = vsel %vm578_vm4, %v644_v15, %v658_v14  ;;  %v656_v20 = vrot.slane %v644_v15, 4  ;;  %v669_v21 = vsel %vm578_vm4, %v668_v17, %v649_v3 }
 0x24f   : > { %v667_v22 = vperm.slane %v659_v19, %v2323_v42  ;;  %v684_v23 = vrot.slane %v679_v18, 4  ;;  %v675_v24 = vperm.slane %v669_v21, %v2323_v42 }
 0x250   : > { %v657_v26 = vsel %vm578_vm4, %v656_v20, %v638_v7 }
 0x251   : > { %v2361_v28 = vsel %vm578_vm4, %v684_v23, %v667_v22  ;;  %v686_v29 = vrot.slane %v667_v22, 4  ;;  %v663_v30 = vperm.slane %v657_v26, %v2323_v42  ;;  %v680_v32 = vrot.slane %v675_v24, 4 }
 0x253   : > { %v2365_v33 = vsel %vm578_vm4, %v679_v18, %v686_v29  ;;  %v682_v34 = vrot.slane %v663_v30, 4  ;;  %v2368_v36 = vsel %vm578_vm4, %v680_v32, %v663_v30 }
 0x255   : > { %v2371_v37 = vsel %vm578_vm4, %v675_v24, %v682_v34 }
 0x276   : > { %v756_v39 = vpop.permute.xlu2 %755 }
 0x277   : > { %v773_v44 = vrot.slane %v756_v39, 4 }
 0x2a6   : > { %v752_v40 = vpop.permute.xlu0 %751 }
 0x2a7   : > { %v775_v43 = vrot.slane %v752_v40, 4  ;;  %v774_v46 = vsel %vm578_vm4, %v773_v44, %v752_v40 }
 0x2a8   : > { %v780_v49 = vperm.slane %v774_v46, %v2316_v35 }
 0x2a9   : > { %v776_v45 = vsel %vm578_vm4, %v756_v39, %v775_v43 }
 0x2aa   : > { %v784_v47 = vperm.slane %v776_v45, %v2316_v35  ;;  %v785_v56 = vrot.slane %v780_v49, 4 }
 0x2ac   : > { %v797_v53 = vrot.slane %v784_v47, 4 }
 0x2ae   : > { %v754_v50 = vpop.permute.xlu1 %753 }
 0x2af   : > { %v761_v51 = vrot.slane %v754_v50, 4  ;;  %v764_v52 = vsel %vm578_vm4, %v754_v50, %v763_v48 }
 0x2b0   : > { %v772_v54 = vperm.slane %v764_v52, %v2316_v35  ;;  %v566_v52 = vld [vmem:[#allocation7] sm:$0xff] }
 0x2b1   : > { %v762_v55 = vsel %vm578_vm4, %v761_v51, %v750_v38 }
 0x2b2   : > { %v768_v57 = vperm.slane %v762_v55, %v2316_v35  ;;  %v798_v58 = vsel %vm578_vm4, %v797_v53, %v772_v54  ;;  %v799_v59 = vrot.slane %v772_v54, 4 }
 0x2b3   : > { %v804_v60 = vperm.slane %v798_v58, %v2323_v42 }
 0x2b4   : > { %v786_v61 = vsel %vm578_vm4, %v785_v56, %v768_v57  ;;  %v787_v62 = vrot.slane %v768_v57, 4  ;;  %v800_v63 = vsel %vm578_vm4, %v784_v47, %v799_v59 }
 0x2b5   : > { %v792_v0 = vperm.slane %v786_v61, %v2323_v42  ;;  %v808_v1 = vperm.slane %v800_v63, %v2323_v42  ;;  %v813_v4 = vrot.slane %v804_v60, 4 }
 0x2b6   : > { %v788_v2 = vsel %vm578_vm4, %v780_v49, %v787_v62 }
 0x2b7   : > { %v796_v3 = vperm.slane %v788_v2, %v2323_v42  ;;  %v815_v5 = vrot.slane %v808_v1, 4  ;;  %v809_v6 = vrot.slane %v792_v0, 4  ;;  %v814_v13 = vsel %vm578_vm4, 0.0, %v813_v4 }
 0x2b9   : > { %v811_v7 = vrot.slane %v796_v3, 4  ;;  %v816_v8 = vsel %vm578_vm4, 0.0, %v815_v5  ;;  %v828_v9 = vsel %vm578_vm4, %v815_v5, %v804_v60  ;;  %v810_v19 = vsel %vm578_vm4, 0.0, %v809_v6 }
 0x2ba   : > { %v832_v10 = vperm.slane %v828_v9, %v2316_v35  ;;  %v833_v11 = vrot.slane %v816_v8, 4 }
 0x2bb   : > { %v812_v12 = vsel %vm578_vm4, 0.0, %v811_v7  ;;  %v817_v14 = vsel %vm578_vm4, %v811_v7, %v792_v0 }
 0x2bc   : > { %v822_v15 = vrot.slane %v812_v12, 4  ;;  %v834_v16 = vsel %vm578_vm4, %v833_v11, %v814_v13  ;;  %v821_v17 = vperm.slane %v817_v14, %v2316_v35  ;;  %v853_v18 = vrot.slane %v832_v10, 4 }
 0x2bd   : > { %v838_v20 = vperm.slane %v834_v16, %v2316_v35 }
 0x2be   : > { %v823_v21 = vsel %vm578_vm4, %v822_v15, %v810_v19  ;;  %v841_v22 = vrot.slane %v821_v17, 4 }
 0x2bf   : > { %v827_v23 = vperm.slane %v823_v21, %v2316_v35  ;;  %v854_v24 = vsel %vm578_vm4, %v838_v20, %v853_v18  ;;  %v851_v26 = vrot.slane %v838_v20, 4 }
 0x2c0   : > { %v862_v29 = vperm.slane %v854_v24, %v2323_v42 }
 0x2c1   : > { %v842_v30 = vsel %vm578_vm4, %v827_v23, %v841_v22  ;;  %v839_v32 = vrot.slane %v827_v23, 4  ;;  %v852_v34 = vsel %vm578_vm4, %v851_v26, %v832_v10 }
 0x2c2   : > { %v850_v38 = vperm.slane %v842_v30, %v2323_v42  ;;  %v867_v39 = vrot.slane %v862_v29, 4  ;;  %v858_v40 = vperm.slane %v852_v34, %v2323_v42 }
 0x2c3   : > { %v840_v43 = vsel %vm578_vm4, %v839_v32, %v821_v17 }
 0x2c4   : > { %v2409_v44 = vsel %vm578_vm4, %v867_v39, %v850_v38  ;;  %v846_v45 = vperm.slane %v840_v43, %v2323_v42  ;;  %v863_v46 = vrot.slane %v858_v40, 4  ;;  %v869_v50 = vrot.slane %v850_v38, 4 }
 0x2c5   : > { %877 = vrot.lane.b32.xlu1 %v2409_v44, %s2106_s14  ;;  %v1857_v38 = vpack.i.bf16 %v2308_v31, %v2298_v25  ;;  %v1862_v39 = vpack.i.bf16 %v2304_v27, %v2321_v41 }
 0x2c6   : > { %v2415_v47 = vsel %vm578_vm4, %v863_v46, %v846_v45  ;;  %v865_v48 = vrot.slane %v846_v45, 4  ;;  %v2431_v51 = vsel %vm578_vm4, %v862_v29, %v869_v50 }
 0x2c7   : > { %871 = vrot.lane.b32.xlu0 %v2415_v47, %s2106_s14 }
 0x2c8   : > { %v2420_v49 = vsel %vm578_vm4, %v858_v40, %v865_v48  ;;  %v565_v40 = vld [vmem:[#allocation5] sm:$0xff] }
 0x2c9   : > { %874 = vrot.lane.b32.xlu2 %v2420_v49, %s2106_s14  ;;  %v896_v43 = vmul.f32 %v2420_v49, %v565_v40  ;;  %v897_v41 = vmul.f32 %v2409_v44, %v565_v40 }
 0x2cd   : > { %695 = vrot.lane.b32.xlu1 %v2361_v28, %s2106_s14 }
 0x2cf   : > { %698 = vrot.lane.b32.xlu0 %v2365_v33, %s2106_s14 }
 0x2d1   : > { %692 = vrot.lane.b32.xlu2 %v2371_v37, %s2106_s14 }
 0x2d5   : > { %880 = vrot.lane.b32.xlu1 %v2431_v51, %s2106_s14 }
 0x2d9   : > { %689 = vrot.lane.b32.xlu2 %v2368_v36, %s2106_s14 }
 0x2e1   : > { %718 = vrot.lane.b32.xlu2 %v566_v52, %s2107_s1  ;;  %v895_v52 = vmul.f32 %v2415_v47, %v565_v40 }
 0x323   : > { %v875_v53 = vpop.permute.xlu2 %874 }
 0x324   : > { %v876_v54 = vsel %vm688_vm5, %v875_v53, %v2420_v49 }
 0x325   : > { %885 = vrot.lane.b32.xlu0 %v876_v54, %s2106_s14 }
 0x32b   : > { %v693_v55 = vpop.permute.xlu2 %692 }
 0x32c   : > { %v694_v56 = vsel %vm688_vm5, %v693_v55, %v2371_v37 }
 0x32d   : > { %703 = vrot.lane.b32.xlu2 %v694_v56, %s2106_s14 }
 0x333   : > { %v690_v57 = vpop.permute.xlu2 %689 }
 0x334   : > { %v691_v58 = vsel %vm688_vm5, %v690_v57, %v2368_v36  ;;  %v715_v57 = vmul.f32 %v2361_v28, %v565_v40 }
 0x335   : > { %701 = vrot.lane.b32.xlu2 %v691_v58, %s2106_s14  ;;  %v714_v58 = vmul.f32 %v2371_v37, %v565_v40 }
 0x337   : > { %v878_v59 = vpop.permute.xlu1 %877 }
 0x338   : > { %v879_v60 = vsel %vm688_vm5, %v878_v59, %v2409_v44 }
 0x339   : > { %v872_v61 = vpop.permute.xlu0 %871  ;;  %887 = vrot.lane.b32.xlu1 %v879_v60, %s2106_s14 }
 0x33a   : > { %v873_v62 = vsel %vm688_vm5, %v872_v61, %v2415_v47 }
 0x33b   : > { %883 = vrot.lane.b32.xlu0 %v873_v62, %s2106_s14  ;;  %v719_v6 = vpop.permute.xlu2 %718 }
 0x33f   : > { %v696_v63 = vpop.permute.xlu1 %695 }
 0x340   : > { %v697_v0 = vsel %vm688_vm5, %v696_v63, %v2361_v28 }
 0x341   : > { %v699_v1 = vpop.permute.xlu0 %698  ;;  %705 = vrot.lane.b32.xlu1 %v697_v0, %s2106_s14  ;;  %v713_v0 = vmul.f32 %v2368_v36, %v565_v40 }
 0x342   : > { %v700_v2 = vsel %vm688_vm5, %v699_v1, %v2365_v33 }
 0x343   : > { %707 = vrot.lane.b32.xlu0 %v700_v2, %s2106_s14 }
 0x347   : > { %v881_v3 = vpop.permute.xlu1 %880 }
 0x348   : > { %v882_v4 = vsel %vm688_vm5, %v881_v3, %v2431_v51 }
 0x349   : > { %889 = vrot.lane.b32.xlu1 %v882_v4, %s2106_s14 }
 0x387   : > { %v704_v11 = vpop.permute.xlu2 %703 }
 0x388   : > { %v710_v16 = vsel %vm688_vm5, %v704_v11, %v2371_v37 }
 0x389   : > { %v722_v19 = vmul.f32 %v719_v6, %v710_v16 }
 0x38f   : > { %v702_v23 = vpop.permute.xlu2 %701 }
 0x390   : > { %v709_v26 = vsel %vm688_vm5, %v702_v23, %v2368_v36 }
 0x391   : > { %v721_v32 = vmul.f32 %v719_v6, %v709_v26 }
 0x397   : > { %v886_v5 = vpop.permute.xlu0 %885 }
 0x398   : > { %v892_v7 = vsel %vm688_vm5, %v886_v5, %v2420_v49 }
 0x399   : > { %v900_v8 = vmul.f32 %v892_v7, %v719_v6 }
 0x39b   : > { %909 = vrot.lane.b32.xlu2 %v900_v8, %s2108_s4 }
 0x3ab   : > { %v888_v9 = vpop.permute.xlu1 %887 }
 0x3ac   : > { %v893_v10 = vsel %vm688_vm5, %v888_v9, %v2409_v44  ;;  %v898_v44 = vmul.f32 %v2431_v51, %v565_v40 }
 0x3ad   : > { %v901_v12 = vmul.f32 %v893_v10, %v719_v6  ;;  %v884_v13 = vpop.permute.xlu0 %883 }
 0x3ae   : > { %v891_v14 = vsel %vm688_vm5, %v884_v13, %v2415_v47 }
 0x3af   : > { %v899_v15 = vmul.f32 %v891_v14, %v719_v6  ;;  %911 = vrot.lane.b32.xlu1 %v901_v12, %s2108_s4 }
 0x3b1   : > { %907 = vrot.lane.b32.xlu2 %v899_v15, %s2108_s4 }
 0x3b3   : > { %v706_v17 = vpop.permute.xlu1 %705 }
 0x3b4   : > { %v711_v18 = vsel %vm688_vm5, %v706_v17, %v2361_v28 }
 0x3b5   : > { %v723_v20 = vmul.f32 %v719_v6, %v711_v18  ;;  %v708_v21 = vpop.permute.xlu0 %707 }
 0x3b6   : > { %v712_v22 = vsel %vm688_vm5, %v708_v21, %v2365_v33 }
 0x3b7   : > { %v724_v24 = vmul.f32 %v719_v6, %v712_v22  ;;  %733 = vrot.lane.b32.xlu0 %v723_v20, %s2108_s4  ;;  %731 = vrot.lane.b32.xlu1 %v722_v19, %s2108_s4 }
 0x3b9   : > { %735 = vrot.lane.b32.xlu2 %v724_v24, %s2108_s4 }
 0x3bb   : > { %v890_v29 = vpop.permute.xlu1 %889 }
 0x3bc   : > { %v894_v30 = vsel %vm688_vm5, %v890_v29, %v2431_v51 }
 0x3bd   : > { %v902_v34 = vmul.f32 %v894_v30, %v719_v6  ;;  %v716_v6 = vmul.f32 %v2365_v33, %v565_v40 }
 0x3bf   : > { %913 = vrot.lane.b32.xlu0 %v902_v34, %s2108_s4  ;;  %729 = vrot.lane.b32.xlu1 %v721_v32, %s2108_s4 }
 0x3c7   : > { %1858 = vrot.lane.b32.xlu0 %v1857_v38, %s2109_s5  ;;  %1863 = vrot.lane.b32.xlu1 %v1862_v39, %s2109_s5 }
 0x3f5   : > { %v910_v45 = vpop.permute.xlu2 %909 }
 0x3f6   : > { %v920_v46 = vadd.f32 %v910_v45, %v896_v43 }
 0x3f8   : > { %v924_v48 = vpack.c.bf16 %v920_v46, %v920_v46 }
 0x3fa   : > { %v1077_v50 = vsel %vm1053_vm6, %v924_v48, 0 }
 0x3fb   : > { %1086 = vmatpush.bf16.xpose.msra.mxu2 %v1077_v50 }
 0x40b   : > { %v908_v53 = vpop.permute.xlu2 %907 }
 0x40c   : > { %v919_v25 = vadd.f32 %v908_v53, %v895_v52 }
 0x40e   : > { %v923_v31 = vpack.c.bf16 %v919_v25, %v919_v25 }
 0x410   : > { %v1058_v27 = vsel %vm1053_vm6, %v923_v31, 0 }
 0x411   : > { %1067 = vmatpush.bf16.xpose.msra.mxu1 %v1058_v27 }
 0x413   : > { %v736_v4 = vpop.permute.xlu2 %735 }
 0x414   : > { %v744_v8 = vadd.f32 %v736_v4, %v716_v6 }
 0x416   : > { %v748_v13 = vpack.c.bf16 %v744_v8, %v744_v8 }
 0x421   : > { %v912_v54 = vpop.permute.xlu1 %911 }
 0x422   : > { %v921_v55 = vadd.f32 %v912_v54, %v897_v41 }
 0x424   : > { %v925_v49 = vpack.c.bf16 %v921_v55, %v921_v55 }
 0x426   : > { %v1096_v56 = vsel %vm1053_vm6, %v925_v49, 0 }
 0x427   : > { %1105 = vmatpush.bf16.xpose.msra.mxu3 %v1096_v56 }
 0x429   : > { %v734_v59 = vpop.permute.xlu0 %733  ;;  %v732_v47 = vpop.permute.xlu1 %731 }
 0x42a   : > { %v743_v60 = vadd.f32 %v734_v59, %v715_v57  ;;  %v742_v61 = vadd.f32 %v732_v47, %v714_v58 }
 0x42c   : > { %v747_v62 = vpack.c.bf16 %v743_v60, %v743_v60  ;;  %v746_v63 = vpack.c.bf16 %v742_v61, %v742_v61 }
 0x42e   : > { %1706 = vmatmul.msk.bf16.vlgmr.msra.gmra.mxu2 %vm1053_vm6, %v746_v63  ;;  %1707 = vmatmul.msk.bf16.vlgmr.msra.gmra.mxu3 %vm1053_vm6, %v747_v62 }
 0x431   : > { %v914_v1 = vpop.permute.xlu0 %913  ;;  %v730_v2 = vpop.permute.xlu1 %729 }
 0x432   : > { %v922_v3 = vadd.f32 %v914_v1, %v898_v44  ;;  %v741_v28 = vadd.f32 %v730_v2, %v713_v0 }
 0x434   : > { %v926_v37 = vpack.c.bf16 %v922_v3, %v922_v3  ;;  %v745_v5 = vpack.c.bf16 %v741_v28, %v741_v28 }
 0x436   : > { %1705 = vmatmul.msk.bf16.vlgmr.msra.gmra.mxu1 %vm1053_vm6, %v745_v5  ;;  %v1115_v7 = vsel %vm1053_vm6, %v926_v37, 0 }
 0x437   : > { %1124 = vmatpush.bf16.xpose.msrb.mxu0 %v1115_v7 }
 0x439   : > { %v1859_v9 = vpop.permute.xlu0 %1858  ;;  %v1864_v10 = vpop.permute.xlu1 %1863 }
 0x43a   : > { %v1861_v51 = vunpack.i.h.bf16 %v1859_v9  ;;  %v1860_v11 = vunpack.i.l.bf16 %v1859_v9  ;;  %v1866_v36 = vunpack.i.h.bf16 %v1864_v10  ;;  %v1865_v12 = vunpack.i.l.bf16 %v1864_v10 }
 0x43c   : > { %v953_v14 = vrot.slane %v1861_v51, 4  ;;  %v941_v15 = vrot.slane %v1860_v11, 4  ;;  %v951_v16 = vrot.slane %v1866_v36, 4  ;;  %v939_v17 = vrot.slane %v1865_v12, 4 }
 0x43e   : > { %v952_v18 = vsel %vm578_vm4, %v951_v16, %v1861_v51  ;;  %v954_v33 = vsel %vm578_vm4, %v1866_v36, %v953_v14  ;;  %v940_v19 = vsel %vm578_vm4, %v939_v17, %v1860_v11  ;;  %v942_v20 = vsel %vm578_vm4, %v1865_v12, %v941_v15  ;;  %1708 = vmatmul.msk.bf16.vlgmr.msrb.gmra.mxu0 %vm1053_vm6, %v748_v13 }
 0x43f   : > { %v958_v21 = vperm.slane %v952_v18, %v2316_v35  ;;  %v962_v22 = vperm.slane %v954_v33, %v2316_v35  ;;  %v946_v23 = vperm.slane %v940_v19, %v2316_v35  ;;  %v950_v24 = vperm.slane %v942_v20, %v2316_v35 }
 0x441   : > { %v963_v26 = vrot.slane %v958_v21, 4  ;;  %v975_v29 = vrot.slane %v962_v22, 4  ;;  %v965_v30 = vrot.slane %v946_v23, 4  ;;  %v977_v32 = vrot.slane %v950_v24, 4 }
 0x443   : > { %v964_v34 = vsel %vm578_vm4, %v963_v26, %v946_v23  ;;  %v966_v38 = vsel %vm578_vm4, %v958_v21, %v965_v30  ;;  %v976_v39 = vsel %vm578_vm4, %v975_v29, %v950_v24  ;;  %v978_v40 = vsel %vm578_vm4, %v962_v22, %v977_v32 }
 0x444   : > { %v970_v43 = vperm.slane %v964_v34, %v2323_v42  ;;  %v974_v45 = vperm.slane %v966_v38, %v2323_v42  ;;  %v982_v46 = vperm.slane %v976_v39, %v2323_v42  ;;  %v986_v48 = vperm.slane %v978_v40, %v2323_v42 }
 0x446   : > { %v987_v50 = vrot.slane %v970_v43, 4  ;;  %v989_v52 = vrot.slane %v974_v45, 4  ;;  %v991_v53 = vrot.slane %v982_v46, 4  ;;  %v993_v25 = vrot.slane %v986_v48, 4 }
 0x448   : > { %v990_v31 = vsel %vm578_vm4, 0.0, %v989_v52  ;;  %v994_v27 = vsel %vm578_vm4, 0.0, %v993_v25  ;;  %v1006_v41 = vsel %vm578_vm4, %v993_v25, %v982_v46  ;;  %v995_v49 = vsel %vm578_vm4, %v989_v52, %v970_v43 }
 0x449   : > { %v1000_v54 = vrot.slane %v990_v31, 4  ;;  %v1011_v55 = vrot.slane %v994_v27, 4  ;;  %v992_v56 = vsel %vm578_vm4, 0.0, %v991_v53  ;;  %v988_v57 = vsel %vm578_vm4, 0.0, %v987_v50 }
 0x44a   : > { %v999_v58 = vperm.slane %v995_v49, %v2316_v35  ;;  %v1010_v59 = vperm.slane %v1006_v41, %v2316_v35 }
 0x44b   : > { %v1001_v47 = vsel %vm578_vm4, %v1000_v54, %v988_v57  ;;  %v1012_v60 = vsel %vm578_vm4, %v1011_v55, %v992_v56 }
 0x44c   : > { %v1005_v61 = vperm.slane %v1001_v47, %v2316_v35  ;;  %v1016_v62 = vperm.slane %v1012_v60, %v2316_v35  ;;  %v1019_v63 = vrot.slane %v999_v58, 4  ;;  %v1031_v44 = vrot.slane %v1010_v59, 4 }
 0x44e   : > { %v1020_v0 = vsel %vm578_vm4, %v1005_v61, %v1019_v63  ;;  %v1032_v1 = vsel %vm578_vm4, %v1016_v62, %v1031_v44  ;;  %v1017_v2 = vrot.slane %v1005_v61, 4  ;;  %v1029_v3 = vrot.slane %v1016_v62, 4 }
 0x44f   : > { %v1028_v28 = vperm.slane %v1020_v0, %v2323_v42  ;;  %v1040_v4 = vperm.slane %v1032_v1, %v2323_v42 }
 0x450   : > { %v1018_v37 = vsel %vm578_vm4, %v1017_v2, %v999_v58  ;;  %v1030_v5 = vsel %vm578_vm4, %v1029_v3, %v1010_v59 }
 0x451   : > { %v1045_v6 = vrot.slane %v1040_v4, 4  ;;  %v1047_v7 = vrot.slane %v1028_v28, 4  ;;  %v1024_v8 = vperm.slane %v1018_v37, %v2323_v42  ;;  %v1036_v9 = vperm.slane %v1030_v5, %v2323_v42 }
 0x453   : > { %v1046_v10 = vsel %vm578_vm4, %v1045_v6, %v1028_v28  ;;  %v1048_v51 = vsel %vm578_vm4, %v1040_v4, %v1047_v7  ;;  %v1041_v11 = vrot.slane %v1036_v9, 4  ;;  %v1043_v36 = vrot.slane %v1024_v8, 4 }
 0x454   : > { %v1051_v12 = vpack.c.bf16 %v1046_v10, %v1046_v10  ;;  %v1052_v13 = vpack.c.bf16 %v1048_v51, %v1048_v51 }
 0x455   : > { %v1042_v14 = vsel %vm578_vm4, %v1041_v11, %v1024_v8  ;;  %v1044_v15 = vsel %vm578_vm4, %v1036_v9, %v1043_v36 }
 0x456   : > { %v1213_v16 = vsel %vm1173_vm7, %v1051_v12, 0  ;;  %v1232_v17 = vsel %vm1173_vm7, %v1052_v13, 0  ;;  %v1049_v18 = vpack.c.bf16 %v1042_v14, %v1042_v14  ;;  %v1050_v33 = vpack.c.bf16 %v1044_v15, %v1044_v15 }
 0x457   : > { %1222 = vmatpush.bf16.msrb.mxu3 %v1213_v16  ;;  %1241 = vmatpush.bf16.msra.mxu0 %v1232_v17 }
 0x458   : > { %v1175_v19 = vsel %vm1173_vm7, %v1049_v18, 0  ;;  %v1194_v20 = vsel %vm1173_vm7, %v1050_v33, 0 }
 0x459   : > { %1184 = vmatpush.bf16.msrb.mxu1 %v1175_v19  ;;  %1203 = vmatpush.bf16.msrb.mxu2 %v1194_v20 }
 0x4b1   : > { %v1088_v21 = vpop.f32.mrf.mxu2  ;;  %v1107_v22 = vpop.f32.mrf.mxu3 }
 0x4b2   : > { %v1136_v23 = vsel %vm1053_vm6, %v1107_v22, -inf  ;;  %v1133_v24 = vsel %vm1053_vm6, %v1088_v21, -inf }
 0x4b3   : > { %1137 = vmax.xlane.f32.xlu2 %v1136_v23  ;;  %1134 = vmax.xlane.f32.xlu0 %v1133_v24  ;;  %v1069_v26 = vpop.f32.mrf.mxu1 }
 0x4b4   : > { %v1130_v29 = vsel %vm1053_vm6, %v1069_v26, -inf }
 0x4b5   : > { %1131 = vmax.xlane.f32.xlu1 %v1130_v29 }
 0x4b9   : > { %v1090_v30 = vpop.f32.mrf.mxu2  ;;  %v1109_v32 = vpop.f32.mrf.mxu3 }
 0x4bb   : > { %v1071_v34 = vpop.f32.mrf.mxu1  ;;  %v1126_v38 = vpop.f32.mrf.mxu0 }
 0x4bc   : > { %v1139_v39 = vsel %vm1053_vm6, %v1126_v38, -inf }
 0x4bd   : > { %1140 = vmax.xlane.f32.xlu2 %v1139_v39 }
 0x4c3   : > { %v1128_v40 = vpop.f32.mrf.mxu0 }
 0x526   : > { %v1135_v43 = vpop.xlane.xlu0 %1134  ;;  %v1138_v45 = vpop.xlane.xlu2 %1137 }
 0x527   : > { %v1143_v46 = vsub.f32 %v1088_v21, %v1135_v43  ;;  %v1144_v48 = vsub.f32 %v1107_v22, %v1138_v45 }
 0x528   : > { %v1132_v50 = vpop.xlane.xlu1 %1131 }
 0x529   : > { %v1148_v52 = vmul.f32 1.442695, %v1143_v46  ;;  %v1150_v53 = vmul.f32 1.442695, %v1144_v48  ;;  %v1142_v25 = vsub.f32 %v1069_v26, %v1132_v50 }
 0x52b   : > { %1875 = vpow2.f32 %v1148_v52  ;;  %v1146_v31 = vmul.f32 1.442695, %v1142_v25 }
 0x52c   : > { %1877 = vpow2.f32 %v1150_v53 }
 0x52d   : > { %1879 = vpow2.f32 %v1146_v31 }
 0x530   : > { %v1141_v27 = vpop.xlane.xlu2 %1140 }
 0x531   : > { %v1876_v41 = vpop.eup %1875  ;;  %v1145_v54 = vsub.f32 %v1126_v38, %v1141_v27 }
 0x532   : > { %v1878_v55 = vpop.eup %1877  ;;  %v1167_v49 = vpack.c.bf16 %v1876_v41, %v1876_v41  ;;  %v1157_v62 = vsel %vm1053_vm6, %v1876_v41, 0.0 }
 0x533   : > { %v1880_v56 = vpop.eup %1879  ;;  %v1152_v57 = vmul.f32 1.442695, %v1145_v54  ;;  %v1160_v58 = vsel %vm1053_vm6, %v1878_v55, 0.0  ;;  %v1168_v59 = vpack.c.bf16 %v1878_v55, %v1878_v55 }
 0x534   : > { %1161 = vadd.xlane.f32.xlu0 %v1160_v58  ;;  %1710 = vmatmul.msk.bf16.vlgmr.msrb.gmra.mxu2 %vm1053_vm6, %v1167_v49  ;;  %v1154_v47 = vsel %vm1053_vm6, %v1880_v56, 0.0  ;;  %v1166_v60 = vpack.c.bf16 %v1880_v56, %v1880_v56 }
 0x535   : > { %1881 = vpow2.f32 %v1152_v57  ;;  %1711 = vmatmul.msk.bf16.vlgmr.msrb.gmra.mxu3 %vm1053_vm6, %v1168_v59  ;;  %1155 = vadd.xlane.f32.xlu2 %v1154_v47 }
 0x536   : > { %1709 = vmatmul.msk.bf16.vlgmr.msrb.gmra.mxu1 %vm1053_vm6, %v1166_v60 }
 0x53b   : > { %v1882_v61 = vpop.eup %1881 }
 0x53c   : > { %v1169_v63 = vpack.c.bf16 %v1882_v61, %v1882_v61  ;;  %1158 = vadd.xlane.f32.xlu0 %v1157_v62  ;;  %v1163_v44 = vsel %vm1053_vm6, %v1882_v61, 0.0 }
 0x53d   : > { %1164 = vadd.xlane.f32.xlu1 %v1163_v44 }
 0x53e   : > { %1712 = vmatmul.msk.bf16.vlgmr.msra.gmra.mxu0 %vm1053_vm6, %v1169_v63 }
 0x5a7   : > { %v1162_v0 = vpop.xlane.xlu0 %1161 }
 0x5a8   : > { %v1156_v1 = vpop.xlane.xlu2 %1155 }
 0x5a9   : > { %1883 = vrcp.f32 %v1156_v1 }
 0x5af   : > { %v1159_v2 = vpop.xlane.xlu0 %1158  ;;  %v1884_v4 = vpop.eup %1883 }
 0x5b0   : > { %1885 = vrcp.f32 %v1159_v2  ;;  %v1165_v3 = vpop.xlane.xlu1 %1164 }
 0x5b1   : > { %1887 = vrcp.f32 %v1162_v0 }
 0x5b2   : > { %1889 = vrcp.f32 %v1165_v3 }
 0x5b3   : > { %v1186_v28 = vpop.f32.mrf.mxu1 }
 0x5b4   : > { %v1251_v37 = vmul.f32 %v1884_v4, %v1186_v28 }
 0x5b6   : > { %v1886_v5 = vpop.eup %1885  ;;  %v1257_v10 = vrot.slane %v1251_v37, 4 }
 0x5b7   : > { %v1205_v6 = vpop.f32.mrf.mxu2  ;;  %v1888_v7 = vpop.eup %1887 }
 0x5b8   : > { %v1252_v8 = vmul.f32 %v1886_v5, %v1205_v6  ;;  %v1224_v9 = vpop.f32.mrf.mxu3  ;;  %v1890_v11 = vpop.eup %1889 }
 0x5b9   : > { %v1253_v51 = vmul.f32 %v1888_v7, %v1224_v9 }
 0x5ba   : > { %v1269_v15 = vrot.slane %v1252_v8, 4 }
 0x5bb   : > { %v1255_v36 = vrot.slane %v1253_v51, 4  ;;  %v1258_v12 = vsel %vm578_vm4, %v1253_v51, %v1257_v10  ;;  %v1188_v13 = vpop.f32.mrf.mxu1  ;;  %v1243_v14 = vpop.f32.mrf.mxu0 }
 0x5bc   : > { %v1266_v16 = vperm.slane %v1258_v12, %v2316_v35  ;;  %v1254_v17 = vmul.f32 %v1890_v11, %v1243_v14 }
 0x5bd   : > { %v1256_v18 = vsel %vm578_vm4, %v1255_v36, %v1251_v37 }
 0x5be   : > { %v1262_v33 = vperm.slane %v1256_v18, %v2316_v35  ;;  %v1267_v19 = vrot.slane %v1254_v17, 4  ;;  %v1270_v20 = vsel %vm578_vm4, %v1254_v17, %v1269_v15  ;;  %v1293_v21 = vrot.slane %v1266_v16, 4  ;;  %v1754_v15 = vld [vmem:[%s2674_s6] sm:$0xff] }
 0x5bf   : > { %v1278_v22 = vperm.slane %v1270_v20, %v2316_v35  ;;  %v1207_v23 = vpop.f32.mrf.mxu2 }
 0x5c0   : > { %v1268_v24 = vsel %vm578_vm4, %v1267_v19, %v1252_v8  ;;  %v1226_v26 = vpop.f32.mrf.mxu3  ;;  %v1281_v29 = vrot.slane %v1262_v33, 4  ;;  %v1897_v23 = vld [vmem:[%s2283_s27] sm:$0xff]  ;;  %s1749_s27 = sshll.u32 %s2204_s29, 3  ;;  %s1567_s29 = scalar_lea.sflag [#allocation4], %s490_s23 }
 0x5c1   : > { %v1274_v30 = vperm.slane %v1268_v24, %v2316_v35  ;;  %v1291_v32 = vrot.slane %v1278_v22, 4  ;;  %v1294_v34 = vsel %vm578_vm4, %v1278_v22, %v1293_v21  ;;  %s1577_s22 = scalar_lea.hbm %s2681_s13, %s1749_s27 }
 0x5c2   : > { %v1302_v38 = vperm.slane %v1294_v34, %v2323_v42  ;;  %s1581_s4 = sshll.u32 %s1577_s22, 4  ;;  %s1582_s4 = int_to_ptr.hbm [resolvable:$true] %s1581_s4 }
 0x5c3   : > { %v1279_v39 = vrot.slane %v1274_v30, 4  ;;  %v1282_v40 = vsel %vm578_vm4, %v1274_v30, %v1281_v29  ;;  %v1292_v43 = vsel %vm578_vm4, %v1291_v32, %v1266_v16  ;;  %v1245_v45 = vpop.f32.mrf.mxu0  ;;  %s2032_s5 = sshra.s32 %s1582_s4, 4  ;;  %s2033_s5 = int_to_ptr.hbm [resolvable:$true] %s2032_s5 }
 0x5c4   : > { %v1290_v46 = vperm.slane %v1282_v40, %v2323_v42  ;;  %v1298_v48 = vperm.slane %v1292_v43, %v2323_v42  ;;  %v1309_v50 = vrot.slane %v1302_v38, 4  ;;  %v1757_v40 = vld [vmem:[#allocation8 + $0x8] sm:$0xff]  ;;  %v1756_v43 = vld [vmem:[#allocation8] sm:$0xff]  ;;  %p2039_p3 = scmp.lt.s32.totalorder %s2033_s5, %s2681_s13 }
 0x5c5   : > { %v1280_v52 = vsel %vm578_vm4, %v1279_v39, %v1262_v33  ;;  %1477 = vmatpush.bf16.msra.mxu2 %v1757_v40 }
 0x5c6   : > { %v1286_v53 = vperm.slane %v1280_v52, %v2323_v42  ;;  %v1305_v25 = vrot.slane %v1290_v46, 4  ;;  %v1307_v31 = vrot.slane %v1298_v48, 4  ;;  %v1310_v27 = vsel %vm578_vm4, 0.0, %v1309_v50 }
 0x5c7   : > { %v1322_v41 = vsel %vm578_vm4, %v1309_v50, %v1298_v48  ;;  %v1327_v54 = vrot.slane %v1310_v27, 4 }
 0x5c8   : > { %v1306_v55 = vsel %vm578_vm4, 0.0, %v1305_v25  ;;  %v1303_v49 = vrot.slane %v1286_v53, 4  ;;  %v1308_v56 = vsel %vm578_vm4, 0.0, %v1307_v31  ;;  %v1311_v57 = vsel %vm578_vm4, %v1305_v25, %v1286_v53 }
 0x5c9   : > { %v1316_v58 = vrot.slane %v1306_v55, 4  ;;  %v1315_v59 = vperm.slane %v1311_v57, %v2316_v35  ;;  %v1326_v47 = vperm.slane %v1322_v41, %v2316_v35  ;;  %v1328_v60 = vsel %vm578_vm4, %v1327_v54, %v1308_v56  ;;  %1478 = vmatpush.bf16.msra.mxu2 %v1756_v43  ;;  %v1869_v41 = vld [vmem:[%s2675_s7] ss:$0 sm:$0xff] }
 0x5ca   : > { %v1304_v61 = vsel %vm578_vm4, 0.0, %v1303_v49  ;;  %v1332_v62 = vperm.slane %v1328_v60, %v2316_v35  ;;  %v1870_v49 = vld [vmem:[%s2676_s8] ss:$0 sm:$0xff] }
 0x5cb   : > { %v1317_v63 = vsel %vm578_vm4, %v1316_v58, %v1304_v61  ;;  %v1335_v44 = vrot.slane %v1315_v59, 4  ;;  %v1347_v0 = vrot.slane %v1326_v47, 4  ;;  %v1761_v61 = vld [vmem:[%s2679_s11 + $0x18] sm:$0xff] }
 0x5cc   : > { %v1321_v1 = vperm.slane %v1317_v63, %v2316_v35  ;;  %v1345_v2 = vrot.slane %v1332_v62, 4  ;;  %1555 = vmatpush.bf16.msra.mxu3 %v1761_v61 }
 0x5cd   : > { %v1348_v3 = vsel %vm578_vm4, %v1332_v62, %v1347_v0 }
 0x5ce   : > { %v1336_v28 = vsel %vm578_vm4, %v1321_v1, %v1335_v44  ;;  %v1356_v4 = vperm.slane %v1348_v3, %v2323_v42  ;;  %v1333_v37 = vrot.slane %v1321_v1, 4  ;;  %v1346_v5 = vsel %vm578_vm4, %v1345_v2, %v1326_v47  ;;  %v1760_v44 = vld [vmem:[%s2679_s11 + $0x10] sm:$0xff]  ;;  %v1759_v3 = vld [vmem:[%s2679_s11 + $0x8] sm:$0xff] }
 0x5cf   : > { %v1344_v6 = vperm.slane %v1336_v28, %v2323_v42  ;;  %v1352_v7 = vperm.slane %v1346_v5, %v2323_v42  ;;  %v1758_v28 = vld [vmem:[%s2679_s11] sm:$0xff] }
 0x5d0   : > { %v1361_v8 = vrot.slane %v1356_v4, 4  ;;  %v1334_v9 = vsel %vm578_vm4, %v1333_v37, %v1315_v59  ;;  %v1871_v59 = vld [vmem:[%s2678_s10] ss:$0 sm:$0xff]  ;;  %1556 = vmatpush.bf16.msra.mxu3 %v1760_v44 }
 0x5d1   : > { %v1363_v10 = vrot.slane %v1344_v6, 4  ;;  %v1340_v35 = vperm.slane %v1334_v9, %v2323_v42  ;;  %v1357_v51 = vrot.slane %v1352_v7, 4  ;;  %v1755_v42 = vld [vmem:[%s2674_s6 + $0x8] sm:$0xff] }
 0x5d2   : > { %v1362_v11 = vsel %vm578_vm4, %v1361_v8, %v1344_v6  ;;  %1408 = vmatpush.bf16.msra.mxu1 %v1755_v42 }
 0x5d3   : > { %1370 = vrot.lane.b32.xlu1 %v1362_v11, %s2110_s25  ;;  %v1364_v36 = vsel %vm578_vm4, %v1356_v4, %v1363_v10  ;;  %v1359_v12 = vrot.slane %v1340_v35, 4  ;;  %v1358_v13 = vsel %vm578_vm4, %v1357_v51, %v1340_v35  ;;  %s2034_s25 = scalar_lea.hbm %s2033_s5, 8 }
 0x5d4   : > { %1374 = vrot.lane.b32.xlu0 %v1364_v36, %s2111_s17  ;;  %1557 = vmatpush.bf16.msra.mxu3 %v1759_v3  ;;  %p2035_p0 = scmp.ne.s32.totalorder %s2033_s5, %s2034_s25  ;;  %p2040_p4 = scmp.lt.s32.totalorder %s2038_s20, %s2034_s25 }
 0x5d5   : > { %v1360_v14 = vsel %vm578_vm4, %v1352_v7, %v1359_v12 }
 0x5d6   : > { %1366 = vrot.lane.b32.xlu2 %v1360_v14, %s2106_s14  ;;  %1409 = vmatpush.bf16.msra.mxu1 %v1754_v15  ;;  %v2112_v15 = vmov -1.0   ;;  %s492_s14 = scalar_lea.vmem [#allocation10], %s1694_s30  ;;  %p2036_p1 = pnand %p2035_p0, %p2221_p5 }
 0x5d7   : > { %s1579_s1 = sshll.u32 %s492_s14, 4  ;;  %p2041_p7 = por %p2040_p4, %p2039_p3  ;;  %s1580_s1 = int_to_ptr.vmem [resolvable:$true] %s1579_s1 }
 0x5d8   : > { %1558 = vmatpush.bf16.msra.mxu3 %v1758_v28  ;;  %p2037_p2 = pneg %p2036_p1 }
 0x5da   : > { %p2042_p8 = pnand %p2041_p7, %p2037_p2 }
 0x630   : > { %v1367_v16 = vpop.permute.xlu2 %1366 }
 0x631   : > { %v1377_v17 = vsel %vm1053_vm6, %v1358_v13, %v1367_v16 }
 0x645   : > { %v1371_v18 = vpop.permute.xlu1 %1370 }
 0x646   : > { %v1379_v33 = vsel %vm1378_vm8, %v1377_v17, %v1371_v18  ;;  %v1375_v19 = vpop.permute.xlu0 %1374 }
 0x647   : > { %v1381_v20 = vsel %vm1380_vm9, %v1379_v33, %v1375_v19 }
 0x648   : > { %v1382_v21 = vpack.c.bf16 %v1381_v20, %v1381_v20 }
 0x64a   : > { %1721 = vmatmul.msk.bf16.vlgmr.msra.gmra.mxu1 %vm501_vm0, %v1382_v21  ;;  %v1872_v21 = vld [vmem:[%s2680_s12] ss:$0 sm:$0xff] }
 0x6c7   : > { %v1411_v22 = vpop.f32.mrf.mxu1 }
 0x6c8   : > { %v2603_v24 = vadd.f32 %v1897_v23, %v1411_v22 }
 0x6ca   : > { %v1417_v26 = vsel %vm501_vm0, %v2603_v24, 0.0 }
 0x6cb   : > { %1418 = vadd.xlane.f32.xlu2 %v1417_v26 }
 0x6cf   : > { %v1413_v29 = vpop.f32.mrf.mxu1 }
 0x73e   : > { %v1419_v30 = vpop.xlane.xlu2 %1418 }
 0x73f   : > { %v1420_v32 = vmul.f32 0.03125, %v1419_v30 }
 0x741   : > { %v1421_v34 = vsub.f32 %v2603_v24, %v1420_v32 }
 0x743   : > { %v1422_v38 = vmul.f32 %v1421_v34, %v1421_v34 }
 0x745   : > { %v1423_v39 = vsel %vm501_vm0, %v1422_v38, 0.0 }
 0x746   : > { %1424 = vadd.xlane.f32.xlu0 %v1423_v39 }
 0x7b9   : > { %v1425_v45 = vpop.xlane.xlu0 %1424 }
 0x7ba   : > { %v1426_v46 = vmul.f32 0.03125, %v1425_v45 }
 0x7bc   : > { %v1427_v48 = vadd.f32 1e-05, %v1426_v46 }
 0x7be   : > { %1891 = vrsqrt.f32 %v1427_v48  ;;  %vm1434_vm11 = vweird.f32 %v1427_v48 }
 0x7c4   : > { %v1892_v50 = vpop.eup %1891 }
 0x7c5   : > { %v1429_v52 = vmul.f32 %v1892_v50, %v1427_v48  ;;  %vm1435_vm10 = vweird.f32 %v1892_v50 }
 0x7c6   : > { %vm1436_vm12 = vmor %vm1434_vm11, %vm1435_vm10 }
 0x7c7   : > { %v1430_v53 = vmul.f32 %v1892_v50, %v1429_v52 }
 0x7c9   : > { %v1431_v25 = vmul.f32 0.5, %v1430_v53 }
 0x7cb   : > { %v1432_v31 = vsub.f32 1.5, %v1431_v25 }
 0x7cd   : > { %v1433_v27 = vmul.f32 %v1892_v50, %v1432_v31 }
 0x7cf   : > { %v1437_v54 = vsel %vm1436_vm12, %v1892_v50, %v1433_v27 }
 0x7d0   : > { %v1438_v55 = vmul.f32 %v1437_v54, %v1421_v34 }
 0x7d2   : > { %v1442_v56 = vmul.f32 %v1869_v41, %v1438_v55 }
 0x7d4   : > { %v1446_v57 = vadd.f32 %v1870_v49, %v1442_v56 }
 0x7d6   : > { %v1447_v58 = vpack.c.bf16 %v1446_v57, %v1446_v57 }
 0x7d8   : > { %1730 = vmatmul.msk.bf16.vlgmr.msra.gmra.mxu2 %vm501_vm0, %v1447_v58 }
 0x85b   : > { %v1480_v47 = vpop.f32.mrf.mxu2 }
 0x85c   : > { %v1481_v60 = vadd.f32 %v1871_v59, %v1480_v47 }
 0x85e   : > { %v1485_v62 = vmul.f32 0.70710677, %v1481_v60  ;;  %v1484_v18 = vmul.f32 0.5, %v1481_v60 }
 0x860   : > { %v1488_v63 = vand.u32 2147483647, %v1485_v62  ;;  %vm1486_vm13 = vcmp.ge.f32.partialorder %v1485_v62, 0.0 }
 0x861   : > { %v1487_v16 = vsel %vm1486_vm13, 1.0, %v2112_v15 }
 0x862   : > { %v1489_v0 = vmul.f32 0.3275911, %v1488_v63  ;;  %v1501_v37 = vsub.f32 0.0, %v1488_v63 }
 0x863   : > { %v1482_v1 = vpop.f32.mrf.mxu2 }
 0x864   : > { %v1490_v2 = vadd.f32 1.0, %v1489_v0  ;;  %v1502_v7 = vmul.f32 %v1501_v37, %v1488_v63 }
 0x866   : > { %1893 = vrcp.f32 %v1490_v2  ;;  %v1503_v10 = vmul.f32 1.442695, %v1502_v7 }
 0x868   : > { %1895 = vpow2.f32 %v1503_v10 }
 0x86c   : > { %v1894_v4 = vpop.eup %1893 }
 0x86d   : > { %v1492_v5 = vmul.f32 1.0614054, %v1894_v4 }
 0x86e   : > { %v1896_v13 = vpop.eup %1895 }
 0x86f   : > { %v1493_v6 = vadd.f32 -1.4531521, %v1492_v5 }
 0x871   : > { %v1494_v8 = vmul.f32 %v1894_v4, %v1493_v6 }
 0x873   : > { %v1495_v9 = vadd.f32 1.4214138, %v1494_v8 }
 0x875   : > { %v1496_v35 = vmul.f32 %v1894_v4, %v1495_v9 }
 0x877   : > { %v1497_v51 = vadd.f32 -0.28449672, %v1496_v35 }
 0x879   : > { %v1498_v11 = vmul.f32 %v1894_v4, %v1497_v51 }
 0x87b   : > { %v1499_v36 = vadd.f32 0.2548296, %v1498_v11 }
 0x87d   : > { %v1500_v12 = vmul.f32 %v1894_v4, %v1499_v36 }
 0x87f   : > { %v1505_v14 = vmul.f32 %v1896_v13, %v1500_v12 }
 0x881   : > { %v1506_v42 = vsub.f32 1.0, %v1505_v14 }
 0x883   : > { %v1507_v17 = vmul.f32 %v1506_v42, %v1487_v16 }
 0x885   : > { %v1508_v33 = vadd.f32 1.0, %v1507_v17 }
 0x887   : > { %v1509_v19 = vmul.f32 %v1508_v33, %v1484_v18 }
 0x889   : > { %v1510_v20 = vpack.c.bf16 %v1509_v19, %v1509_v19 }
 0x88b   : > { %1747 = vmatmul.msk.bf16.vlgmr.msra.gmra.mxu3 %vm1547_vm14, %v1510_v20 }
 0x90e   : > { %v1560_v22 = vpop.f32.mrf.mxu3 }
 0x90f   : > { %v1561_v23 = vadd.f32 %v1872_v21, %v1560_v22 }
 0x911   : > { %v1564_v26 = vadd.f32 %v1561_v23, %v2603_v24 }
 0x913   : > { %1565 = vst.msk [vmem:[%s492_s14] sm:$0xff] %vm501_vm0, %v1564_v26 }
 0x914   : > { %2045 = shalt.err (!%p2042_p8)
}
 0x915   : > { %1778 = dma.vmem_to_hbm [thread:$0]  (%p2221_p5), %s1580_s1, 128, %s1582_s4, %s1567_s29  }
 0x916   : > { %v1562_v24 = vpop.f32.mrf.mxu3 }
 0x917 PF: > { %s2702_s23 = sld [smem:[#allocation15_spill]]  ;;  %p1805_p9 = scmp.ge.s32.totalorder %s2092_s28, 2 }
 0x919   : > { %p1794_p10 = pnand %p1805_p9, %p2225_p6 }
 0x91b   : > { %p1795_p11 = pneg %p1794_p10 }
 0x91d   : > { %s1593_s15 = sand.u32 1, %s2702_s23  }
 0x91e   : > { %s1594_s16 = scalar_lea.sflag [#allocation4], %s1593_s15 }
 0x91f   : > { %2075 = dma.done.wait (%p1795_p11), %s1594_s16, 128  }
 0x920   : > { %2077 = vsyncadd (%p1795_p11), %s1594_s16, 4294967168  ;;  %s2704_s28 = sld [smem:[#allocation17_spill]]  ;;  %s2707_s25 = smov %s2084_s26 }
 0x921   : > { %s2705_s21 = sld [smem:[#allocation16_spill]] }
 0x922   : > { %s2706_s27 = sld [smem:[#allocation18_spill]] }
 0x926   : > { %p26_p12 = scmp.ge.s32.totalorder %s2704_s28, 4  }
 0x927   : > { %s2708_s26 = smov %s2705_s21 }
 0x928   :  { %28 = sbr.rel (!%p26_p12) target bundleno = 10 (0xa), region = 124 }
 0x92d   :  { %1600 = vsyncpa [#allocation3], 1 }
 0x92e   :  { %1602 = vsyncpa [#allocation3 + $0x1], 1 }
 0x92f   :  { %1603 = vsyncpa [#allocation6], 1 }
 0x930   :  { %1604 = vsyncpa [#allocation9], 1 }
 0x931   :  { %1605 = vsyncpa [#allocation4], 1 }
 0x932   :  { %1607 = vsyncpa [#allocation4 + $0x1], 1 }

// kernel: tpu_custom_call.1
= control target key start
LH: loop header
LB: loop body
LE: loop exit
PB: predicated region body
PF: predicated region fallthrough
CT: control target
= control target key end

     0   :  { %s2668_s0 = inlined_call_operand.vmem [shape: f32[2,8,32], index: 0, kind: input, shape index: {}]   ;;  %s2669_s1 = inlined_call_operand.hbm [shape: f32[1,32], index: 1, kind: input, shape index: {}]   ;;  %s2670_s2 = inlined_call_operand.vmem [shape: f32[1,32], index: 2, kind: input, shape index: {}]   ;;  %s2671_s3 = inlined_call_operand.vmem [shape: bf16[32,96], index: 3, kind: input, shape index: {}]   ;;  %s2672_s4 = inlined_call_operand.hbm [shape: f32[8,8], index: 4, kind: input, shape index: {}]   ;;  %s2673_s5 = inlined_call_operand.hbm [shape: f32[8,8], index: 5, kind: input, shape index: {}]   ;;  %s2674_s6 = inlined_call_operand.vmem [shape: bf16[32,32], index: 6, kind: input, shape index: {}]   ;;  %s2675_s7 = inlined_call_operand.vmem [shape: f32[1,32], index: 7, kind: input, shape index: {}]   ;;  %s2676_s8 = inlined_call_operand.vmem [shape: f32[1,32], index: 8, kind: input, shape index: {}]   ;;  %s2677_s9 = inlined_call_operand.hbm [shape: bf16[32,64], index: 9, kind: input, shape index: {}]   ;;  %s2678_s10 = inlined_call_operand.vmem [shape: f32[1,64], index: 10, kind: input, shape index: {}]   ;;  %s2679_s11 = inlined_call_operand.vmem [shape: bf16[64,32], index: 11, kind: input, shape index: {}]   ;;  %s2680_s12 = inlined_call_operand.vmem [shape: f32[1,32], index: 12, kind: input, shape index: {}]   ;;  %s2681_s13 = inlined_call_operand.hbm [shape: f32[2,8,32], index: 13, kind: output, shape index: {}]  }
   0x1   :  { %2687 = sst [smem:[#allocation20_spill]] %s2669_s1 }
   0x2   :  { %2688 = sst [smem:[#allocation21_spill]] %s2672_s4 }
   0x3   :  { %2689 = sst [smem:[#allocation22_spill]] %s2673_s5 }
   0x4   :  { %18 = vsyncpa [#allocation3], 0 }
   0x5   :  { %19 = vsyncpa [#allocation6], 0 }
   0x6   :  { %20 = vsyncpa [#allocation9], 0 }
   0x7   :  { %21 = vsyncpa [#allocation4], 0 }
   0x8   :  { %23 = vsyncpa [#allocation4 + $0x1], 0  ;;  %s2183_s25 = smov 0   ;;  %s2185_s26 = smov 0  }
   0x9   :  { %s2187_s27 = smov 0   ;;  %s2189_s28 = smov 0  }
   0xa LB: > { %2690 = sst [smem:[#allocation15_spill]] %s2080_s25  ;;  %s2204_s29 = sadd.s32 4294967295, %s2092_s28   ;;  %s2092_s28 = sphi %s2189_s28, %s2704_s28   ;;  %s2088_s27 = sphi %s2187_s27, %s2706_s27   ;;  %s2084_s26 = sphi %s2185_s26, %s2708_s26   ;;  %s2080_s25 = sphi %s2183_s25, %s2707_s25  }
   0xb   : > { %2691 = sst [smem:[#allocation16_spill]] %s2088_s27  ;;  %s1682_s30 = sadd.s32 4294967294, %s2092_s28  }
   0xc   : > { %s2208_s14 = sadd.s32 1, %s2092_s28   ;;  %s314_s15 = sadd.s32 1, %s2088_s27 }
   0xd   : > { %2692 = sst [smem:[#allocation17_spill]] %s2208_s14  ;;  %s311_s16 = ssub.s32 %s2092_s28, %s2208_s14 }
   0xe   : > { %p324_p0 = scmp.ne.s32.totalorder %s2088_s27, %s2084_s26  ;;  %p312_p1 = scmp.eq.s32.totalorder %s311_s16, 0 }
   0xf   : > { %p325_p2 = scmp.eq.s32.totalorder %s2204_s29, 1  ;;  %p330_p3 = scmp.ne.s32.totalorder %s2084_s26, %s2080_s25 }
  0x10   : > { %p331_p4 = scmp.eq.s32.totalorder %s1682_s30, 1  ;;  %p1683_p7 = scmp.ge.s32.totalorder %s2092_s28, 1 }
  0x11   : > { %s2219_s17 = scalar_select %p312_p1, %s2088_s27, %s314_s15  }
  0x12   : > { %p2221_p5 = por %p325_p2, %p324_p0  ;;  %p2225_p6 = por %p331_p4, %p330_p3 }
  0x13   : > { %2693 = sst [smem:[#allocation18_spill]] %s2219_s17  ;;  %p338_p8 = scmp.lt.s32.totalorder %s2092_s28, 3 }
  0x14   : > { %s2695_s19 = scalar_select %p2225_p6, 1, 0 }
  0x15   : > { %p1797_p9 = scmp.eq.s32.totalorder %s2204_s29, 0  ;;  %p2232_p10 = pnand %p1683_p7, %p338_p8 }
  0x16   : > { %2696 = sst [smem:[#allocation19_spill]] %s2695_s19  ;;  %s2094_s24 = smov [#allocation5]  }
  0x17   : > { %s2698_s4 = sld [smem:[#allocation21_spill]]  ;;  %p1780_p11 = pneg %p2232_p10 }
  0x18   : > { %s370_s30 = sshll.u32 %s2094_s24, 4  ;;  %s2699_s1 = sld [smem:[#allocation20_spill]]  ;;  %s371_s30 = int_to_ptr.vmem [resolvable:$true] %s370_s30 }
  0x19   : > { %p2246_p12 = pnand %p1797_p9, %p1780_p11  ;;  %s2701_s5 = sld [smem:[#allocation22_spill]] }
  0x1a   : > { %s2095_s14 = smov [#allocation2]   ;;  %s2096_s19 = smov [#allocation7]  }
  0x1b   : > { %s352_s24 = sshll.u32 %s2095_s14, 4  ;;  %s382_s25 = sshll.u32 %s2096_s19, 4  ;;  %s353_s24 = int_to_ptr.vmem [resolvable:$true] %s352_s24  ;;  %s383_s25 = int_to_ptr.vmem [resolvable:$true] %s382_s25 }
  0x1c   : > { %s2097_s21 = smov [#allocation8]   ;;  %s2098_s14 = smov 64  }
  0x1d   : > { %s368_s23 = sshll.u32 %s2698_s4, 4  ;;  %s402_s22 = sshll.u32 %s2097_s21, 4  ;;  %s369_s23 = int_to_ptr.hbm [resolvable:$true] %s368_s23  ;;  %s403_s22 = int_to_ptr.vmem [resolvable:$true] %s402_s22 }
  0x1e   : > { %s350_s17 = sshll.u32 %s2699_s1, 4  ;;  %s400_s1 = sshll.u32 %s2677_s9, 4  ;;  %s351_s17 = int_to_ptr.hbm [resolvable:$true] %s350_s17  ;;  %s401_s1 = int_to_ptr.hbm [resolvable:$true] %s400_s1 }
  0x1f   : > { %s380_s4 = sshll.u32 %s2701_s5, 4  ;;  %s2099_s5 = smov 4   ;;  %s381_s4 = int_to_ptr.hbm [resolvable:$true] %s380_s4 }
  0x20   : > { %1786 = dma.hbm_to_vmem [thread:$0]  (!%p2246_p12), %s369_s23, 128, %s371_s30, [#allocation6]  }
  0x21   : > { %1783 = dma.hbm_to_vmem [thread:$0]  (!%p2246_p12), %s351_s17, 16, %s353_s24, [#allocation3]  }
  0x22   : > { %1789 = dma.hbm_to_vmem [thread:$0]  (!%p2246_p12), %s381_s4, 128, %s383_s25, [#allocation6]  }
  0x23   : > { %1792 = dma.hbm_to_vmem [thread:$0]  (!%p2246_p12), %s401_s1, 256, %s403_s22, [#allocation9], %s2098_s14, %s2098_s14, %s2099_s5  }
  0x24   : > { %434 = sbr.rel (%p2232_p10) target bundleno = 2327 (0x917), region = 72 }
  0x29   : > { %2063 = dma.done.wait (%p1797_p9), [#allocation3], 16  }
  0x2a   : > { %2065 = vsyncadd (%p1797_p9), [#allocation3], 4294967280 }
  0x2b   : > { %2067 = dma.done.wait (%p1797_p9), [#allocation6], 256  }
  0x2c   : > { %2069 = vsyncadd (%p1797_p9), [#allocation6], 4294967040 }
  0x2d   : > { %2071 = dma.done.wait (%p1797_p9), [#allocation9], 256  }
  0x2e   : > { %2073 = vsyncadd (%p1797_p9), [#allocation9], 4294967040  ;;  %p493_p13 = scmp.lt.s32.totalorder %s2204_s29, 1  ;;  %vm501_vm0 = vcmask 261120   ;;  %v1753_v7 = vld [vmem:[%s2671_s3 + $0x8] sm:$0xff]  ;;  %v1752_v8 = vld [vmem:[%s2671_s3] sm:$0xff] }
  0x2f   : > { %558 = vmatpush.bf16.msra.mxu0 %v1753_v7  ;;  %v1867_v18 = vld [vmem:[#allocation2] ss:$0 sm:$0xff]  ;;  %s2100_s15 = smov 104   ;;  %s2101_s16 = smov 120   ;;  %vm578_vm4 = vcmask 1047556   ;;  %vm688_vm5 = vcmask 1047616  }
  0x30   : > { %s494_s1 = scalar_select %p493_p13, %s2204_s29, 1  ;;  %v1868_v21 = vld [vmem:[%s2670_s2] ss:$0 sm:$0xff]  ;;  %v2104_v29 = vmov 1983009808   ;;  %vm1053_vm6 = vcmask 64512  }
  0x31   : > { %s2102_s21 = smov 96   ;;  %s2103_s22 = smov 112   ;;  %v583_v30 = vunpack.c.l.s4 %v2104_v29  ;;  %v2105_v36 = vmov 1934713408   ;;  %vm1173_vm7 = vcmask 1043456   ;;  %vm1378_vm8 = vcmask 130048  }
  0x32   : > { %s1695_s4 = sshll.u32 %s494_s1, 3  ;;  %v607_v37 = vunpack.c.l.s4 %v2105_v36  ;;  %s2106_s14 = smov 8   ;;  %vm1380_vm9 = vcmask 195584   ;;  %vm1547_vm14 = vcmask 523264  }
  0x33   : > { %s2283_s27 = scalar_lea.vmem %s2668_s0, %s1695_s4  ;;  %559 = vmatpush.bf16.msra.mxu0 %v1752_v8  ;;  %v2316_v35 = vunpack.c.0.s8 %v583_v30  ;;  %s2107_s1 = smov 4  }
  0x34   : > { %v498_v0 = vld [vmem:[%s2283_s27] sm:$0xff]  ;;  %v2323_v42 = vunpack.c.0.s8 %v607_v37  ;;  %s2108_s4 = smov 124   ;;  %s2109_s5 = smov 64  }
  0x35   : > { %v502_v1 = vsel %vm501_vm0, %v498_v0, 0.0  ;;  %s2110_s25 = smov 16   ;;  %s2111_s17 = smov 24  }
  0x36   : > { %503 = vadd.xlane.f32.xlu0 %v502_v1  ;;  %s490_s23 = sand.u32 1, %s2084_s26   ;;  %s2038_s20 = scalar_lea.hbm %s2681_s13, 16 }
  0x37   : > { %s1694_s30 = sshll.u32 %s490_s23, 3 }
  0xa9   : > { %v504_v2 = vpop.xlane.xlu0 %503 }
  0xaa   : > { %v505_v3 = vmul.f32 0.03125, %v504_v2 }
  0xac   : > { %v506_v4 = vsub.f32 %v498_v0, %v505_v3 }
  0xae   : > { %v507_v5 = vmul.f32 %v506_v4, %v506_v4 }
  0xb0   : > { %v508_v6 = vsel %vm501_vm0, %v507_v5, 0.0 }
  0xb1   : > { %509 = vadd.xlane.f32.xlu0 %v508_v6 }
 0x124   : > { %v510_v9 = vpop.xlane.xlu0 %509 }
 0x125   : > { %v511_v10 = vmul.f32 0.03125, %v510_v9 }
 0x127   : > { %v512_v11 = vadd.f32 1e-05, %v511_v10 }
 0x129   : > { %1873 = vrsqrt.f32 %v512_v11  ;;  %vm519_vm2 = vweird.f32 %v512_v11 }
 0x12f   : > { %v1874_v12 = vpop.eup %1873 }
 0x130   : > { %v514_v13 = vmul.f32 %v1874_v12, %v512_v11  ;;  %vm520_vm1 = vweird.f32 %v1874_v12 }
 0x131   : > { %vm521_vm3 = vmor %vm519_vm2, %vm520_vm1 }
 0x132   : > { %v515_v14 = vmul.f32 %v1874_v12, %v514_v13 }
 0x134   : > { %v516_v15 = vmul.f32 0.5, %v515_v14 }
 0x136   : > { %v517_v16 = vsub.f32 1.5, %v516_v15 }
 0x138   : > { %v518_v17 = vmul.f32 %v1874_v12, %v517_v16 }
 0x13a   : > { %v522_v19 = vsel %vm521_vm3, %v1874_v12, %v518_v17 }
 0x13b   : > { %v523_v20 = vmul.f32 %v522_v19, %v506_v4 }
 0x13d   : > { %v527_v22 = vmul.f32 %v1867_v18, %v523_v20 }
 0x13f   : > { %v531_v23 = vadd.f32 %v1868_v21, %v527_v22 }
 0x141   : > { %v532_v24 = vpack.c.bf16 %v531_v23, %v531_v23 }
 0x143   : > { %1704 = vmatmul.msk.bf16.vlgmr.msra.gmra.mxu0 %vm501_vm0, %v532_v24 }
 0x1c0   : > { %v2298_v25 = vpop.f32.mrf.mxu0 }
 0x1c1   : > { %574 = vrot.lane.b32.xlu2 %v2298_v25, %s2100_s15  ;;  %568 = vrot.lane.b32.xlu1 %v2298_v25, %s2101_s16  ;;  %v580_v39 = vrot.slane %v2298_v25, 4 }
 0x1c8   : > { %v563_v26 = vpop.f32.mrf.mxu0 }
 0x1c9   : > { %749 = vrot.lane.b32.xlu2 %v2298_v25, %s2102_s21  ;;  %571 = vrot.lane.b32.xlu1 %v2298_v25, %s2103_s22 }
 0x21b   : > { %v2304_v27 = vpop.permute.xlu2 %574 }
 0x21c   : > { %755 = vrot.lane.b32.xlu2 %v2304_v27, %s2102_s21  ;;  %v590_v28 = vrot.slane %v2304_v27, 4 }
 0x233   : > { %v2308_v31 = vpop.permute.xlu1 %568 }
 0x234   : > { %v591_v32 = vsel %vm578_vm4, %v590_v28, %v2308_v31  ;;  %v592_v33 = vrot.slane %v2308_v31, 4  ;;  %751 = vrot.lane.b32.xlu0 %v2308_v31, %s2102_s21 }
 0x235   : > { %v597_v40 = vperm.slane %v591_v32, %v2316_v35 }
 0x236   : > { %v593_v34 = vsel %vm578_vm4, %v2304_v27, %v592_v33 }
 0x237   : > { %v601_v38 = vperm.slane %v593_v34, %v2316_v35  ;;  %v602_v48 = vrot.slane %v597_v40, 4 }
 0x239   : > { %v614_v45 = vrot.slane %v601_v38, 4 }
 0x23b   : > { %v2321_v41 = vpop.permute.xlu1 %571 }
 0x23c   : > { %v577_v43 = vrot.slane %v2321_v41, 4  ;;  %v581_v44 = vsel %vm578_vm4, %v2321_v41, %v580_v39  ;;  %753 = vrot.lane.b32.xlu1 %v2321_v41, %s2102_s21 }
 0x23d   : > { %v589_v46 = vperm.slane %v581_v44, %v2316_v35 }
 0x23e   : > { %v579_v47 = vsel %vm578_vm4, %v577_v43, %v2298_v25 }
 0x23f   : > { %v585_v49 = vperm.slane %v579_v47, %v2316_v35  ;;  %v615_v50 = vsel %vm578_vm4, %v614_v45, %v589_v46  ;;  %v616_v51 = vrot.slane %v589_v46, 4 }
 0x240   : > { %v621_v52 = vperm.slane %v615_v50, %v2323_v42 }
 0x241   : > { %v603_v53 = vsel %vm578_vm4, %v602_v48, %v585_v49  ;;  %v604_v54 = vrot.slane %v585_v49, 4  ;;  %v617_v55 = vsel %vm578_vm4, %v601_v38, %v616_v51  ;;  %v750_v38 = vpop.permute.xlu2 %749 }
 0x242   : > { %v609_v56 = vperm.slane %v603_v53, %v2323_v42  ;;  %v625_v57 = vperm.slane %v617_v55, %v2323_v42  ;;  %v630_v60 = vrot.slane %v621_v52, 4  ;;  %v763_v48 = vrot.slane %v750_v38, 4 }
 0x243   : > { %v605_v58 = vsel %vm578_vm4, %v597_v40, %v604_v54 }
 0x244   : > { %v613_v59 = vperm.slane %v605_v58, %v2323_v42  ;;  %v632_v61 = vrot.slane %v625_v57, 4  ;;  %v626_v1 = vrot.slane %v609_v56, 4  ;;  %v631_v4 = vsel %vm578_vm4, 0.0, %v630_v60 }
 0x246   : > { %v628_v62 = vrot.slane %v613_v59, 4  ;;  %v633_v63 = vsel %vm578_vm4, 0.0, %v632_v61  ;;  %v645_v0 = vsel %vm578_vm4, %v632_v61, %v621_v52  ;;  %v627_v11 = vsel %vm578_vm4, 0.0, %v626_v1 }
 0x247   : > { %v650_v2 = vrot.slane %v633_v63, 4  ;;  %v649_v3 = vperm.slane %v645_v0, %v2316_v35 }
 0x248   : > { %v629_v5 = vsel %vm578_vm4, 0.0, %v628_v62  ;;  %v634_v6 = vsel %vm578_vm4, %v628_v62, %v609_v56 }
 0x249   : > { %v638_v7 = vperm.slane %v634_v6, %v2316_v35  ;;  %v639_v8 = vrot.slane %v629_v5, 4  ;;  %v651_v9 = vsel %vm578_vm4, %v650_v2, %v631_v4  ;;  %v670_v10 = vrot.slane %v649_v3, 4 }
 0x24a   : > { %v655_v12 = vperm.slane %v651_v9, %v2316_v35 }
 0x24b   : > { %v640_v13 = vsel %vm578_vm4, %v639_v8, %v627_v11  ;;  %v658_v14 = vrot.slane %v638_v7, 4 }
 0x24c   : > { %v644_v15 = vperm.slane %v640_v13, %v2316_v35  ;;  %v671_v16 = vsel %vm578_vm4, %v655_v12, %v670_v10  ;;  %v668_v17 = vrot.slane %v655_v12, 4 }
 0x24d   : > { %v679_v18 = vperm.slane %v671_v16, %v2323_v42 }
 0x24e   : > { %v659_v19 = vsel %vm578_vm4, %v644_v15, %v658_v14  ;;  %v656_v20 = vrot.slane %v644_v15, 4  ;;  %v669_v21 = vsel %vm578_vm4, %v668_v17, %v649_v3 }
 0x24f   : > { %v667_v22 = vperm.slane %v659_v19, %v2323_v42  ;;  %v684_v23 = vrot.slane %v679_v18, 4  ;;  %v675_v24 = vperm.slane %v669_v21, %v2323_v42 }
 0x250   : > { %v657_v26 = vsel %vm578_vm4, %v656_v20, %v638_v7 }
 0x251   : > { %v2361_v28 = vsel %vm578_vm4, %v684_v23, %v667_v22  ;;  %v686_v29 = vrot.slane %v667_v22, 4  ;;  %v663_v30 = vperm.slane %v657_v26, %v2323_v42  ;;  %v680_v32 = vrot.slane %v675_v24, 4 }
 0x253   : > { %v2365_v33 = vsel %vm578_vm4, %v679_v18, %v686_v29  ;;  %v682_v34 = vrot.slane %v663_v30, 4  ;;  %v2368_v36 = vsel %vm578_vm4, %v680_v32, %v663_v30 }
 0x255   : > { %v2371_v37 = vsel %vm578_vm4, %v675_v24, %v682_v34 }
 0x276   : > { %v756_v39 = vpop.permute.xlu2 %755 }
 0x277   : > { %v773_v44 = vrot.slane %v756_v39, 4 }
 0x2a6   : > { %v752_v40 = vpop.permute.xlu0 %751 }
 0x2a7   : > { %v775_v43 = vrot.slane %v752_v40, 4  ;;  %v774_v46 = vsel %vm578_vm4, %v773_v44, %v752_v40 }
 0x2a8   : > { %v780_v49 = vperm.slane %v774_v46, %v2316_v35 }
 0x2a9   : > { %v776_v45 = vsel %vm578_vm4, %v756_v39, %v775_v43 }
 0x2aa   : > { %v784_v47 = vperm.slane %v776_v45, %v2316_v35  ;;  %v785_v56 = vrot.slane %v780_v49, 4 }
 0x2ac   : > { %v797_v53 = vrot.slane %v784_v47, 4 }
 0x2ae   : > { %v754_v50 = vpop.permute.xlu1 %753 }
 0x2af   : > { %v761_v51 = vrot.slane %v754_v50, 4  ;;  %v764_v52 = vsel %vm578_vm4, %v754_v50, %v763_v48 }
 0x2b0   : > { %v772_v54 = vperm.slane %v764_v52, %v2316_v35  ;;  %v566_v52 = vld [vmem:[#allocation7] sm:$0xff] }
 0x2b1   : > { %v762_v55 = vsel %vm578_vm4, %v761_v51, %v750_v38 }
 0x2b2   : > { %v768_v57 = vperm.slane %v762_v55, %v2316_v35  ;;  %v798_v58 = vsel %vm578_vm4, %v797_v53, %v772_v54  ;;  %v799_v59 = vrot.slane %v772_v54, 4 }
 0x2b3   : > { %v804_v60 = vperm.slane %v798_v58, %v2323_v42 }
 0x2b4   : > { %v786_v61 = vsel %vm578_vm4, %v785_v56, %v768_v57  ;;  %v787_v62 = vrot.slane %v768_v57, 4  ;;  %v800_v63 = vsel %vm578_vm4, %v784_v47, %v799_v59 }
 0x2b5   : > { %v792_v0 = vperm.slane %v786_v61, %v2323_v42  ;;  %v808_v1 = vperm.slane %v800_v63, %v2323_v42  ;;  %v813_v4 = vrot.slane %v804_v60, 4 }
 0x2b6   : > { %v788_v2 = vsel %vm578_vm4, %v780_v49, %v787_v62 }
 0x2b7   : > { %v796_v3 = vperm.slane %v788_v2, %v2323_v42  ;;  %v815_v5 = vrot.slane %v808_v1, 4  ;;  %v809_v6 = vrot.slane %v792_v0, 4  ;;  %v814_v13 = vsel %vm578_vm4, 0.0, %v813_v4 }
 0x2b9   : > { %v811_v7 = vrot.slane %v796_v3, 4  ;;  %v816_v8 = vsel %vm578_vm4, 0.0, %v815_v5  ;;  %v828_v9 = vsel %vm578_vm4, %v815_v5, %v804_v60  ;;  %v810_v19 = vsel %vm578_vm4, 0.0, %v809_v6 }
 0x2ba   : > { %v832_v10 = vperm.slane %v828_v9, %v2316_v35  ;;  %v833_v11 = vrot.slane %v816_v8, 4 }
 0x2bb   : > { %v812_v12 = vsel %vm578_vm4, 0.0, %v811_v7  ;;  %v817_v14 = vsel %vm578_vm4, %v811_v7, %v792_v0 }
 0x2bc   : > { %v822_v15 = vrot.slane %v812_v12, 4  ;;  %v834_v16 = vsel %vm578_vm4, %v833_v11, %v814_v13  ;;  %v821_v17 = vperm.slane %v817_v14, %v2316_v35  ;;  %v853_v18 = vrot.slane %v832_v10, 4 }
 0x2bd   : > { %v838_v20 = vperm.slane %v834_v16, %v2316_v35 }
 0x2be   : > { %v823_v21 = vsel %vm578_vm4, %v822_v15, %v810_v19  ;;  %v841_v22 = vrot.slane %v821_v17, 4 }
 0x2bf   : > { %v827_v23 = vperm.slane %v823_v21, %v2316_v35  ;;  %v854_v24 = vsel %vm578_vm4, %v838_v20, %v853_v18  ;;  %v851_v26 = vrot.slane %v838_v20, 4 }
 0x2c0   : > { %v862_v29 = vperm.slane %v854_v24, %v2323_v42 }
 0x2c1   : > { %v842_v30 = vsel %vm578_vm4, %v827_v23, %v841_v22  ;;  %v839_v32 = vrot.slane %v827_v23, 4  ;;  %v852_v34 = vsel %vm578_vm4, %v851_v26, %v832_v10 }
 0x2c2   : > { %v850_v38 = vperm.slane %v842_v30, %v2323_v42  ;;  %v867_v39 = vrot.slane %v862_v29, 4  ;;  %v858_v40 = vperm.slane %v852_v34, %v2323_v42 }
 0x2c3   : > { %v840_v43 = vsel %vm578_vm4, %v839_v32, %v821_v17 }
 0x2c4   : > { %v2409_v44 = vsel %vm578_vm4, %v867_v39, %v850_v38  ;;  %v846_v45 = vperm.slane %v840_v43, %v2323_v42  ;;  %v863_v46 = vrot.slane %v858_v40, 4  ;;  %v869_v50 = vrot.slane %v850_v38, 4 }
 0x2c5   : > { %877 = vrot.lane.b32.xlu1 %v2409_v44, %s2106_s14  ;;  %v1857_v38 = vpack.i.bf16 %v2308_v31, %v2298_v25  ;;  %v1862_v39 = vpack.i.bf16 %v2304_v27, %v2321_v41 }
 0x2c6   : > { %v2415_v47 = vsel %vm578_vm4, %v863_v46, %v846_v45  ;;  %v865_v48 = vrot.slane %v846_v45, 4  ;;  %v2431_v51 = vsel %vm578_vm4, %v862_v29, %v869_v50 }
 0x2c7   : > { %871 = vrot.lane.b32.xlu0 %v2415_v47, %s2106_s14 }
 0x2c8   : > { %v2420_v49 = vsel %vm578_vm4, %v858_v40, %v865_v48  ;;  %v565_v40 = vld [vmem:[#allocation5] sm:$0xff] }
 0x2c9   : > { %874 = vrot.lane.b32.xlu2 %v2420_v49, %s2106_s14  ;;  %v896_v43 = vmul.f32 %v2420_v49, %v565_v40  ;;  %v897_v41 = vmul.f32 %v2409_v44, %v565_v40 }
 0x2cd   : > { %695 = vrot.lane.b32.xlu1 %v2361_v28, %s2106_s14 }
 0x2cf   : > { %698 = vrot.lane.b32.xlu0 %v2365_v33, %s2106_s14 }
 0x2d1   : > { %692 = vrot.lane.b32.xlu2 %v2371_v37, %s2106_s14 }
 0x2d5   : > { %880 = vrot.lane.b32.xlu1 %v2431_v51, %s2106_s14 }
 0x2d9   : > { %689 = vrot.lane.b32.xlu2 %v2368_v36, %s2106_s14 }
 0x2e1   : > { %718 = vrot.lane.b32.xlu2 %v566_v52, %s2107_s1  ;;  %v895_v52 = vmul.f32 %v2415_v47, %v565_v40 }
 0x323   : > { %v875_v53 = vpop.permute.xlu2 %874 }
 0x324   : > { %v876_v54 = vsel %vm688_vm5, %v875_v53, %v2420_v49 }
 0x325   : > { %885 = vrot.lane.b32.xlu0 %v876_v54, %s2106_s14 }
 0x32b   : > { %v693_v55 = vpop.permute.xlu2 %692 }
 0x32c   : > { %v694_v56 = vsel %vm688_vm5, %v693_v55, %v2371_v37 }
 0x32d   : > { %703 = vrot.lane.b32.xlu2 %v694_v56, %s2106_s14 }
 0x333   : > { %v690_v57 = vpop.permute.xlu2 %689 }
 0x334   : > { %v691_v58 = vsel %vm688_vm5, %v690_v57, %v2368_v36  ;;  %v715_v57 = vmul.f32 %v2361_v28, %v565_v40 }
 0x335   : > { %701 = vrot.lane.b32.xlu2 %v691_v58, %s2106_s14  ;;  %v714_v58 = vmul.f32 %v2371_v37, %v565_v40 }
 0x337   : > { %v878_v59 = vpop.permute.xlu1 %877 }
 0x338   : > { %v879_v60 = vsel %vm688_vm5, %v878_v59, %v2409_v44 }
 0x339   : > { %v872_v61 = vpop.permute.xlu0 %871  ;;  %887 = vrot.lane.b32.xlu1 %v879_v60, %s2106_s14 }
 0x33a   : > { %v873_v62 = vsel %vm688_vm5, %v872_v61, %v2415_v47 }
 0x33b   : > { %883 = vrot.lane.b32.xlu0 %v873_v62, %s2106_s14  ;;  %v719_v6 = vpop.permute.xlu2 %718 }
 0x33f   : > { %v696_v63 = vpop.permute.xlu1 %695 }
 0x340   : > { %v697_v0 = vsel %vm688_vm5, %v696_v63, %v2361_v28 }
 0x341   : > { %v699_v1 = vpop.permute.xlu0 %698  ;;  %705 = vrot.lane.b32.xlu1 %v697_v0, %s2106_s14  ;;  %v713_v0 = vmul.f32 %v2368_v36, %v565_v40 }
 0x342   : > { %v700_v2 = vsel %vm688_vm5, %v699_v1, %v2365_v33 }
 0x343   : > { %707 = vrot.lane.b32.xlu0 %v700_v2, %s2106_s14 }
 0x347   : > { %v881_v3 = vpop.permute.xlu1 %880 }
 0x348   : > { %v882_v4 = vsel %vm688_vm5, %v881_v3, %v2431_v51 }
 0x349   : > { %889 = vrot.lane.b32.xlu1 %v882_v4, %s2106_s14 }
 0x387   : > { %v704_v11 = vpop.permute.xlu2 %703 }
 0x388   : > { %v710_v16 = vsel %vm688_vm5, %v704_v11, %v2371_v37 }
 0x389   : > { %v722_v19 = vmul.f32 %v719_v6, %v710_v16 }
 0x38f   : > { %v702_v23 = vpop.permute.xlu2 %701 }
 0x390   : > { %v709_v26 = vsel %vm688_vm5, %v702_v23, %v2368_v36 }
 0x391   : > { %v721_v32 = vmul.f32 %v719_v6, %v709_v26 }
 0x397   : > { %v886_v5 = vpop.permute.xlu0 %885 }
 0x398   : > { %v892_v7 = vsel %vm688_vm5, %v886_v5, %v2420_v49 }
 0x399   : > { %v900_v8 = vmul.f32 %v892_v7, %v719_v6 }
 0x39b   : > { %909 = vrot.lane.b32.xlu2 %v900_v8, %s2108_s4 }
 0x3ab   : > { %v888_v9 = vpop.permute.xlu1 %887 }
 0x3ac   : > { %v893_v10 = vsel %vm688_vm5, %v888_v9, %v2409_v44  ;;  %v898_v44 = vmul.f32 %v2431_v51, %v565_v40 }
 0x3ad   : > { %v901_v12 = vmul.f32 %v893_v10, %v719_v6  ;;  %v884_v13 = vpop.permute.xlu0 %883 }
 0x3ae   : > { %v891_v14 = vsel %vm688_vm5, %v884_v13, %v2415_v47 }
 0x3af   : > { %v899_v15 = vmul.f32 %v891_v14, %v719_v6  ;;  %911 = vrot.lane.b32.xlu1 %v901_v12, %s2108_s4 }
 0x3b1   : > { %907 = vrot.lane.b32.xlu2 %v899_v15, %s2108_s4 }
 0x3b3   : > { %v706_v17 = vpop.permute.xlu1 %705 }
 0x3b4   : > { %v711_v18 = vsel %vm688_vm5, %v706_v17, %v2361_v28 }
 0x3b5   : > { %v723_v20 = vmul.f32 %v719_v6, %v711_v18  ;;  %v708_v21 = vpop.permute.xlu0 %707 }
 0x3b6   : > { %v712_v22 = vsel %vm688_vm5, %v708_v21, %v2365_v33 }
 0x3b7   : > { %v724_v24 = vmul.f32 %v719_v6, %v712_v22  ;;  %733 = vrot.lane.b32.xlu0 %v723_v20, %s2108_s4  ;;  %731 = vrot.lane.b32.xlu1 %v722_v19, %s2108_s4 }
 0x3b9   : > { %735 = vrot.lane.b32.xlu2 %v724_v24, %s2108_s4 }
 0x3bb   : > { %v890_v29 = vpop.permute.xlu1 %889 }
 0x3bc   : > { %v894_v30 = vsel %vm688_vm5, %v890_v29, %v2431_v51 }
 0x3bd   : > { %v902_v34 = vmul.f32 %v894_v30, %v719_v6  ;;  %v716_v6 = vmul.f32 %v2365_v33, %v565_v40 }
 0x3bf   : > { %913 = vrot.lane.b32.xlu0 %v902_v34, %s2108_s4  ;;  %729 = vrot.lane.b32.xlu1 %v721_v32, %s2108_s4 }
 0x3c7   : > { %1858 = vrot.lane.b32.xlu0 %v1857_v38, %s2109_s5  ;;  %1863 = vrot.lane.b32.xlu1 %v1862_v39, %s2109_s5 }
 0x3f5   : > { %v910_v45 = vpop.permute.xlu2 %909 }
 0x3f6   : > { %v920_v46 = vadd.f32 %v910_v45, %v896_v43 }
 0x3f8   : > { %v924_v48 = vpack.c.bf16 %v920_v46, %v920_v46 }
 0x3fa   : > { %v1077_v50 = vsel %vm1053_vm6, %v924_v48, 0 }
 0x3fb   : > { %1086 = vmatpush.bf16.xpose.msra.mxu2 %v1077_v50 }
 0x40b   : > { %v908_v53 = vpop.permute.xlu2 %907 }
 0x40c   : > { %v919_v25 = vadd.f32 %v908_v53, %v895_v52 }
 0x40e   : > { %v923_v31 = vpack.c.bf16 %v919_v25, %v919_v25 }
 0x410   : > { %v1058_v27 = vsel %vm1053_vm6, %v923_v31, 0 }
 0x411   : > { %1067 = vmatpush.bf16.xpose.msra.mxu1 %v1058_v27 }
 0x413   : > { %v736_v4 = vpop.permute.xlu2 %735 }
 0x414   : > { %v744_v8 = vadd.f32 %v736_v4, %v716_v6 }
 0x416   : > { %v748_v13 = vpack.c.bf16 %v744_v8, %v744_v8 }
 0x421   : > { %v912_v54 = vpop.permute.xlu1 %911 }
 0x422   : > { %v921_v55 = vadd.f32 %v912_v54, %v897_v41 }
 0x424   : > { %v925_v49 = vpack.c.bf16 %v921_v55, %v921_v55 }
 0x426   : > { %v1096_v56 = vsel %vm1053_vm6, %v925_v49, 0 }
 0x427   : > { %1105 = vmatpush.bf16.xpose.msra.mxu3 %v1096_v56 }
 0x429   : > { %v734_v59 = vpop.permute.xlu0 %733  ;;  %v732_v47 = vpop.permute.xlu1 %731 }
 0x42a   : > { %v743_v60 = vadd.f32 %v734_v59, %v715_v57  ;;  %v742_v61 = vadd.f32 %v732_v47, %v714_v58 }
 0x42c   : > { %v747_v62 = vpack.c.bf16 %v743_v60, %v743_v60  ;;  %v746_v63 = vpack.c.bf16 %v742_v61, %v742_v61 }
 0x42e   : > { %1706 = vmatmul.msk.bf16.vlgmr.msra.gmra.mxu2 %vm1053_vm6, %v746_v63  ;;  %1707 = vmatmul.msk.bf16.vlgmr.msra.gmra.mxu3 %vm1053_vm6, %v747_v62 }
 0x431   : > { %v914_v1 = vpop.permute.xlu0 %913  ;;  %v730_v2 = vpop.permute.xlu1 %729 }
 0x432   : > { %v922_v3 = vadd.f32 %v914_v1, %v898_v44  ;;  %v741_v28 = vadd.f32 %v730_v2, %v713_v0 }
 0x434   : > { %v926_v37 = vpack.c.bf16 %v922_v3, %v922_v3  ;;  %v745_v5 = vpack.c.bf16 %v741_v28, %v741_v28 }
 0x436   : > { %1705 = vmatmul.msk.bf16.vlgmr.msra.gmra.mxu1 %vm1053_vm6, %v745_v5  ;;  %v1115_v7 = vsel %vm1053_vm6, %v926_v37, 0 }
 0x437   : > { %1124 = vmatpush.bf16.xpose.msrb.mxu0 %v1115_v7 }
 0x439   : > { %v1859_v9 = vpop.permute.xlu0 %1858  ;;  %v1864_v10 = vpop.permute.xlu1 %1863 }
 0x43a   : > { %v1861_v51 = vunpack.i.h.bf16 %v1859_v9  ;;  %v1860_v11 = vunpack.i.l.bf16 %v1859_v9  ;;  %v1866_v36 = vunpack.i.h.bf16 %v1864_v10  ;;  %v1865_v12 = vunpack.i.l.bf16 %v1864_v10 }
 0x43c   : > { %v953_v14 = vrot.slane %v1861_v51, 4  ;;  %v941_v15 = vrot.slane %v1860_v11, 4  ;;  %v951_v16 = vrot.slane %v1866_v36, 4  ;;  %v939_v17 = vrot.slane %v1865_v12, 4 }
 0x43e   : > { %v952_v18 = vsel %vm578_vm4, %v951_v16, %v1861_v51  ;;  %v954_v33 = vsel %vm578_vm4, %v1866_v36, %v953_v14  ;;  %v940_v19 = vsel %vm578_vm4, %v939_v17, %v1860_v11  ;;  %v942_v20 = vsel %vm578_vm4, %v1865_v12, %v941_v15  ;;  %1708 = vmatmul.msk.bf16.vlgmr.msrb.gmra.mxu0 %vm1053_vm6, %v748_v13 }
 0x43f   : > { %v958_v21 = vperm.slane %v952_v18, %v2316_v35  ;;  %v962_v22 = vperm.slane %v954_v33, %v2316_v35  ;;  %v946_v23 = vperm.slane %v940_v19, %v2316_v35  ;;  %v950_v24 = vperm.slane %v942_v20, %v2316_v35 }
 0x441   : > { %v963_v26 = vrot.slane %v958_v21, 4  ;;  %v975_v29 = vrot.slane %v962_v22, 4  ;;  %v965_v30 = vrot.slane %v946_v23, 4  ;;  %v977_v32 = vrot.slane %v950_v24, 4 }
 0x443   : > { %v964_v34 = vsel %vm578_vm4, %v963_v26, %v946_v23  ;;  %v966_v38 = vsel %vm578_vm4, %v958_v21, %v965_v30  ;;  %v976_v39 = vsel %vm578_vm4, %v975_v29, %v950_v24  ;;  %v978_v40 = vsel %vm578_vm4, %v962_v22, %v977_v32 }
 0x444   : > { %v970_v43 = vperm.slane %v964_v34, %v2323_v42  ;;  %v974_v45 = vperm.slane %v966_v38, %v2323_v42  ;;  %v982_v46 = vperm.slane %v976_v39, %v2323_v42  ;;  %v986_v48 = vperm.slane %v978_v40, %v2323_v42 }
 0x446   : > { %v987_v50 = vrot.slane %v970_v43, 4  ;;  %v989_v52 = vrot.slane %v974_v45, 4  ;;  %v991_v53 = vrot.slane %v982_v46, 4  ;;  %v993_v25 = vrot.slane %v986_v48, 4 }
 0x448   : > { %v990_v31 = vsel %vm578_vm4, 0.0, %v989_v52  ;;  %v994_v27 = vsel %vm578_vm4, 0.0, %v993_v25  ;;  %v1006_v41 = vsel %vm578_vm4, %v993_v25, %v982_v46  ;;  %v995_v49 = vsel %vm578_vm4, %v989_v52, %v970_v43 }
 0x449   : > { %v1000_v54 = vrot.slane %v990_v31, 4  ;;  %v1011_v55 = vrot.slane %v994_v27, 4  ;;  %v992_v56 = vsel %vm578_vm4, 0.0, %v991_v53  ;;  %v988_v57 = vsel %vm578_vm4, 0.0, %v987_v50 }
 0x44a   : > { %v999_v58 = vperm.slane %v995_v49, %v2316_v35  ;;  %v1010_v59 = vperm.slane %v1006_v41, %v2316_v35 }
 0x44b   : > { %v1001_v47 = vsel %vm578_vm4, %v1000_v54, %v988_v57  ;;  %v1012_v60 = vsel %vm578_vm4, %v1011_v55, %v992_v56 }
 0x44c   : > { %v1005_v61 = vperm.slane %v1001_v47, %v2316_v35  ;;  %v1016_v62 = vperm.slane %v1012_v60, %v2316_v35  ;;  %v1019_v63 = vrot.slane %v999_v58, 4  ;;  %v1031_v44 = vrot.slane %v1010_v59, 4 }
 0x44e   : > { %v1020_v0 = vsel %vm578_vm4, %v1005_v61, %v1019_v63  ;;  %v1032_v1 = vsel %vm578_vm4, %v1016_v62, %v1031_v44  ;;  %v1017_v2 = vrot.slane %v1005_v61, 4  ;;  %v1029_v3 = vrot.slane %v1016_v62, 4 }
 0x44f   : > { %v1028_v28 = vperm.slane %v1020_v0, %v2323_v42  ;;  %v1040_v4 = vperm.slane %v1032_v1, %v2323_v42 }
 0x450   : > { %v1018_v37 = vsel %vm578_vm4, %v1017_v2, %v999_v58  ;;  %v1030_v5 = vsel %vm578_vm4, %v1029_v3, %v1010_v59 }
 0x451   : > { %v1045_v6 = vrot.slane %v1040_v4, 4  ;;  %v1047_v7 = vrot.slane %v1028_v28, 4  ;;  %v1024_v8 = vperm.slane %v1018_v37, %v2323_v42  ;;  %v1036_v9 = vperm.slane %v1030_v5, %v2323_v42 }
 0x453   : > { %v1046_v10 = vsel %vm578_vm4, %v1045_v6, %v1028_v28  ;;  %v1048_v51 = vsel %vm578_vm4, %v1040_v4, %v1047_v7  ;;  %v1041_v11 = vrot.slane %v1036_v9, 4  ;;  %v1043_v36 = vrot.slane %v1024_v8, 4 }
 0x454   : > { %v1051_v12 = vpack.c.bf16 %v1046_v10, %v1046_v10  ;;  %v1052_v13 = vpack.c.bf16 %v1048_v51, %v1048_v51 }
 0x455   : > { %v1042_v14 = vsel %vm578_vm4, %v1041_v11, %v1024_v8  ;;  %v1044_v15 = vsel %vm578_vm4, %v1036_v9, %v1043_v36 }
 0x456   : > { %v1213_v16 = vsel %vm1173_vm7, %v1051_v12, 0  ;;  %v1232_v17 = vsel %vm1173_vm7, %v1052_v13, 0  ;;  %v1049_v18 = vpack.c.bf16 %v1042_v14, %v1042_v14  ;;  %v1050_v33 = vpack.c.bf16 %v1044_v15, %v1044_v15 }
 0x457   : > { %1222 = vmatpush.bf16.msrb.mxu3 %v1213_v16  ;;  %1241 = vmatpush.bf16.msra.mxu0 %v1232_v17 }
 0x458   : > { %v1175_v19 = vsel %vm1173_vm7, %v1049_v18, 0  ;;  %v1194_v20 = vsel %vm1173_vm7, %v1050_v33, 0 }
 0x459   : > { %1184 = vmatpush.bf16.msrb.mxu1 %v1175_v19  ;;  %1203 = vmatpush.bf16.msrb.mxu2 %v1194_v20 }
 0x4b1   : > { %v1088_v21 = vpop.f32.mrf.mxu2  ;;  %v1107_v22 = vpop.f32.mrf.mxu3 }
 0x4b2   : > { %v1136_v23 = vsel %vm1053_vm6, %v1107_v22, -inf  ;;  %v1133_v24 = vsel %vm1053_vm6, %v1088_v21, -inf }
 0x4b3   : > { %1137 = vmax.xlane.f32.xlu2 %v1136_v23  ;;  %1134 = vmax.xlane.f32.xlu0 %v1133_v24  ;;  %v1069_v26 = vpop.f32.mrf.mxu1 }
 0x4b4   : > { %v1130_v29 = vsel %vm1053_vm6, %v1069_v26, -inf }
 0x4b5   : > { %1131 = vmax.xlane.f32.xlu1 %v1130_v29 }
 0x4b9   : > { %v1090_v30 = vpop.f32.mrf.mxu2  ;;  %v1109_v32 = vpop.f32.mrf.mxu3 }
 0x4bb   : > { %v1071_v34 = vpop.f32.mrf.mxu1  ;;  %v1126_v38 = vpop.f32.mrf.mxu0 }
 0x4bc   : > { %v1139_v39 = vsel %vm1053_vm6, %v1126_v38, -inf }
 0x4bd   : > { %1140 = vmax.xlane.f32.xlu2 %v1139_v39 }
 0x4c3   : > { %v1128_v40 = vpop.f32.mrf.mxu0 }
 0x526   : > { %v1135_v43 = vpop.xlane.xlu0 %1134  ;;  %v1138_v45 = vpop.xlane.xlu2 %1137 }
 0x527   : > { %v1143_v46 = vsub.f32 %v1088_v21, %v1135_v43  ;;  %v1144_v48 = vsub.f32 %v1107_v22, %v1138_v45 }
 0x528   : > { %v1132_v50 = vpop.xlane.xlu1 %1131 }
 0x529   : > { %v1148_v52 = vmul.f32 1.442695, %v1143_v46  ;;  %v1150_v53 = vmul.f32 1.442695, %v1144_v48  ;;  %v1142_v25 = vsub.f32 %v1069_v26, %v1132_v50 }
 0x52b   : > { %1875 = vpow2.f32 %v1148_v52  ;;  %v1146_v31 = vmul.f32 1.442695, %v1142_v25 }
 0x52c   : > { %1877 = vpow2.f32 %v1150_v53 }
 0x52d   : > { %1879 = vpow2.f32 %v1146_v31 }
 0x530   : > { %v1141_v27 = vpop.xlane.xlu2 %1140 }
 0x531   : > { %v1876_v41 = vpop.eup %1875  ;;  %v1145_v54 = vsub.f32 %v1126_v38, %v1141_v27 }
 0x532   : > { %v1878_v55 = vpop.eup %1877  ;;  %v1167_v49 = vpack.c.bf16 %v1876_v41, %v1876_v41  ;;  %v1157_v62 = vsel %vm1053_vm6, %v1876_v41, 0.0 }
 0x533   : > { %v1880_v56 = vpop.eup %1879  ;;  %v1152_v57 = vmul.f32 1.442695, %v1145_v54  ;;  %v1160_v58 = vsel %vm1053_vm6, %v1878_v55, 0.0  ;;  %v1168_v59 = vpack.c.bf16 %v1878_v55, %v1878_v55 }
 0x534   : > { %1161 = vadd.xlane.f32.xlu0 %v1160_v58  ;;  %1710 = vmatmul.msk.bf16.vlgmr.msrb.gmra.mxu2 %vm1053_vm6, %v1167_v49  ;;  %v1154_v47 = vsel %vm1053_vm6, %v1880_v56, 0.0  ;;  %v1166_v60 = vpack.c.bf16 %v1880_v56, %v1880_v56 }
 0x535   : > { %1881 = vpow2.f32 %v1152_v57  ;;  %1711 = vmatmul.msk.bf16.vlgmr.msrb.gmra.mxu3 %vm1053_vm6, %v1168_v59  ;;  %1155 = vadd.xlane.f32.xlu2 %v1154_v47 }
 0x536   : > { %1709 = vmatmul.msk.bf16.vlgmr.msrb.gmra.mxu1 %vm1053_vm6, %v1166_v60 }
 0x53b   : > { %v1882_v61 = vpop.eup %1881 }
 0x53c   : > { %v1169_v63 = vpack.c.bf16 %v1882_v61, %v1882_v61  ;;  %1158 = vadd.xlane.f32.xlu0 %v1157_v62  ;;  %v1163_v44 = vsel %vm1053_vm6, %v1882_v61, 0.0 }
 0x53d   : > { %1164 = vadd.xlane.f32.xlu1 %v1163_v44 }
 0x53e   : > { %1712 = vmatmul.msk.bf16.vlgmr.msra.gmra.mxu0 %vm1053_vm6, %v1169_v63 }
 0x5a7   : > { %v1162_v0 = vpop.xlane.xlu0 %1161 }
 0x5a8   : > { %v1156_v1 = vpop.xlane.xlu2 %1155 }
 0x5a9   : > { %1883 = vrcp.f32 %v1156_v1 }
 0x5af   : > { %v1159_v2 = vpop.xlane.xlu0 %1158  ;;  %v1884_v4 = vpop.eup %1883 }
 0x5b0   : > { %1885 = vrcp.f32 %v1159_v2  ;;  %v1165_v3 = vpop.xlane.xlu1 %1164 }
 0x5b1   : > { %1887 = vrcp.f32 %v1162_v0 }
 0x5b2   : > { %1889 = vrcp.f32 %v1165_v3 }
 0x5b3   : > { %v1186_v28 = vpop.f32.mrf.mxu1 }
 0x5b4   : > { %v1251_v37 = vmul.f32 %v1884_v4, %v1186_v28 }
 0x5b6   : > { %v1886_v5 = vpop.eup %1885  ;;  %v1257_v10 = vrot.slane %v1251_v37, 4 }
 0x5b7   : > { %v1205_v6 = vpop.f32.mrf.mxu2  ;;  %v1888_v7 = vpop.eup %1887 }
 0x5b8   : > { %v1252_v8 = vmul.f32 %v1886_v5, %v1205_v6  ;;  %v1224_v9 = vpop.f32.mrf.mxu3  ;;  %v1890_v11 = vpop.eup %1889 }
 0x5b9   : > { %v1253_v51 = vmul.f32 %v1888_v7, %v1224_v9 }
 0x5ba   : > { %v1269_v15 = vrot.slane %v1252_v8, 4 }
 0x5bb   : > { %v1255_v36 = vrot.slane %v1253_v51, 4  ;;  %v1258_v12 = vsel %vm578_vm4, %v1253_v51, %v1257_v10  ;;  %v1188_v13 = vpop.f32.mrf.mxu1  ;;  %v1243_v14 = vpop.f32.mrf.mxu0 }
 0x5bc   : > { %v1266_v16 = vperm.slane %v1258_v12, %v2316_v35  ;;  %v1254_v17 = vmul.f32 %v1890_v11, %v1243_v14 }
 0x5bd   : > { %v1256_v18 = vsel %vm578_vm4, %v1255_v36, %v1251_v37 }
 0x5be   : > { %v1262_v33 = vperm.slane %v1256_v18, %v2316_v35  ;;  %v1267_v19 = vrot.slane %v1254_v17, 4  ;;  %v1270_v20 = vsel %vm578_vm4, %v1254_v17, %v1269_v15  ;;  %v1293_v21 = vrot.slane %v1266_v16, 4  ;;  %v1754_v15 = vld [vmem:[%s2674_s6] sm:$0xff] }
 0x5bf   : > { %v1278_v22 = vperm.slane %v1270_v20, %v2316_v35  ;;  %v1207_v23 = vpop.f32.mrf.mxu2 }
 0x5c0   : > { %v1268_v24 = vsel %vm578_vm4, %v1267_v19, %v1252_v8  ;;  %v1226_v26 = vpop.f32.mrf.mxu3  ;;  %v1281_v29 = vrot.slane %v1262_v33, 4  ;;  %v1897_v23 = vld [vmem:[%s2283_s27] sm:$0xff]  ;;  %s1749_s27 = sshll.u32 %s2204_s29, 3  ;;  %s1567_s29 = scalar_lea.sflag [#allocation4], %s490_s23 }
 0x5c1   : > { %v1274_v30 = vperm.slane %v1268_v24, %v2316_v35  ;;  %v1291_v32 = vrot.slane %v1278_v22, 4  ;;  %v1294_v34 = vsel %vm578_vm4, %v1278_v22, %v1293_v21  ;;  %s1577_s22 = scalar_lea.hbm %s2681_s13, %s1749_s27 }
 0x5c2   : > { %v1302_v38 = vperm.slane %v1294_v34, %v2323_v42  ;;  %s1581_s4 = sshll.u32 %s1577_s22, 4  ;;  %s1582_s4 = int_to_ptr.hbm [resolvable:$true] %s1581_s4 }
 0x5c3   : > { %v1279_v39 = vrot.slane %v1274_v30, 4  ;;  %v1282_v40 = vsel %vm578_vm4, %v1274_v30, %v1281_v29  ;;  %v1292_v43 = vsel %vm578_vm4, %v1291_v32, %v1266_v16  ;;  %v1245_v45 = vpop.f32.mrf.mxu0  ;;  %s2032_s5 = sshra.s32 %s1582_s4, 4  ;;  %s2033_s5 = int_to_ptr.hbm [resolvable:$true] %s2032_s5 }
 0x5c4   : > { %v1290_v46 = vperm.slane %v1282_v40, %v2323_v42  ;;  %v1298_v48 = vperm.slane %v1292_v43, %v2323_v42  ;;  %v1309_v50 = vrot.slane %v1302_v38, 4  ;;  %v1757_v40 = vld [vmem:[#allocation8 + $0x8] sm:$0xff]  ;;  %v1756_v43 = vld [vmem:[#allocation8] sm:$0xff]  ;;  %p2039_p3 = scmp.lt.s32.totalorder %s2033_s5, %s2681_s13 }
 0x5c5   : > { %v1280_v52 = vsel %vm578_vm4, %v1279_v39, %v1262_v33  ;;  %1477 = vmatpush.bf16.msra.mxu2 %v1757_v40 }
 0x5c6   : > { %v1286_v53 = vperm.slane %v1280_v52, %v2323_v42  ;;  %v1305_v25 = vrot.slane %v1290_v46, 4  ;;  %v1307_v31 = vrot.slane %v1298_v48, 4  ;;  %v1310_v27 = vsel %vm578_vm4, 0.0, %v1309_v50 }
 0x5c7   : > { %v1322_v41 = vsel %vm578_vm4, %v1309_v50, %v1298_v48  ;;  %v1327_v54 = vrot.slane %v1310_v27, 4 }
 0x5c8   : > { %v1306_v55 = vsel %vm578_vm4, 0.0, %v1305_v25  ;;  %v1303_v49 = vrot.slane %v1286_v53, 4  ;;  %v1308_v56 = vsel %vm578_vm4, 0.0, %v1307_v31  ;;  %v1311_v57 = vsel %vm578_vm4, %v1305_v25, %v1286_v53 }
 0x5c9   : > { %v1316_v58 = vrot.slane %v1306_v55, 4  ;;  %v1315_v59 = vperm.slane %v1311_v57, %v2316_v35  ;;  %v1326_v47 = vperm.slane %v1322_v41, %v2316_v35  ;;  %v1328_v60 = vsel %vm578_vm4, %v1327_v54, %v1308_v56  ;;  %1478 = vmatpush.bf16.msra.mxu2 %v1756_v43  ;;  %v1869_v41 = vld [vmem:[%s2675_s7] ss:$0 sm:$0xff] }
 0x5ca   : > { %v1304_v61 = vsel %vm578_vm4, 0.0, %v1303_v49  ;;  %v1332_v62 = vperm.slane %v1328_v60, %v2316_v35  ;;  %v1870_v49 = vld [vmem:[%s2676_s8] ss:$0 sm:$0xff] }
 0x5cb   : > { %v1317_v63 = vsel %vm578_vm4, %v1316_v58, %v1304_v61  ;;  %v1335_v44 = vrot.slane %v1315_v59, 4  ;;  %v1347_v0 = vrot.slane %v1326_v47, 4  ;;  %v1761_v61 = vld [vmem:[%s2679_s11 + $0x18] sm:$0xff] }
 0x5cc   : > { %v1321_v1 = vperm.slane %v1317_v63, %v2316_v35  ;;  %v1345_v2 = vrot.slane %v1332_v62, 4  ;;  %1555 = vmatpush.bf16.msra.mxu3 %v1761_v61 }
 0x5cd   : > { %v1348_v3 = vsel %vm578_vm4, %v1332_v62, %v1347_v0 }
 0x5ce   : > { %v1336_v28 = vsel %vm578_vm4, %v1321_v1, %v1335_v44  ;;  %v1356_v4 = vperm.slane %v1348_v3, %v2323_v42  ;;  %v1333_v37 = vrot.slane %v1321_v1, 4  ;;  %v1346_v5 = vsel %vm578_vm4, %v1345_v2, %v1326_v47  ;;  %v1760_v44 = vld [vmem:[%s2679_s11 + $0x10] sm:$0xff]  ;;  %v1759_v3 = vld [vmem:[%s2679_s11 + $0x8] sm:$0xff] }
 0x5cf   : > { %v1344_v6 = vperm.slane %v1336_v28, %v2323_v42  ;;  %v1352_v7 = vperm.slane %v1346_v5, %v2323_v42  ;;  %v1758_v28 = vld [vmem:[%s2679_s11] sm:$0xff] }
 0x5d0   : > { %v1361_v8 = vrot.slane %v1356_v4, 4  ;;  %v1334_v9 = vsel %vm578_vm4, %v1333_v37, %v1315_v59  ;;  %v1871_v59 = vld [vmem:[%s2678_s10] ss:$0 sm:$0xff]  ;;  %1556 = vmatpush.bf16.msra.mxu3 %v1760_v44 }
 0x5d1   : > { %v1363_v10 = vrot.slane %v1344_v6, 4  ;;  %v1340_v35 = vperm.slane %v1334_v9, %v2323_v42  ;;  %v1357_v51 = vrot.slane %v1352_v7, 4  ;;  %v1755_v42 = vld [vmem:[%s2674_s6 + $0x8] sm:$0xff] }
 0x5d2   : > { %v1362_v11 = vsel %vm578_vm4, %v1361_v8, %v1344_v6  ;;  %1408 = vmatpush.bf16.msra.mxu1 %v1755_v42 }
 0x5d3   : > { %1370 = vrot.lane.b32.xlu1 %v1362_v11, %s2110_s25  ;;  %v1364_v36 = vsel %vm578_vm4, %v1356_v4, %v1363_v10  ;;  %v1359_v12 = vrot.slane %v1340_v35, 4  ;;  %v1358_v13 = vsel %vm578_vm4, %v1357_v51, %v1340_v35  ;;  %s2034_s25 = scalar_lea.hbm %s2033_s5, 8 }
 0x5d4   : > { %1374 = vrot.lane.b32.xlu0 %v1364_v36, %s2111_s17  ;;  %1557 = vmatpush.bf16.msra.mxu3 %v1759_v3  ;;  %p2035_p0 = scmp.ne.s32.totalorder %s2033_s5, %s2034_s25  ;;  %p2040_p4 = scmp.lt.s32.totalorder %s2038_s20, %s2034_s25 }
 0x5d5   : > { %v1360_v14 = vsel %vm578_vm4, %v1352_v7, %v1359_v12 }
 0x5d6   : > { %1366 = vrot.lane.b32.xlu2 %v1360_v14, %s2106_s14  ;;  %1409 = vmatpush.bf16.msra.mxu1 %v1754_v15  ;;  %v2112_v15 = vmov -1.0   ;;  %s492_s14 = scalar_lea.vmem [#allocation10], %s1694_s30  ;;  %p2036_p1 = pnand %p2035_p0, %p2221_p5 }
 0x5d7   : > { %s1579_s1 = sshll.u32 %s492_s14, 4  ;;  %p2041_p7 = por %p2040_p4, %p2039_p3  ;;  %s1580_s1 = int_to_ptr.vmem [resolvable:$true] %s1579_s1 }
 0x5d8   : > { %1558 = vmatpush.bf16.msra.mxu3 %v1758_v28  ;;  %p2037_p2 = pneg %p2036_p1 }
 0x5da   : > { %p2042_p8 = pnand %p2041_p7, %p2037_p2 }
 0x630   : > { %v1367_v16 = vpop.permute.xlu2 %1366 }
 0x631   : > { %v1377_v17 = vsel %vm1053_vm6, %v1358_v13, %v1367_v16 }
 0x645   : > { %v1371_v18 = vpop.permute.xlu1 %1370 }
 0x646   : > { %v1379_v33 = vsel %vm1378_vm8, %v1377_v17, %v1371_v18  ;;  %v1375_v19 = vpop.permute.xlu0 %1374 }
 0x647   : > { %v1381_v20 = vsel %vm1380_vm9, %v1379_v33, %v1375_v19 }
 0x648   : > { %v1382_v21 = vpack.c.bf16 %v1381_v20, %v1381_v20 }
 0x64a   : > { %1721 = vmatmul.msk.bf16.vlgmr.msra.gmra.mxu1 %vm501_vm0, %v1382_v21  ;;  %v1872_v21 = vld [vmem:[%s2680_s12] ss:$0 sm:$0xff] }
 0x6c7   : > { %v1411_v22 = vpop.f32.mrf.mxu1 }
 0x6c8   : > { %v2603_v24 = vadd.f32 %v1897_v23, %v1411_v22 }
 0x6ca   : > { %v1417_v26 = vsel %vm501_vm0, %v2603_v24, 0.0 }
 0x6cb   : > { %1418 = vadd.xlane.f32.xlu2 %v1417_v26 }
 0x6cf   : > { %v1413_v29 = vpop.f32.mrf.mxu1 }
 0x73e   : > { %v1419_v30 = vpop.xlane.xlu2 %1418 }
 0x73f   : > { %v1420_v32 = vmul.f32 0.03125, %v1419_v30 }
 0x741   : > { %v1421_v34 = vsub.f32 %v2603_v24, %v1420_v32 }
 0x743   : > { %v1422_v38 = vmul.f32 %v1421_v34, %v1421_v34 }
 0x745   : > { %v1423_v39 = vsel %vm501_vm0, %v1422_v38, 0.0 }
 0x746   : > { %1424 = vadd.xlane.f32.xlu0 %v1423_v39 }
 0x7b9   : > { %v1425_v45 = vpop.xlane.xlu0 %1424 }
 0x7ba   : > { %v1426_v46 = vmul.f32 0.03125, %v1425_v45 }
 0x7bc   : > { %v1427_v48 = vadd.f32 1e-05, %v1426_v46 }
 0x7be   : > { %1891 = vrsqrt.f32 %v1427_v48  ;;  %vm1434_vm11 = vweird.f32 %v1427_v48 }
 0x7c4   : > { %v1892_v50 = vpop.eup %1891 }
 0x7c5   : > { %v1429_v52 = vmul.f32 %v1892_v50, %v1427_v48  ;;  %vm1435_vm10 = vweird.f32 %v1892_v50 }
 0x7c6   : > { %vm1436_vm12 = vmor %vm1434_vm11, %vm1435_vm10 }
 0x7c7   : > { %v1430_v53 = vmul.f32 %v1892_v50, %v1429_v52 }
 0x7c9   : > { %v1431_v25 = vmul.f32 0.5, %v1430_v53 }
 0x7cb   : > { %v1432_v31 = vsub.f32 1.5, %v1431_v25 }
 0x7cd   : > { %v1433_v27 = vmul.f32 %v1892_v50, %v1432_v31 }
 0x7cf   : > { %v1437_v54 = vsel %vm1436_vm12, %v1892_v50, %v1433_v27 }
 0x7d0   : > { %v1438_v55 = vmul.f32 %v1437_v54, %v1421_v34 }
 0x7d2   : > { %v1442_v56 = vmul.f32 %v1869_v41, %v1438_v55 }
 0x7d4   : > { %v1446_v57 = vadd.f32 %v1870_v49, %v1442_v56 }
 0x7d6   : > { %v1447_v58 = vpack.c.bf16 %v1446_v57, %v1446_v57 }
 0x7d8   : > { %1730 = vmatmul.msk.bf16.vlgmr.msra.gmra.mxu2 %vm501_vm0, %v1447_v58 }
 0x85b   : > { %v1480_v47 = vpop.f32.mrf.mxu2 }
 0x85c   : > { %v1481_v60 = vadd.f32 %v1871_v59, %v1480_v47 }
 0x85e   : > { %v1485_v62 = vmul.f32 0.70710677, %v1481_v60  ;;  %v1484_v18 = vmul.f32 0.5, %v1481_v60 }
 0x860   : > { %v1488_v63 = vand.u32 2147483647, %v1485_v62  ;;  %vm1486_vm13 = vcmp.ge.f32.partialorder %v1485_v62, 0.0 }
 0x861   : > { %v1487_v16 = vsel %vm1486_vm13, 1.0, %v2112_v15 }
 0x862   : > { %v1489_v0 = vmul.f32 0.3275911, %v1488_v63  ;;  %v1501_v37 = vsub.f32 0.0, %v1488_v63 }
 0x863   : > { %v1482_v1 = vpop.f32.mrf.mxu2 }
 0x864   : > { %v1490_v2 = vadd.f32 1.0, %v1489_v0  ;;  %v1502_v7 = vmul.f32 %v1501_v37, %v1488_v63 }
 0x866   : > { %1893 = vrcp.f32 %v1490_v2  ;;  %v1503_v10 = vmul.f32 1.442695, %v1502_v7 }
 0x868   : > { %1895 = vpow2.f32 %v1503_v10 }
 0x86c   : > { %v1894_v4 = vpop.eup %1893 }
 0x86d   : > { %v1492_v5 = vmul.f32 1.0614054, %v1894_v4 }
 0x86e   : > { %v1896_v13 = vpop.eup %1895 }
 0x86f   : > { %v1493_v6 = vadd.f32 -1.4531521, %v1492_v5 }
 0x871   : > { %v1494_v8 = vmul.f32 %v1894_v4, %v1493_v6 }
 0x873   : > { %v1495_v9 = vadd.f32 1.4214138, %v1494_v8 }
 0x875   : > { %v1496_v35 = vmul.f32 %v1894_v4, %v1495_v9 }
 0x877   : > { %v1497_v51 = vadd.f32 -0.28449672, %v1496_v35 }
 0x879   : > { %v1498_v11 = vmul.f32 %v1894_v4, %v1497_v51 }
 0x87b   : > { %v1499_v36 = vadd.f32 0.2548296, %v1498_v11 }
 0x87d   : > { %v1500_v12 = vmul.f32 %v1894_v4, %v1499_v36 }
 0x87f   : > { %v1505_v14 = vmul.f32 %v1896_v13, %v1500_v12 }
 0x881   : > { %v1506_v42 = vsub.f32 1.0, %v1505_v14 }
 0x883   : > { %v1507_v17 = vmul.f32 %v1506_v42, %v1487_v16 }
 0x885   : > { %v1508_v33 = vadd.f32 1.0, %v1507_v17 }
 0x887   : > { %v1509_v19 = vmul.f32 %v1508_v33, %v1484_v18 }
 0x889   : > { %v1510_v20 = vpack.c.bf16 %v1509_v19, %v1509_v19 }
 0x88b   : > { %1747 = vmatmul.msk.bf16.vlgmr.msra.gmra.mxu3 %vm1547_vm14, %v1510_v20 }
 0x90e   : > { %v1560_v22 = vpop.f32.mrf.mxu3 }
 0x90f   : > { %v1561_v23 = vadd.f32 %v1872_v21, %v1560_v22 }
 0x911   : > { %v1564_v26 = vadd.f32 %v1561_v23, %v2603_v24 }
 0x913   : > { %1565 = vst.msk [vmem:[%s492_s14] sm:$0xff] %vm501_vm0, %v1564_v26 }
 0x914   : > { %2045 = shalt.err (!%p2042_p8)
}
 0x915   : > { %1778 = dma.vmem_to_hbm [thread:$0]  (%p2221_p5), %s1580_s1, 128, %s1582_s4, %s1567_s29  }
 0x916   : > { %v1562_v24 = vpop.f32.mrf.mxu3 }
 0x917 PF: > { %s2702_s23 = sld [smem:[#allocation15_spill]]  ;;  %p1805_p9 = scmp.ge.s32.totalorder %s2092_s28, 2 }
 0x919   : > { %p1794_p10 = pnand %p1805_p9, %p2225_p6 }
 0x91b   : > { %p1795_p11 = pneg %p1794_p10 }
 0x91d   : > { %s1593_s15 = sand.u32 1, %s2702_s23  }
 0x91e   : > { %s1594_s16 = scalar_lea.sflag [#allocation4], %s1593_s15 }
 0x91f   : > { %2075 = dma.done.wait (%p1795_p11), %s1594_s16, 128  }
 0x920   : > { %2077 = vsyncadd (%p1795_p11), %s1594_s16, 4294967168  ;;  %s2704_s28 = sld [smem:[#allocation17_spill]]  ;;  %s2707_s25 = smov %s2084_s26 }
 0x921   : > { %s2705_s21 = sld [smem:[#allocation16_spill]] }
 0x922   : > { %s2706_s27 = sld [smem:[#allocation18_spill]] }
 0x926   : > { %p26_p12 = scmp.ge.s32.totalorder %s2704_s28, 4  }
 0x927   : > { %s2708_s26 = smov %s2705_s21 }
 0x928   :  { %28 = sbr.rel (!%p26_p12) target bundleno = 10 (0xa), region = 124 }
 0x92d   :  { %1600 = vsyncpa [#allocation3], 1 }
 0x92e   :  { %1602 = vsyncpa [#allocation3 + $0x1], 1 }
 0x92f   :  { %1603 = vsyncpa [#allocation6], 1 }
 0x930   :  { %1604 = vsyncpa [#allocation9], 1 }
 0x931   :  { %1605 = vsyncpa [#allocation4], 1 }
 0x932   :  { %1607 = vsyncpa [#allocation4 + $0x1], 1 }

</bundles_post_ra>
